<compile_context>
chip_gen: v7x
topology: tpu7x:2x2x1
jax: 0.10.0
libtpu: 0.0.40
codegen_flags: <defaults>
</compile_context>

<pallas_src>
import functools

import numpy as np
import jax
import jax.numpy as jnp
from jax.experimental import pallas as pl
from jax.experimental.pallas import tpu as pltpu


# ---------------------------------------------------------------------------
# Small helpers / generation-aware tuning
# ---------------------------------------------------------------------------
def _cdiv(a, b):
    return -(-a // b)


def _round_up(a, b):
    return _cdiv(a, b) * b


def _detect_tpu():
    """(tensorcores_per_chip, vmem_limit_bytes) — generation aware."""
    try:
        kind = jax.devices()[0].device_kind.lower()
    except Exception:  # pragma: no cover - defensive
        kind = ""
    if "7" in kind:                       # v7x: 2 TCs/chip, 64 MiB VMEM per TC
        return 2, 56 * 1024 * 1024
    return 1, 96 * 1024 * 1024            # v5e/v6e: 1 TC, 128 MiB VMEM


_TPU_CORES, _VMEM_LIMIT = _detect_tpu()


def _choose_tm(m):
    """Row-tile size.  Single-TC chips: one big tile (<=512 rows) — no forced
    split.  v7x: an even number of tiles so both TensorCores get equal work."""
    steps = _cdiv(m, 512)                          # target <= 512 rows / tile
    if _TPU_CORES > 1 and m > 128:
        steps = max(2, steps + (steps % 2))        # even step count for 2 TCs
    return _round_up(_cdiv(m, steps), 8)


def _compiler_params(ndim=1):
    return pltpu.CompilerParams(
        dimension_semantics=("parallel",) * ndim,
        vmem_limit_bytes=_VMEM_LIMIT,
    )


def _pad_cols(x, kpad):
    """Zero-pad the last dim (the matmul K) up to the weight's padded K."""
    k = x.shape[-1]
    if k == kpad:
        return x
    pad = [(0, 0)] * (x.ndim - 1) + [(0, kpad - k)]
    return jnp.pad(x, pad)


def _pad_rows(x, tm):
    m = x.shape[0]
    mp = _round_up(m, tm)
    if mp != m:
        x = jnp.pad(x, ((0, mp - m), (0, 0)))
    return x, m, mp


# ---------------------------------------------------------------------------
# Pallas kernels
# ---------------------------------------------------------------------------
def _matmul_bias_act_kernel(x_ref, w_ref, bias_ref, o_ref, *, relu):
    """Conv-as-matmul: bf16 operands on the MXU, f32 accumulate, f32 epilogue
    (+bias with BN scale already folded into w, optional ReLU)."""
    acc = jnp.dot(x_ref[...], w_ref[...], preferred_element_type=jnp.float32)
    acc = acc + bias_ref[...]
    if relu:
        acc = jnp.maximum(acc, 0.0)
    o_ref[...] = acc.astype(o_ref.dtype)


def _aspp_kernel(p1_ref, pd_ref, pool_ref, wb1_ref, wbd_ref, wb5_ref,
                 bbcat_ref, bb5_ref, wp_ref, wp5_ref, bp_ref, o_ref):
    """Whole ASPP block for one (image, row-tile):
       - branches 1x1 / d6 / d12 / d18 write DISJOINT 32-lane segments of a
         [TM, 128] buffer (their weights are column-offset), so the channel
         concat is a plain elementwise sum;
       - one merged K=128 projection matmul replaces the 5 per-branch ones;
       - the image-pooling branch is a single [1,128] row, broadcast-added."""
    z = jnp.dot(p1_ref[0], wb1_ref[...], preferred_element_type=jnp.float32)
    for i in range(3):                                  # dilated 3x3 branches
        z = z + jnp.dot(pd_ref[i, 0], wbd_ref[i],
                        preferred_element_type=jnp.float32)
    t = jnp.maximum(z + bbcat_ref[...], 0.0).astype(jnp.bfloat16)   # [TM,128]
    acc = jnp.dot(t, wp_ref[...], preferred_element_type=jnp.float32)  # [TM,32]

    # image-pooling branch: one row per image, computed once per tile.
    z5 = jnp.dot(pool_ref[0], wb5_ref[...], preferred_element_type=jnp.float32)
    t5 = jnp.maximum(z5 + bb5_ref[...], 0.0).astype(jnp.bfloat16)    # [1,128]
    c5 = jnp.dot(t5, wp5_ref[...], preferred_element_type=jnp.float32)  # [1,32]

    out = jnp.maximum(acc + c5 + bp_ref[...], 0.0)
    o_ref[0] = out.astype(o_ref.dtype)


def _dec_cls_kernel(p_ref, w2_ref, b2_ref, wc_ref, bc_ref, o_ref):
    """dec2 (3x3 conv + BN + ReLU) chained with the 1x1 classifier; the
    intermediate stays in VMEM/registers and only 3 class lanes are stored."""
    t = jnp.dot(p_ref[...], w2_ref[...], preferred_element_type=jnp.float32)
    t = jnp.maximum(t + b2_ref[...], 0.0).astype(jnp.bfloat16)
    o = jnp.dot(t, wc_ref[...], preferred_element_type=jnp.float32) + bc_ref[...]
    o_ref[...] = o


# ---------------------------------------------------------------------------
# Pallas wrappers
# ---------------------------------------------------------------------------
def fused_matmul_bias(x, w, bias, *, relu, out_dtype=jnp.bfloat16):
    """act(x @ w + bias).  x:[M,Kpad] bf16, w:[Kpad,N] bf16 (Kpad multiple of
    128, BN folded), bias:[1,N] f32.  M is padded to the tile and sliced back."""
    M, K = x.shape
    Kw, N = w.shape
    assert K == Kw and K % 128 == 0, (K, Kw)
    TM = _choose_tm(M)
    x, m_real, Mp = _pad_rows(x, TM)
    kernel = functools.partial(_matmul_bias_act_kernel, relu=relu)
    out = pl.pallas_call(
        kernel,
        out_shape=jax.ShapeDtypeStruct((Mp, N), out_dtype),
        grid=(Mp // TM,),
        in_specs=[
            pl.BlockSpec((TM, K), lambda i: (i, 0)),
            pl.BlockSpec((K, N), lambda i: (0, 0)),
            pl.BlockSpec((1, N), lambda i: (0, 0)),
        ],
        out_specs=pl.BlockSpec((TM, N), lambda i: (i, 0)),
        compiler_params=_compiler_params(1),
    )(x, w, bias)
    return out[:m_real] if Mp != m_real else out


def aspp_fused(high, ap):
    """Whole ASPP block (5 branches + merged projection) in one tiled call."""
    nb, hh, wh, c = high.shape
    m_img = hh * wh
    k1p = ap["wb1"].shape[0]                    # 128
    kdp = ap["wbd"].shape[1]                    # 512
    nout = ap["wp"].shape[1]                    # 32

    p1 = _pad_cols(high.reshape(nb * m_img, c), k1p).reshape(nb, m_img, k1p)
    pd = jnp.stack(
        [_pad_cols(im2col(high, 3, 1, d).reshape(nb * m_img, 9 * c), kdp)
         .reshape(nb, m_img, kdp) for d in (6, 12, 18)], axis=0)
    pooled = jnp.mean(high.astype(jnp.float32), axis=(1, 2)).astype(jnp.bfloat16)
    pooled = _pad_cols(pooled, k1p).reshape(nb, 1, k1p)   # once per image

    TM = _choose_tm(m_img)
    mp = _round_up(m_img, TM)
    if mp != m_img:
        p1 = jnp.pad(p1, ((0, 0), (0, mp - m_img), (0, 0)))
        pd = jnp.pad(pd, ((0, 0), (0, 0), (0, mp - m_img), (0, 0)))

    out = pl.pallas_call(
        _aspp_kernel,
        out_shape=jax.ShapeDtypeStruct((nb, mp, nout), jnp.bfloat16),
        grid=(nb, mp // TM),
        in_specs=[
            pl.BlockSpec((1, TM, k1p), lambda b, t: (b, t, 0)),
            pl.BlockSpec((3, 1, TM, kdp), lambda b, t: (0, b, t, 0)),
            pl.BlockSpec((1, 1, k1p), lambda b, t: (b, 0, 0)),
            pl.BlockSpec(ap["wb1"].shape, lambda b, t: (0, 0)),
            pl.BlockSpec(ap["wbd"].shape, lambda b, t: (0, 0, 0)),
            pl.BlockSpec(ap["wb5"].shape, lambda b, t: (0, 0)),
            pl.BlockSpec(ap["bbcat"].shape, lambda b, t: (0, 0)),
            pl.BlockSpec(ap["bb5"].shape, lambda b, t: (0, 0)),
            pl.BlockSpec(ap["wp"].shape, lambda b, t: (0, 0)),
            pl.BlockSpec(ap["wp5"].shape, lambda b, t: (0, 0)),
            pl.BlockSpec(ap["bp"].shape, lambda b, t: (0, 0)),
        ],
        out_specs=pl.BlockSpec((1, TM, nout), lambda b, t: (b, t, 0)),
        compiler_params=_compiler_params(2),
    )(p1, pd, pooled, ap["wb1"], ap["wbd"], ap["wb5"],
      ap["bbcat"], ap["bb5"], ap["wp"], ap["wp5"], ap["bp"])
    return out[:, :m_img].reshape(nb, hh, wh, nout)


def dec_cls_fused(cols, p2, pc):
    """dec2 + classifier chained through one pallas_call; [M,3] f32 output."""
    M, K = cols.shape
    w2, b2, wc, bc = p2["w"], p2["bias"], pc["w"], pc["bias"]
    assert K == w2.shape[0] and w2.shape[1] == wc.shape[0], (K, w2.shape, wc.shape)
    ncls = wc.shape[1]
    TM = _choose_tm(M)
    cols, m_real, Mp = _pad_rows(cols, TM)
    out = pl.pallas_call(
        _dec_cls_kernel,
        out_shape=jax.ShapeDtypeStruct((Mp, ncls), jnp.float32),
        grid=(Mp // TM,),
        in_specs=[
            pl.BlockSpec((TM, K), lambda i: (i, 0)),
            pl.BlockSpec(w2.shape, lambda i: (0, 0)),
            pl.BlockSpec(b2.shape, lambda i: (0, 0)),
            pl.BlockSpec(wc.shape, lambda i: (0, 0)),
            pl.BlockSpec(bc.shape, lambda i: (0, 0)),
        ],
        out_specs=pl.BlockSpec((TM, ncls), lambda i: (i, 0)),
        compiler_params=_compiler_params(1),
    )(cols, w2, b2, wc, bc)
    return out[:m_real] if Mp != m_real else out


# ---------------------------------------------------------------------------
# Glue: compact-channel im2col, conv wrapper, matmul-form bilinear resize
# ---------------------------------------------------------------------------
# Remaining lever (not taken): implicit GEMM (in-kernel tap loop) would avoid
# materializing these patch matrices at all at real image resolutions.
def im2col(x, k, stride, dilation):
    """x: [N,H,W,C] (TRUE channel count) -> patches [N,Ho,Wo,k*k*C]."""
    pad = dilation * (k - 1) // 2
    xp = jnp.pad(x, ((0, 0), (pad, pad), (pad, pad), (0, 0)))
    N, Hp, Wp, C = xp.shape
    Ho = (Hp - dilation * (k - 1) - 1) // stride + 1
    Wo = (Wp - dilation * (k - 1) - 1) // stride + 1
    cols = []
    for i in range(k):
        for j in range(k):
            cols.append(
                xp[:, i * dilation: i * dilation + stride * (Ho - 1) + 1: stride,
                      j * dilation: j * dilation + stride * (Wo - 1) + 1: stride, :])
    return jnp.concatenate(cols, axis=-1)           # tap-major, channel-minor


def conv_bn(x, p, *, stride=1, dilation=1, relu=True, out_dtype=jnp.bfloat16):
    """Conv + folded BN + optional ReLU via the fused Pallas matmul kernel.
    Channels stay compact; only the flattened K is padded (to the weight's
    pre-padded K, a multiple of 128)."""
    k = p["k"]
    if k == 1 and stride == 1 and dilation == 1:
        patches = x
    else:
        patches = im2col(x, k, stride, dilation)
    n, ho, wo, kk = patches.shape
    cols = _pad_cols(patches.reshape(n * ho * wo, kk).astype(jnp.bfloat16),
                     p["w"].shape[0])
    out = fused_matmul_bias(cols, p["w"], p["bias"], relu=relu, out_dtype=out_dtype)
    return out.reshape(n, ho, wo, -1)


def _interp_matrix(n_in, n_out):
    """Align_corners=True bilinear interpolation matrix [n_out, n_in]."""
    m = np.zeros((n_out, n_in), np.float32)
    if n_in == 1 or n_out == 1:
        m[:, 0] = 1.0
        return m
    src = np.arange(n_out, dtype=np.float64) * (n_in - 1) / (n_out - 1)
    i0 = np.clip(np.floor(src).astype(np.int64), 0, n_in - 1)
    i1 = np.clip(i0 + 1, 0, n_in - 1)
    f = (src - i0).astype(np.float32)
    m[np.arange(n_out), i0] += 1.0 - f
    m[np.arange(n_out), i1] += f
    return m


def bilinear_ac(x, oh, ow):
    """align_corners=True bilinear resize as two matmuls against precomputed
    interpolation matrices (rides the MXU instead of gather indexing)."""
    n, h, w, c = x.shape
    ry = jnp.asarray(_interp_matrix(h, oh))
    rx = jnp.asarray(_interp_matrix(w, ow))
    x32 = x.astype(jnp.float32)
    t = jnp.einsum("oy,nyxc->noxc", ry, x32)
    return jnp.einsum("px,noxc->nopc", rx, t)


# ---------------------------------------------------------------------------
# Parameters: synthesize, fold BN scale into weights, pre-pad K to 128 mult.
# ---------------------------------------------------------------------------
def _fold_bn(key, cout, with_bn):
    ks, kb = jax.random.split(key)
    if with_bn:
        gamma = jax.random.uniform(ks, (cout,), jnp.float32, 0.5, 1.5)
        beta = jax.random.normal(kb, (cout,), jnp.float32) * 0.1
        mean = jnp.zeros((cout,), jnp.float32)
        var = jnp.ones((cout,), jnp.float32)
        scale = gamma / jnp.sqrt(var + 1e-5)
        bias = beta - mean * scale
    else:
        scale = jnp.ones((cout,), jnp.float32)
        bias = jax.random.normal(kb, (cout,), jnp.float32) * 0.01
    return scale, bias


def make_conv(key, k, cin, cout, *, with_bn=True, cout_pad=None, col_offset=0):
    """w:[Kpad, Nout] bf16 (Kpad = next multiple of 128 of k*k*cin, BN scale
    folded, zero rows beyond the real K), bias:[1, Nout] f32.  `cout_pad` /
    `col_offset` place the real output channels at a lane offset (used so the
    ASPP branch concat becomes a plain sum of disjoint lane segments)."""
    kw, kbn = jax.random.split(key)
    w = jax.random.normal(kw, (k, k, cin, cout), jnp.float32) / np.sqrt(k * k * cin)
    scale, bias = _fold_bn(kbn, cout, with_bn)
    w = (w * scale).reshape(k * k * cin, cout)
    kp = _round_up(k * k * cin, 128)
    n_out = cout_pad or cout
    wfull = jnp.zeros((kp, n_out), jnp.float32)
    wfull = wfull.at[:k * k * cin, col_offset:col_offset + cout].set(w)
    bfull = jnp.zeros((1, n_out), jnp.float32)
    bfull = bfull.at[0, col_offset:col_offset + cout].set(bias)
    return {"k": k, "w": wfull.astype(jnp.bfloat16), "bias": bfull}


def make_aspp(key):
    keys = jax.random.split(key, 6)
    b1 = make_conv(keys[0], 1, 48, 32, cout_pad=128, col_offset=0)    # 1x1
    b2 = make_conv(keys[1], 3, 48, 32, cout_pad=128, col_offset=32)   # d=6
    b3 = make_conv(keys[2], 3, 48, 32, cout_pad=128, col_offset=64)   # d=12
    b4 = make_conv(keys[3], 3, 48, 32, cout_pad=128, col_offset=96)   # d=18
    b5 = make_conv(keys[4], 1, 48, 32, cout_pad=128, col_offset=0)    # image pool
    kw, kbn = jax.random.split(keys[5])
    wproj = jax.random.normal(kw, (160, 32), jnp.float32) / np.sqrt(160)
    scale, bias = _fold_bn(kbn, 32, True)
    wproj = wproj * scale
    wp5 = jnp.zeros((128, 32), jnp.float32).at[:32].set(wproj[128:])
    return {
        "wb1": b1["w"],                                             # [128,128]
        "wbd": jnp.stack([b2["w"], b3["w"], b4["w"]], axis=0),      # [3,512,128]
        "wb5": b5["w"],                                             # [128,128]
        "bbcat": b1["bias"] + b2["bias"] + b3["bias"] + b4["bias"],  # disjoint
        "bb5": b5["bias"],
        "wp": wproj[:128].astype(jnp.bfloat16),                     # merged proj
        "wp5": wp5.astype(jnp.bfloat16),
        "bp": bias[None, :],                                        # [1,32]
    }


def init_params(key):
    keys = jax.random.split(key, 9)
    return {
        "stem":     make_conv(keys[0], 3, 3, 16),     # stride 2
        "layer1":   make_conv(keys[1], 3, 16, 24),    # stride 2 (low-level, OS=4)
        "layer2":   make_conv(keys[2], 3, 24, 32),    # stride 2
        "layer3":   make_conv(keys[3], 3, 32, 48),    # stride 2 (high, OS=16)
        "aspp":     make_aspp(keys[4]),
        "low_proj": make_conv(keys[5], 1, 24, 16),
        "dec1":     make_conv(keys[6], 3, 48, 32),    # compact 48-ch concat input
        "dec2":     make_conv(keys[7], 3, 32, 32, cout_pad=128),
        "cls":      make_conv(keys[8], 1, 32, 3, with_bn=False),
    }


# ---------------------------------------------------------------------------
# DeepLabV3+ style forward (num_classes=3, output_stride=16)
# ---------------------------------------------------------------------------
def deeplab_forward(params, x_nchw):
    x = jnp.transpose(x_nchw, (0, 2, 3, 1))          # NCHW -> NHWC, compact ch.
    n, h, w, _ = x.shape

    # Backbone (reduced, output_stride = 16); compact-channel bf16 activations.
    f = conv_bn(x, params["stem"], stride=2)          # [n, h/2,  w/2,  16]
    low = conv_bn(f, params["layer1"], stride=2)      # [n, h/4,  w/4,  24] skip
    f = conv_bn(low, params["layer2"], stride=2)      # [n, h/8,  w/8,  32]
    high = conv_bn(f, params["layer3"], stride=2)     # [n, h/16, w/16, 48]

    # ASPP: 5 branches + merged 1x1 projection, one tiled pallas_call.
    aspp = aspp_fused(high, params["aspp"])           # [n, h/16, w/16, 32]

    # Decoder with low-level skip (48 compact channels in the concat).
    low_r = conv_bn(low, params["low_proj"])          # [n, h/4, w/4, 16]
    aspp_up = bilinear_ac(aspp, low_r.shape[1], low_r.shape[2]).astype(jnp.bfloat16)
    d = jnp.concatenate([aspp_up, low_r], axis=-1)    # [n, h/4, w/4, 48]
    d = conv_bn(d, params["dec1"])                    # [n, h/4, w/4, 32]

    # dec2 (3x3 conv+BN+ReLU) and classifier fused; only 3 class lanes stored.
    patches = im2col(d, 3, 1, 1)                      # [n, h/4, w/4, 288]
    nn, ho, wo, kk = patches.shape
    cols = _pad_cols(patches.reshape(nn * ho * wo, kk), params["dec2"]["w"].shape[0])
    logits = dec_cls_fused(cols, params["dec2"], params["cls"])
    logits = logits.reshape(nn, ho, wo, -1)           # [n, h/4, w/4, 3] f32

    logits = bilinear_ac(logits, h, w)                # back to input resolution
    return jnp.transpose(logits, (0, 3, 1, 2))        # NHWC -> NCHW


# ---------------------------------------------------------------------------
if __name__ == "__main__":
    root = jax.random.PRNGKey(0)
    k_params, k_data = jax.random.split(root)

    params = init_params(k_params)
    data = jax.random.normal(k_data, (2, 3, 32, 32), jnp.float32)   # NCHW input

    fwd = jax.jit(functools.partial(deeplab_forward, params))
    out = jax.block_until_ready(fwd(data))

    assert out.shape == (2, 3, 32, 32), out.shape
    assert out.dtype == jnp.float32
    assert bool(jnp.all(jnp.isfinite(out)))
    print("KERNEL_OK")
</pallas_src>

<mosaic_0001>
module attributes {stable_mosaic.version = 11 : i64} {
  func.func @_matmul_bias_act_kernel(%arg0: i32, %arg1: memref<512x128xbf16, #tpu.memory_space<vmem>>, %arg2: memref<128x16xbf16, #tpu.memory_space<vmem>>, %arg3: memref<1x16xf32, #tpu.memory_space<vmem>>, %arg4: memref<512x16xbf16, #tpu.memory_space<vmem>>) attributes {dimension_semantics = [#tpu.dimension_semantics<parallel>], iteration_bounds = array<i64: 1>, scalar_prefetch = 0 : i64, scratch_operands = 0 : i64, tpu.core_type = #tpu.core_type<tc>, window_params = [{transform_indices = @transform_0, window_bounds = array<i64: 512, 128>}, {pipeline_mode = #tpu.pipeline_mode<synchronous>, transform_indices = @transform_1, window_bounds = array<i64: 128, 16>}, {pipeline_mode = #tpu.pipeline_mode<synchronous>, transform_indices = @transform_2, window_bounds = array<i64: 1, 16>}, {transform_indices = @transform_3, window_bounds = array<i64: 512, 16>}]} {
    %c0 = arith.constant 0 : index
    %c0_0 = arith.constant 0 : index
    %0 = vector.load %arg1[%c0, %c0_0] : memref<512x128xbf16, #tpu.memory_space<vmem>>, vector<512x128xbf16>
    %c0_1 = arith.constant 0 : index
    %c0_2 = arith.constant 0 : index
    %1 = vector.load %arg2[%c0_1, %c0_2] : memref<128x16xbf16, #tpu.memory_space<vmem>>, vector<128x16xbf16>
    %cst = arith.constant dense<0.000000e+00> : vector<512x16xf32>
    %2 = tpu.matmul %0, %1, %cst {dimension_numbers = #tpu.dot_dimension_numbers<[1], [0], [0], [1], [0, 0, 1, 1], [], []>} : vector<512x128xbf16>, vector<128x16xbf16>, vector<512x16xf32> -> vector<512x16xf32>
    %c0_3 = arith.constant 0 : index
    %c0_4 = arith.constant 0 : index
    %3 = vector.load %arg3[%c0_3, %c0_4] : memref<1x16xf32, #tpu.memory_space<vmem>>, vector<1x16xf32>
    %4 = vector.broadcast %3 : vector<1x16xf32> to vector<512x16xf32>
    %5 = arith.addf %2, %4 : vector<512x16xf32>
    %cst_5 = arith.constant 0.000000e+00 : f32
    %6 = vector.broadcast %cst_5 : f32 to vector<512x16xf32>
    %7 = arith.maximumf %5, %6 : vector<512x16xf32>
    %8 = arith.truncf %7 : vector<512x16xf32> to vector<512x16xbf16>
    %c0_6 = arith.constant 0 : index
    %c0_7 = arith.constant 0 : index
    %9 = vector.load %arg4[%c0_6, %c0_7] : memref<512x16xbf16, #tpu.memory_space<vmem>>, vector<512x16xbf16>
    tpu.vector_store %arg4[%c0_6, %c0_7], %8 {strides = array<i32>} : memref<512x16xbf16, #tpu.memory_space<vmem>>, vector<512x16xbf16>,
    return
  }
  func.func @transform_0(%arg0: i32) -> (i32, i32) {
    %c0_i32 = arith.constant 0 : i32
    %c0_i32_0 = arith.constant 0 : i32
    return %arg0, %c0_i32 : i32, i32
  }
  func.func @transform_1(%arg0: i32) -> (i32, i32) {
    %c0_i32 = arith.constant 0 : i32
    %c0_i32_0 = arith.constant 0 : i32
    %c0_i32_1 = arith.constant 0 : i32
    return %c0_i32, %c0_i32_0 : i32, i32
  }
  func.func @transform_2(%arg0: i32) -> (i32, i32) {
    %c0_i32 = arith.constant 0 : i32
    %c0_i32_0 = arith.constant 0 : i32
    %c0_i32_1 = arith.constant 0 : i32
    return %c0_i32, %c0_i32_0 : i32, i32
  }
  func.func @transform_3(%arg0: i32) -> (i32, i32) {
    %c0_i32 = arith.constant 0 : i32
    %c0_i32_0 = arith.constant 0 : i32
    return %arg0, %c0_i32 : i32, i32
  }
}

module attributes {stable_mosaic.version = 11 : i64} {
  func.func @_matmul_bias_act_kernel(%arg0: i32, %arg1: memref<128x256xbf16, #tpu.memory_space<vmem>>, %arg2: memref<256x24xbf16, #tpu.memory_space<vmem>>, %arg3: memref<1x24xf32, #tpu.memory_space<vmem>>, %arg4: memref<128x24xbf16, #tpu.memory_space<vmem>>) attributes {dimension_semantics = [#tpu.dimension_semantics<parallel>], iteration_bounds = array<i64: 1>, scalar_prefetch = 0 : i64, scratch_operands = 0 : i64, tpu.core_type = #tpu.core_type<tc>, window_params = [{transform_indices = @transform_0, window_bounds = array<i64: 128, 256>}, {pipeline_mode = #tpu.pipeline_mode<synchronous>, transform_indices = @transform_1, window_bounds = array<i64: 256, 24>}, {pipeline_mode = #tpu.pipeline_mode<synchronous>, transform_indices = @transform_2, window_bounds = array<i64: 1, 24>}, {transform_indices = @transform_3, window_bounds = array<i64: 128, 24>}]} {
    %c0 = arith.constant 0 : index
    %c0_0 = arith.constant 0 : index
    %0 = vector.load %arg1[%c0, %c0_0] : memref<128x256xbf16, #tpu.memory_space<vmem>>, vector<128x256xbf16>
    %c0_1 = arith.constant 0 : index
    %c0_2 = arith.constant 0 : index
    %1 = vector.load %arg2[%c0_1, %c0_2] : memref<256x24xbf16, #tpu.memory_space<vmem>>, vector<256x24xbf16>
    %cst = arith.constant dense<0.000000e+00> : vector<128x24xf32>
    %2 = tpu.matmul %0, %1, %cst {dimension_numbers = #tpu.dot_dimension_numbers<[1], [0], [0], [1], [0, 0, 1, 1], [], []>} : vector<128x256xbf16>, vector<256x24xbf16>, vector<128x24xf32> -> vector<128x24xf32>
    %c0_3 = arith.constant 0 : index
    %c0_4 = arith.constant 0 : index
    %3 = vector.load %arg3[%c0_3, %c0_4] : memref<1x24xf32, #tpu.memory_space<vmem>>, vector<1x24xf32>
    %4 = vector.broadcast %3 : vector<1x24xf32> to vector<128x24xf32>
    %5 = arith.addf %2, %4 : vector<128x24xf32>
    %cst_5 = arith.constant 0.000000e+00 : f32
    %6 = vector.broadcast %cst_5 : f32 to vector<128x24xf32>
    %7 = arith.maximumf %5, %6 : vector<128x24xf32>
    %8 = arith.truncf %7 : vector<128x24xf32> to vector<128x24xbf16>
    %c0_6 = arith.constant 0 : index
    %c0_7 = arith.constant 0 : index
    %9 = vector.load %arg4[%c0_6, %c0_7] : memref<128x24xbf16, #tpu.memory_space<vmem>>, vector<128x24xbf16>
    tpu.vector_store %arg4[%c0_6, %c0_7], %8 {strides = array<i32>} : memref<128x24xbf16, #tpu.memory_space<vmem>>, vector<128x24xbf16>,
    return
  }
  func.func @transform_0(%arg0: i32) -> (i32, i32) {
    %c0_i32 = arith.constant 0 : i32
    %c0_i32_0 = arith.constant 0 : i32
    return %arg0, %c0_i32 : i32, i32
  }
  func.func @transform_1(%arg0: i32) -> (i32, i32) {
    %c0_i32 = arith.constant 0 : i32
    %c0_i32_0 = arith.constant 0 : i32
    %c0_i32_1 = arith.constant 0 : i32
    return %c0_i32, %c0_i32_0 : i32, i32
  }
  func.func @transform_2(%arg0: i32) -> (i32, i32) {
    %c0_i32 = arith.constant 0 : i32
    %c0_i32_0 = arith.constant 0 : i32
    %c0_i32_1 = arith.constant 0 : i32
    return %c0_i32, %c0_i32_0 : i32, i32
  }
  func.func @transform_3(%arg0: i32) -> (i32, i32) {
    %c0_i32 = arith.constant 0 : i32
    %c0_i32_0 = arith.constant 0 : i32
    return %arg0, %c0_i32 : i32, i32
  }
}

module attributes {stable_mosaic.version = 11 : i64} {
  func.func @_matmul_bias_act_kernel(%arg0: i32, %arg1: memref<32x256xbf16, #tpu.memory_space<vmem>>, %arg2: memref<256x32xbf16, #tpu.memory_space<vmem>>, %arg3: memref<1x32xf32, #tpu.memory_space<vmem>>, %arg4: memref<32x32xbf16, #tpu.memory_space<vmem>>) attributes {dimension_semantics = [#tpu.dimension_semantics<parallel>], iteration_bounds = array<i64: 1>, scalar_prefetch = 0 : i64, scratch_operands = 0 : i64, tpu.core_type = #tpu.core_type<tc>, window_params = [{transform_indices = @transform_0, window_bounds = array<i64: 32, 256>}, {pipeline_mode = #tpu.pipeline_mode<synchronous>, transform_indices = @transform_1, window_bounds = array<i64: 256, 32>}, {pipeline_mode = #tpu.pipeline_mode<synchronous>, transform_indices = @transform_2, window_bounds = array<i64: 1, 32>}, {transform_indices = @transform_3, window_bounds = array<i64: 32, 32>}]} {
    %c0 = arith.constant 0 : index
    %c0_0 = arith.constant 0 : index
    %0 = vector.load %arg1[%c0, %c0_0] : memref<32x256xbf16, #tpu.memory_space<vmem>>, vector<32x256xbf16>
    %c0_1 = arith.constant 0 : index
    %c0_2 = arith.constant 0 : index
    %1 = vector.load %arg2[%c0_1, %c0_2] : memref<256x32xbf16, #tpu.memory_space<vmem>>, vector<256x32xbf16>
    %cst = arith.constant dense<0.000000e+00> : vector<32x32xf32>
    %2 = tpu.matmul %0, %1, %cst {dimension_numbers = #tpu.dot_dimension_numbers<[1], [0], [0], [1], [0, 0, 1, 1], [], []>} : vector<32x256xbf16>, vector<256x32xbf16>, vector<32x32xf32> -> vector<32x32xf32>
    %c0_3 = arith.constant 0 : index
    %c0_4 = arith.constant 0 : index
    %3 = vector.load %arg3[%c0_3, %c0_4] : memref<1x32xf32, #tpu.memory_space<vmem>>, vector<1x32xf32>
    %4 = vector.broadcast %3 : vector<1x32xf32> to vector<32x32xf32>
    %5 = arith.addf %2, %4 : vector<32x32xf32>
    %cst_5 = arith.constant 0.000000e+00 : f32
    %6 = vector.broadcast %cst_5 : f32 to vector<32x32xf32>
    %7 = arith.maximumf %5, %6 : vector<32x32xf32>
    %8 = arith.truncf %7 : vector<32x32xf32> to vector<32x32xbf16>
    %c0_6 = arith.constant 0 : index
    %c0_7 = arith.constant 0 : index
    %9 = vector.load %arg4[%c0_6, %c0_7] : memref<32x32xbf16, #tpu.memory_space<vmem>>, vector<32x32xbf16>
    tpu.vector_store %arg4[%c0_6, %c0_7], %8 {strides = array<i32>} : memref<32x32xbf16, #tpu.memory_space<vmem>>, vector<32x32xbf16>,
    return
  }
  func.func @transform_0(%arg0: i32) -> (i32, i32) {
    %c0_i32 = arith.constant 0 : i32
    %c0_i32_0 = arith.constant 0 : i32
    return %arg0, %c0_i32 : i32, i32
  }
  func.func @transform_1(%arg0: i32) -> (i32, i32) {
    %c0_i32 = arith.constant 0 : i32
    %c0_i32_0 = arith.constant 0 : i32
    %c0_i32_1 = arith.constant 0 : i32
    return %c0_i32, %c0_i32_0 : i32, i32
  }
  func.func @transform_2(%arg0: i32) -> (i32, i32) {
    %c0_i32 = arith.constant 0 : i32
    %c0_i32_0 = arith.constant 0 : i32
    %c0_i32_1 = arith.constant 0 : i32
    return %c0_i32, %c0_i32_0 : i32, i32
  }
  func.func @transform_3(%arg0: i32) -> (i32, i32) {
    %c0_i32 = arith.constant 0 : i32
    %c0_i32_0 = arith.constant 0 : i32
    return %arg0, %c0_i32 : i32, i32
  }
}

module attributes {stable_mosaic.version = 11 : i64} {
  func.func @_matmul_bias_act_kernel(%arg0: i32, %arg1: memref<8x384xbf16, #tpu.memory_space<vmem>>, %arg2: memref<384x48xbf16, #tpu.memory_space<vmem>>, %arg3: memref<1x48xf32, #tpu.memory_space<vmem>>, %arg4: memref<8x48xbf16, #tpu.memory_space<vmem>>) attributes {dimension_semantics = [#tpu.dimension_semantics<parallel>], iteration_bounds = array<i64: 1>, scalar_prefetch = 0 : i64, scratch_operands = 0 : i64, tpu.core_type = #tpu.core_type<tc>, window_params = [{transform_indices = @transform_0, window_bounds = array<i64: 8, 384>}, {pipeline_mode = #tpu.pipeline_mode<synchronous>, transform_indices = @transform_1, window_bounds = array<i64: 384, 48>}, {pipeline_mode = #tpu.pipeline_mode<synchronous>, transform_indices = @transform_2, window_bounds = array<i64: 1, 48>}, {transform_indices = @transform_3, window_bounds = array<i64: 8, 48>}]} {
    %c0 = arith.constant 0 : index
    %c0_0 = arith.constant 0 : index
    %0 = vector.load %arg1[%c0, %c0_0] : memref<8x384xbf16, #tpu.memory_space<vmem>>, vector<8x384xbf16>
    %c0_1 = arith.constant 0 : index
    %c0_2 = arith.constant 0 : index
    %1 = vector.load %arg2[%c0_1, %c0_2] : memref<384x48xbf16, #tpu.memory_space<vmem>>, vector<384x48xbf16>
    %cst = arith.constant dense<0.000000e+00> : vector<8x48xf32>
    %2 = tpu.matmul %0, %1, %cst {dimension_numbers = #tpu.dot_dimension_numbers<[1], [0], [0], [1], [0, 0, 1, 1], [], []>} : vector<8x384xbf16>, vector<384x48xbf16>, vector<8x48xf32> -> vector<8x48xf32>
    %c0_3 = arith.constant 0 : index
    %c0_4 = arith.constant 0 : index
    %3 = vector.load %arg3[%c0_3, %c0_4] : memref<1x48xf32, #tpu.memory_space<vmem>>, vector<1x48xf32>
    %4 = vector.broadcast %3 : vector<1x48xf32> to vector<8x48xf32>
    %5 = arith.addf %2, %4 : vector<8x48xf32>
    %cst_5 = arith.constant 0.000000e+00 : f32
    %6 = vector.broadcast %cst_5 : f32 to vector<8x48xf32>
    %7 = arith.maximumf %5, %6 : vector<8x48xf32>
    %8 = arith.truncf %7 : vector<8x48xf32> to vector<8x48xbf16>
    %c0_6 = arith.constant 0 : index
    %c0_7 = arith.constant 0 : index
    %9 = vector.load %arg4[%c0_6, %c0_7] : memref<8x48xbf16, #tpu.memory_space<vmem>>, vector<8x48xbf16>
    tpu.vector_store %arg4[%c0_6, %c0_7], %8 {strides = array<i32>} : memref<8x48xbf16, #tpu.memory_space<vmem>>, vector<8x48xbf16>,
    return
  }
  func.func @transform_0(%arg0: i32) -> (i32, i32) {
    %c0_i32 = arith.constant 0 : i32
    %c0_i32_0 = arith.constant 0 : i32
    return %arg0, %c0_i32 : i32, i32
  }
  func.func @transform_1(%arg0: i32) -> (i32, i32) {
    %c0_i32 = arith.constant 0 : i32
    %c0_i32_0 = arith.constant 0 : i32
    %c0_i32_1 = arith.constant 0 : i32
    return %c0_i32, %c0_i32_0 : i32, i32
  }
  func.func @transform_2(%arg0: i32) -> (i32, i32) {
    %c0_i32 = arith.constant 0 : i32
    %c0_i32_0 = arith.constant 0 : i32
    %c0_i32_1 = arith.constant 0 : i32
    return %c0_i32, %c0_i32_0 : i32, i32
  }
  func.func @transform_3(%arg0: i32) -> (i32, i32) {
    %c0_i32 = arith.constant 0 : i32
    %c0_i32_0 = arith.constant 0 : i32
    return %arg0, %c0_i32 : i32, i32
  }
}

module attributes {stable_mosaic.version = 11 : i64} {
  func.func @_aspp_kernel(%arg0: i32, %arg1: i32, %arg2: memref<1x8x128xbf16, #tpu.memory_space<vmem>>, %arg3: memref<3x1x8x512xbf16, #tpu.memory_space<vmem>>, %arg4: memref<1x1x128xbf16, #tpu.memory_space<vmem>>, %arg5: memref<128x128xbf16, #tpu.memory_space<vmem>>, %arg6: memref<3x512x128xbf16, #tpu.memory_space<vmem>>, %arg7: memref<128x128xbf16, #tpu.memory_space<vmem>>, %arg8: memref<1x128xf32, #tpu.memory_space<vmem>>, %arg9: memref<1x128xf32, #tpu.memory_space<vmem>>, %arg10: memref<128x32xbf16, #tpu.memory_space<vmem>>, %arg11: memref<128x32xbf16, #tpu.memory_space<vmem>>, %arg12: memref<1x32xf32, #tpu.memory_space<vmem>>, %arg13: memref<1x8x32xbf16, #tpu.memory_space<vmem>>) attributes {dimension_semantics = [#tpu.dimension_semantics<parallel>, #tpu.dimension_semantics<parallel>], iteration_bounds = array<i64: 2, 1>, scalar_prefetch = 0 : i64, scratch_operands = 0 : i64, tpu.core_type = #tpu.core_type<tc>, window_params = [{transform_indices = @transform_0, window_bounds = array<i64: 1, 8, 128>}, {transform_indices = @transform_1, window_bounds = array<i64: 3, 1, 8, 512>}, {transform_indices = @transform_2, window_bounds = array<i64: 1, 1, 128>}, {pipeline_mode = #tpu.pipeline_mode<synchronous>, transform_indices = @transform_3, window_bounds = array<i64: 128, 128>}, {pipeline_mode = #tpu.pipeline_mode<synchronous>, transform_indices = @transform_4, window_bounds = array<i64: 3, 512, 128>}, {pipeline_mode = #tpu.pipeline_mode<synchronous>, transform_indices = @transform_5, window_bounds = array<i64: 128, 128>}, {pipeline_mode = #tpu.pipeline_mode<synchronous>, transform_indices = @transform_6, window_bounds = array<i64: 1, 128>}, {pipeline_mode = #tpu.pipeline_mode<synchronous>, transform_indices = @transform_7, window_bounds = array<i64: 1, 128>}, {pipeline_mode = #tpu.pipeline_mode<synchronous>, transform_indices = @transform_8, window_bounds = array<i64: 128, 32>}, {pipeline_mode = #tpu.pipeline_mode<synchronous>, transform_indices = @transform_9, window_bounds = array<i64: 128, 32>}, {pipeline_mode = #tpu.pipeline_mode<synchronous>, transform_indices = @transform_10, window_bounds = array<i64: 1, 32>}, {transform_indices = @transform_11, window_bounds = array<i64: 1, 8, 32>}]} {
    %c0 = arith.constant 0 : index
    %c0_0 = arith.constant 0 : index
    %c0_1 = arith.constant 0 : index
    %0 = vector.load %arg2[%c0, %c0_0, %c0_1] : memref<1x8x128xbf16, #tpu.memory_space<vmem>>, vector<1x8x128xbf16>
    %1 = vector.shape_cast %0 : vector<1x8x128xbf16> to vector<8x128xbf16>
    %c0_2 = arith.constant 0 : index
    %c0_3 = arith.constant 0 : index
    %2 = vector.load %arg5[%c0_2, %c0_3] : memref<128x128xbf16, #tpu.memory_space<vmem>>, vector<128x128xbf16>
    %cst = arith.constant dense<0.000000e+00> : vector<8x128xf32>
    %3 = tpu.matmul %1, %2, %cst {dimension_numbers = #tpu.dot_dimension_numbers<[1], [0], [0], [1], [0, 0, 1, 1], [], []>} : vector<8x128xbf16>, vector<128x128xbf16>, vector<8x128xf32> -> vector<8x128xf32>
    %c0_4 = arith.constant 0 : index
    %c0_5 = arith.constant 0 : index
    %c0_6 = arith.constant 0 : index
    %c0_7 = arith.constant 0 : index
    %4 = vector.load %arg3[%c0_4, %c0_5, %c0_6, %c0_7] : memref<3x1x8x512xbf16, #tpu.memory_space<vmem>>, vector<1x1x8x512xbf16>
    %5 = vector.shape_cast %4 : vector<1x1x8x512xbf16> to vector<8x512xbf16>
    %c0_8 = arith.constant 0 : index
    %c0_9 = arith.constant 0 : index
    %c0_10 = arith.constant 0 : index
    %6 = vector.load %arg6[%c0_8, %c0_9, %c0_10] : memref<3x512x128xbf16, #tpu.memory_space<vmem>>, vector<1x512x128xbf16>
    %7 = vector.shape_cast %6 : vector<1x512x128xbf16> to vector<512x128xbf16>
    %cst_11 = arith.constant dense<0.000000e+00> : vector<8x128xf32>
    %8 = tpu.matmul %5, %7, %cst_11 {dimension_numbers = #tpu.dot_dimension_numbers<[1], [0], [0], [1], [0, 0, 1, 1], [], []>} : vector<8x512xbf16>, vector<512x128xbf16>, vector<8x128xf32> -> vector<8x128xf32>
    %9 = arith.addf %3, %8 : vector<8x128xf32>
    %c1 = arith.constant 1 : index
    %c0_12 = arith.constant 0 : index
    %c0_13 = arith.constant 0 : index
    %c0_14 = arith.constant 0 : index
    %10 = vector.load %arg3[%c1, %c0_12, %c0_13, %c0_14] : memref<3x1x8x512xbf16, #tpu.memory_space<vmem>>, vector<1x1x8x512xbf16>
    %11 = vector.shape_cast %10 : vector<1x1x8x512xbf16> to vector<8x512xbf16>
    %c1_15 = arith.constant 1 : index
    %c0_16 = arith.constant 0 : index
    %c0_17 = arith.constant 0 : index
    %12 = vector.load %arg6[%c1_15, %c0_16, %c0_17] : memref<3x512x128xbf16, #tpu.memory_space<vmem>>, vector<1x512x128xbf16>
    %13 = vector.shape_cast %12 : vector<1x512x128xbf16> to vector<512x128xbf16>
    %cst_18 = arith.constant dense<0.000000e+00> : vector<8x128xf32>
    %14 = tpu.matmul %11, %13, %cst_18 {dimension_numbers = #tpu.dot_dimension_numbers<[1], [0], [0], [1], [0, 0, 1, 1], [], []>} : vector<8x512xbf16>, vector<512x128xbf16>, vector<8x128xf32> -> vector<8x128xf32>
    %15 = arith.addf %9, %14 : vector<8x128xf32>
    %c2 = arith.constant 2 : index
    %c0_19 = arith.constant 0 : index
    %c0_20 = arith.constant 0 : index
    %c0_21 = arith.constant 0 : index
    %16 = vector.load %arg3[%c2, %c0_19, %c0_20, %c0_21] : memref<3x1x8x512xbf16, #tpu.memory_space<vmem>>, vector<1x1x8x512xbf16>
    %17 = vector.shape_cast %16 : vector<1x1x8x512xbf16> to vector<8x512xbf16>
    %c2_22 = arith.constant 2 : index
    %c0_23 = arith.constant 0 : index
    %c0_24 = arith.constant 0 : index
    %18 = vector.load %arg6[%c2_22, %c0_23, %c0_24] : memref<3x512x128xbf16, #tpu.memory_space<vmem>>, vector<1x512x128xbf16>
    %19 = vector.shape_cast %18 : vector<1x512x128xbf16> to vector<512x128xbf16>
    %cst_25 = arith.constant dense<0.000000e+00> : vector<8x128xf32>
    %20 = tpu.matmul %17, %19, %cst_25 {dimension_numbers = #tpu.dot_dimension_numbers<[1], [0], [0], [1], [0, 0, 1, 1], [], []>} : vector<8x512xbf16>, vector<512x128xbf16>, vector<8x128xf32> -> vector<8x128xf32>
    %21 = arith.addf %15, %20 : vector<8x128xf32>
    %c0_26 = arith.constant 0 : index
    %c0_27 = arith.constant 0 : index
    %22 = vector.load %arg8[%c0_26, %c0_27] : memref<1x128xf32, #tpu.memory_space<vmem>>, vector<1x128xf32>
    %23 = vector.broadcast %22 : vector<1x128xf32> to vector<8x128xf32>
    %24 = arith.addf %21, %23 : vector<8x128xf32>
    %cst_28 = arith.constant 0.000000e+00 : f32
    %25 = vector.broadcast %cst_28 : f32 to vector<8x128xf32>
    %26 = arith.maximumf %24, %25 : vector<8x128xf32>
    %27 = arith.truncf %26 : vector<8x128xf32> to vector<8x128xbf16>
    %c0_29 = arith.constant 0 : index
    %c0_30 = arith.constant 0 : index
    %28 = vector.load %arg10[%c0_29, %c0_30] : memref<128x32xbf16, #tpu.memory_space<vmem>>, vector<128x32xbf16>
    %cst_31 = arith.constant dense<0.000000e+00> : vector<8x32xf32>
    %29 = tpu.matmul %27, %28, %cst_31 {dimension_numbers = #tpu.dot_dimension_numbers<[1], [0], [0], [1], [0, 0, 1, 1], [], []>} : vector<8x128xbf16>, vector<128x32xbf16>, vector<8x32xf32> -> vector<8x32xf32>
    %c0_32 = arith.constant 0 : index
    %c0_33 = arith.constant 0 : index
    %c0_34 = arith.constant 0 : index
    %30 = vector.load %arg4[%c0_32, %c0_33, %c0_34] : memref<1x1x128xbf16, #tpu.memory_space<vmem>>, vector<1x1x128xbf16>
    %31 = vector.shape_cast %30 : vector<1x1x128xbf16> to vector<1x128xbf16>
    %c0_35 = arith.constant 0 : index
    %c0_36 = arith.constant 0 : index
    %32 = vector.load %arg7[%c0_35, %c0_36] : memref<128x128xbf16, #tpu.memory_space<vmem>>, vector<128x128xbf16>
    %cst_37 = arith.constant dense<0.000000e+00> : vector<1x128xf32>
    %33 = tpu.matmul %31, %32, %cst_37 {dimension_numbers = #tpu.dot_dimension_numbers<[1], [0], [0], [1], [0, 0, 1, 1], [], []>} : vector<1x128xbf16>, vector<128x128xbf16>, vector<1x128xf32> -> vector<1x128xf32>
    %c0_38 = arith.constant 0 : index
    %c0_39 = arith.constant 0 : index
    %34 = vector.load %arg9[%c0_38, %c0_39] : memref<1x128xf32, #tpu.memory_space<vmem>>, vector<1x128xf32>
    %35 = arith.addf %33, %34 : vector<1x128xf32>
    %cst_40 = arith.constant 0.000000e+00 : f32
    %36 = vector.broadcast %cst_40 : f32 to vector<1x128xf32>
    %37 = arith.maximumf %35, %36 : vector<1x128xf32>
    %38 = arith.truncf %37 : vector<1x128xf32> to vector<1x128xbf16>
    %c0_41 = arith.constant 0 : index
    %c0_42 = arith.constant 0 : index
    %39 = vector.load %arg11[%c0_41, %c0_42] : memref<128x32xbf16, #tpu.memory_space<vmem>>, vector<128x32xbf16>
    %cst_43 = arith.constant dense<0.000000e+00> : vector<1x32xf32>
    %40 = tpu.matmul %38, %39, %cst_43 {dimension_numbers = #tpu.dot_dimension_numbers<[1], [0], [0], [1], [0, 0, 1, 1], [], []>} : vector<1x128xbf16>, vector<128x32xbf16>, vector<1x32xf32> -> vector<1x32xf32>
    %41 = vector.broadcast %40 : vector<1x32xf32> to vector<8x32xf32>
    %42 = arith.addf %29, %41 : vector<8x32xf32>
    %c0_44 = arith.constant 0 : index
    %c0_45 = arith.constant 0 : index
    %43 = vector.load %arg12[%c0_44, %c0_45] : memref<1x32xf32, #tpu.memory_space<vmem>>, vector<1x32xf32>
    %44 = vector.broadcast %43 : vector<1x32xf32> to vector<8x32xf32>
    %45 = arith.addf %42, %44 : vector<8x32xf32>
    %cst_46 = arith.constant 0.000000e+00 : f32
    %46 = vector.broadcast %cst_46 : f32 to vector<8x32xf32>
    %47 = arith.maximumf %45, %46 : vector<8x32xf32>
    %48 = arith.truncf %47 : vector<8x32xf32> to vector<8x32xbf16>
    %c0_47 = arith.constant 0 : index
    %c0_48 = arith.constant 0 : index
    %c0_49 = arith.constant 0 : index
    %49 = vector.load %arg13[%c0_47, %c0_48, %c0_49] : memref<1x8x32xbf16, #tpu.memory_space<vmem>>, vector<1x8x32xbf16>
    %50 = vector.shape_cast %49 : vector<1x8x32xbf16> to vector<8x32xbf16>
    %51 = vector.shape_cast %48 : vector<8x32xbf16> to vector<1x8x32xbf16>
    tpu.vector_store %arg13[%c0_47, %c0_48, %c0_49], %51 {strides = array<i32>} : memref<1x8x32xbf16, #tpu.memory_space<vmem>>, vector<1x8x32xbf16>,
    return
  }
  func.func @transform_0(%arg0: i32, %arg1: i32) -> (i32, i32, i32) {
    %c0_i32 = arith.constant 0 : i32
    %c0_i32_0 = arith.constant 0 : i32
    return %arg0, %arg1, %c0_i32 : i32, i32, i32
  }
  func.func @transform_1(%arg0: i32, %arg1: i32) -> (i32, i32, i32, i32) {
    %c0_i32 = arith.constant 0 : i32
    %c0_i32_0 = arith.constant 0 : i32
    %c0_i32_1 = arith.constant 0 : i32
    return %c0_i32, %arg0, %arg1, %c0_i32_0 : i32, i32, i32, i32
  }
  func.func @transform_2(%arg0: i32, %arg1: i32) -> (i32, i32, i32) {
    %c0_i32 = arith.constant 0 : i32
    %c0_i32_0 = arith.constant 0 : i32
    %c0_i32_1 = arith.constant 0 : i32
    return %arg0, %c0_i32, %c0_i32_0 : i32, i32, i32
  }
  func.func @transform_3(%arg0: i32, %arg1: i32) -> (i32, i32) {
    %c0_i32 = arith.constant 0 : i32
    %c0_i32_0 = arith.constant 0 : i32
    %c0_i32_1 = arith.constant 0 : i32
    return %c0_i32, %c0_i32_0 : i32, i32
  }
  func.func @transform_4(%arg0: i32, %arg1: i32) -> (i32, i32, i32) {
    %c0_i32 = arith.constant 0 : i32
    %c0_i32_0 = arith.constant 0 : i32
    %c0_i32_1 = arith.constant 0 : i32
    %c0_i32_2 = arith.constant 0 : i32
    return %c0_i32, %c0_i32_0, %c0_i32_1 : i32, i32, i32
  }
  func.func @transform_5(%arg0: i32, %arg1: i32) -> (i32, i32) {
    %c0_i32 = arith.constant 0 : i32
    %c0_i32_0 = arith.constant 0 : i32
    %c0_i32_1 = arith.constant 0 : i32
    return %c0_i32, %c0_i32_0 : i32, i32
  }
  func.func @transform_6(%arg0: i32, %arg1: i32) -> (i32, i32) {
    %c0_i32 = arith.constant 0 : i32
    %c0_i32_0 = arith.constant 0 : i32
    %c0_i32_1 = arith.constant 0 : i32
    return %c0_i32, %c0_i32_0 : i32, i32
  }
  func.func @transform_7(%arg0: i32, %arg1: i32) -> (i32, i32) {
    %c0_i32 = arith.constant 0 : i32
    %c0_i32_0 = arith.constant 0 : i32
    %c0_i32_1 = arith.constant 0 : i32
    return %c0_i32, %c0_i32_0 : i32, i32
  }
  func.func @transform_8(%arg0: i32, %arg1: i32) -> (i32, i32) {
    %c0_i32 = arith.constant 0 : i32
    %c0_i32_0 = arith.constant 0 : i32
    %c0_i32_1 = arith.constant 0 : i32
    return %c0_i32, %c0_i32_0 : i32, i32
  }
  func.func @transform_9(%arg0: i32, %arg1: i32) -> (i32, i32) {
    %c0_i32 = arith.constant 0 : i32
    %c0_i32_0 = arith.constant 0 : i32
    %c0_i32_1 = arith.constant 0 : i32
    return %c0_i32, %c0_i32_0 : i32, i32
  }
  func.func @transform_10(%arg0: i32, %arg1: i32) -> (i32, i32) {
    %c0_i32 = arith.constant 0 : i32
    %c0_i32_0 = arith.constant 0 : i32
    %c0_i32_1 = arith.constant 0 : i32
    return %c0_i32, %c0_i32_0 : i32, i32
  }
  func.func @transform_11(%arg0: i32, %arg1: i32) -> (i32, i32, i32) {
    %c0_i32 = arith.constant 0 : i32
    %c0_i32_0 = arith.constant 0 : i32
    return %arg0, %arg1, %c0_i32 : i32, i32, i32
  }
}

module attributes {stable_mosaic.version = 11 : i64} {
  func.func @_matmul_bias_act_kernel(%arg0: i32, %arg1: memref<128x128xbf16, #tpu.memory_space<vmem>>, %arg2: memref<128x16xbf16, #tpu.memory_space<vmem>>, %arg3: memref<1x16xf32, #tpu.memory_space<vmem>>, %arg4: memref<128x16xbf16, #tpu.memory_space<vmem>>) attributes {dimension_semantics = [#tpu.dimension_semantics<parallel>], iteration_bounds = array<i64: 1>, scalar_prefetch = 0 : i64, scratch_operands = 0 : i64, tpu.core_type = #tpu.core_type<tc>, window_params = [{transform_indices = @transform_0, window_bounds = array<i64: 128, 128>}, {pipeline_mode = #tpu.pipeline_mode<synchronous>, transform_indices = @transform_1, window_bounds = array<i64: 128, 16>}, {pipeline_mode = #tpu.pipeline_mode<synchronous>, transform_indices = @transform_2, window_bounds = array<i64: 1, 16>}, {transform_indices = @transform_3, window_bounds = array<i64: 128, 16>}]} {
    %c0 = arith.constant 0 : index
    %c0_0 = arith.constant 0 : index
    %0 = vector.load %arg1[%c0, %c0_0] : memref<128x128xbf16, #tpu.memory_space<vmem>>, vector<128x128xbf16>
    %c0_1 = arith.constant 0 : index
    %c0_2 = arith.constant 0 : index
    %1 = vector.load %arg2[%c0_1, %c0_2] : memref<128x16xbf16, #tpu.memory_space<vmem>>, vector<128x16xbf16>
    %cst = arith.constant dense<0.000000e+00> : vector<128x16xf32>
    %2 = tpu.matmul %0, %1, %cst {dimension_numbers = #tpu.dot_dimension_numbers<[1], [0], [0], [1], [0, 0, 1, 1], [], []>} : vector<128x128xbf16>, vector<128x16xbf16>, vector<128x16xf32> -> vector<128x16xf32>
    %c0_3 = arith.constant 0 : index
    %c0_4 = arith.constant 0 : index
    %3 = vector.load %arg3[%c0_3, %c0_4] : memref<1x16xf32, #tpu.memory_space<vmem>>, vector<1x16xf32>
    %4 = vector.broadcast %3 : vector<1x16xf32> to vector<128x16xf32>
    %5 = arith.addf %2, %4 : vector<128x16xf32>
    %cst_5 = arith.constant 0.000000e+00 : f32
    %6 = vector.broadcast %cst_5 : f32 to vector<128x16xf32>
    %7 = arith.maximumf %5, %6 : vector<128x16xf32>
    %8 = arith.truncf %7 : vector<128x16xf32> to vector<128x16xbf16>
    %c0_6 = arith.constant 0 : index
    %c0_7 = arith.constant 0 : index
    %9 = vector.load %arg4[%c0_6, %c0_7] : memref<128x16xbf16, #tpu.memory_space<vmem>>, vector<128x16xbf16>
    tpu.vector_store %arg4[%c0_6, %c0_7], %8 {strides = array<i32>} : memref<128x16xbf16, #tpu.memory_space<vmem>>, vector<128x16xbf16>,
    return
  }
  func.func @transform_0(%arg0: i32) -> (i32, i32) {
    %c0_i32 = arith.constant 0 : i32
    %c0_i32_0 = arith.constant 0 : i32
    return %arg0, %c0_i32 : i32, i32
  }
  func.func @transform_1(%arg0: i32) -> (i32, i32) {
    %c0_i32 = arith.constant 0 : i32
    %c0_i32_0 = arith.constant 0 : i32
    %c0_i32_1 = arith.constant 0 : i32
    return %c0_i32, %c0_i32_0 : i32, i32
  }
  func.func @transform_2(%arg0: i32) -> (i32, i32) {
    %c0_i32 = arith.constant 0 : i32
    %c0_i32_0 = arith.constant 0 : i32
    %c0_i32_1 = arith.constant 0 : i32
    return %c0_i32, %c0_i32_0 : i32, i32
  }
  func.func @transform_3(%arg0: i32) -> (i32, i32) {
    %c0_i32 = arith.constant 0 : i32
    %c0_i32_0 = arith.constant 0 : i32
    return %arg0, %c0_i32 : i32, i32
  }
}

module attributes {stable_mosaic.version = 11 : i64} {
  func.func @_matmul_bias_act_kernel(%arg0: i32, %arg1: memref<128x512xbf16, #tpu.memory_space<vmem>>, %arg2: memref<512x32xbf16, #tpu.memory_space<vmem>>, %arg3: memref<1x32xf32, #tpu.memory_space<vmem>>, %arg4: memref<128x32xbf16, #tpu.memory_space<vmem>>) attributes {dimension_semantics = [#tpu.dimension_semantics<parallel>], iteration_bounds = array<i64: 1>, scalar_prefetch = 0 : i64, scratch_operands = 0 : i64, tpu.core_type = #tpu.core_type<tc>, window_params = [{transform_indices = @transform_0, window_bounds = array<i64: 128, 512>}, {pipeline_mode = #tpu.pipeline_mode<synchronous>, transform_indices = @transform_1, window_bounds = array<i64: 512, 32>}, {pipeline_mode = #tpu.pipeline_mode<synchronous>, transform_indices = @transform_2, window_bounds = array<i64: 1, 32>}, {transform_indices = @transform_3, window_bounds = array<i64: 128, 32>}]} {
    %c0 = arith.constant 0 : index
    %c0_0 = arith.constant 0 : index
    %0 = vector.load %arg1[%c0, %c0_0] : memref<128x512xbf16, #tpu.memory_space<vmem>>, vector<128x512xbf16>
    %c0_1 = arith.constant 0 : index
    %c0_2 = arith.constant 0 : index
    %1 = vector.load %arg2[%c0_1, %c0_2] : memref<512x32xbf16, #tpu.memory_space<vmem>>, vector<512x32xbf16>
    %cst = arith.constant dense<0.000000e+00> : vector<128x32xf32>
    %2 = tpu.matmul %0, %1, %cst {dimension_numbers = #tpu.dot_dimension_numbers<[1], [0], [0], [1], [0, 0, 1, 1], [], []>} : vector<128x512xbf16>, vector<512x32xbf16>, vector<128x32xf32> -> vector<128x32xf32>
    %c0_3 = arith.constant 0 : index
    %c0_4 = arith.constant 0 : index
    %3 = vector.load %arg3[%c0_3, %c0_4] : memref<1x32xf32, #tpu.memory_space<vmem>>, vector<1x32xf32>
    %4 = vector.broadcast %3 : vector<1x32xf32> to vector<128x32xf32>
    %5 = arith.addf %2, %4 : vector<128x32xf32>
    %cst_5 = arith.constant 0.000000e+00 : f32
    %6 = vector.broadcast %cst_5 : f32 to vector<128x32xf32>
    %7 = arith.maximumf %5, %6 : vector<128x32xf32>
    %8 = arith.truncf %7 : vector<128x32xf32> to vector<128x32xbf16>
    %c0_6 = arith.constant 0 : index
    %c0_7 = arith.constant 0 : index
    %9 = vector.load %arg4[%c0_6, %c0_7] : memref<128x32xbf16, #tpu.memory_space<vmem>>, vector<128x32xbf16>
    tpu.vector_store %arg4[%c0_6, %c0_7], %8 {strides = array<i32>} : memref<128x32xbf16, #tpu.memory_space<vmem>>, vector<128x32xbf16>,
    return
  }
  func.func @transform_0(%arg0: i32) -> (i32, i32) {
    %c0_i32 = arith.constant 0 : i32
    %c0_i32_0 = arith.constant 0 : i32
    return %arg0, %c0_i32 : i32, i32
  }
  func.func @transform_1(%arg0: i32) -> (i32, i32) {
    %c0_i32 = arith.constant 0 : i32
    %c0_i32_0 = arith.constant 0 : i32
    %c0_i32_1 = arith.constant 0 : i32
    return %c0_i32, %c0_i32_0 : i32, i32
  }
  func.func @transform_2(%arg0: i32) -> (i32, i32) {
    %c0_i32 = arith.constant 0 : i32
    %c0_i32_0 = arith.constant 0 : i32
    %c0_i32_1 = arith.constant 0 : i32
    return %c0_i32, %c0_i32_0 : i32, i32
  }
  func.func @transform_3(%arg0: i32) -> (i32, i32) {
    %c0_i32 = arith.constant 0 : i32
    %c0_i32_0 = arith.constant 0 : i32
    return %arg0, %c0_i32 : i32, i32
  }
}

module attributes {stable_mosaic.version = 11 : i64} {
  func.func @_dec_cls_kernel(%arg0: i32, %arg1: memref<128x384xbf16, #tpu.memory_space<vmem>>, %arg2: memref<384x128xbf16, #tpu.memory_space<vmem>>, %arg3: memref<1x128xf32, #tpu.memory_space<vmem>>, %arg4: memref<128x3xbf16, #tpu.memory_space<vmem>>, %arg5: memref<1x3xf32, #tpu.memory_space<vmem>>, %arg6: memref<128x3xf32, #tpu.memory_space<vmem>>) attributes {dimension_semantics = [#tpu.dimension_semantics<parallel>], iteration_bounds = array<i64: 1>, scalar_prefetch = 0 : i64, scratch_operands = 0 : i64, tpu.core_type = #tpu.core_type<tc>, window_params = [{transform_indices = @transform_0, window_bounds = array<i64: 128, 384>}, {pipeline_mode = #tpu.pipeline_mode<synchronous>, transform_indices = @transform_1, window_bounds = array<i64: 384, 128>}, {pipeline_mode = #tpu.pipeline_mode<synchronous>, transform_indices = @transform_2, window_bounds = array<i64: 1, 128>}, {pipeline_mode = #tpu.pipeline_mode<synchronous>, transform_indices = @transform_3, window_bounds = array<i64: 128, 3>}, {pipeline_mode = #tpu.pipeline_mode<synchronous>, transform_indices = @transform_4, window_bounds = array<i64: 1, 3>}, {transform_indices = @transform_5, window_bounds = array<i64: 128, 3>}]} {
    %c0 = arith.constant 0 : index
    %c0_0 = arith.constant 0 : index
    %0 = vector.load %arg1[%c0, %c0_0] : memref<128x384xbf16, #tpu.memory_space<vmem>>, vector<128x384xbf16>
    %c0_1 = arith.constant 0 : index
    %c0_2 = arith.constant 0 : index
    %1 = vector.load %arg2[%c0_1, %c0_2] : memref<384x128xbf16, #tpu.memory_space<vmem>>, vector<384x128xbf16>
    %cst = arith.constant dense<0.000000e+00> : vector<128x128xf32>
    %2 = tpu.matmul %0, %1, %cst {dimension_numbers = #tpu.dot_dimension_numbers<[1], [0], [0], [1], [0, 0, 1, 1], [], []>} : vector<128x384xbf16>, vector<384x128xbf16>, vector<128x128xf32> -> vector<128x128xf32>
    %c0_3 = arith.constant 0 : index
    %c0_4 = arith.constant 0 : index
    %3 = vector.load %arg3[%c0_3, %c0_4] : memref<1x128xf32, #tpu.memory_space<vmem>>, vector<1x128xf32>
    %4 = vector.broadcast %3 : vector<1x128xf32> to vector<128x128xf32>
    %5 = arith.addf %2, %4 : vector<128x128xf32>
    %cst_5 = arith.constant 0.000000e+00 : f32
    %6 = vector.broadcast %cst_5 : f32 to vector<128x128xf32>
    %7 = arith.maximumf %5, %6 : vector<128x128xf32>
    %8 = arith.truncf %7 : vector<128x128xf32> to vector<128x128xbf16>
    %c0_6 = arith.constant 0 : index
    %c0_7 = arith.constant 0 : index
    %9 = vector.load %arg4[%c0_6, %c0_7] : memref<128x3xbf16, #tpu.memory_space<vmem>>, vector<128x3xbf16>
    %cst_8 = arith.constant dense<0.000000e+00> : vector<128x3xf32>
    %10 = tpu.matmul %8, %9, %cst_8 {dimension_numbers = #tpu.dot_dimension_numbers<[1], [0], [0], [1], [0, 0, 1, 1], [], []>} : vector<128x128xbf16>, vector<128x3xbf16>, vector<128x3xf32> -> vector<128x3xf32>
    %c0_9 = arith.constant 0 : index
    %c0_10 = arith.constant 0 : index
    %11 = vector.load %arg5[%c0_9, %c0_10] : memref<1x3xf32, #tpu.memory_space<vmem>>, vector<1x3xf32>
    %12 = vector.broadcast %11 : vector<1x3xf32> to vector<128x3xf32>
    %13 = arith.addf %10, %12 : vector<128x3xf32>
    %c0_11 = arith.constant 0 : index
    %c0_12 = arith.constant 0 : index
    %14 = vector.load %arg6[%c0_11, %c0_12] : memref<128x3xf32, #tpu.memory_space<vmem>>, vector<128x3xf32>
    tpu.vector_store %arg6[%c0_11, %c0_12], %13 {strides = array<i32>} : memref<128x3xf32, #tpu.memory_space<vmem>>, vector<128x3xf32>,
    return
  }
  func.func @transform_0(%arg0: i32) -> (i32, i32) {
    %c0_i32 = arith.constant 0 : i32
    %c0_i32_0 = arith.constant 0 : i32
    return %arg0, %c0_i32 : i32, i32
  }
  func.func @transform_1(%arg0: i32) -> (i32, i32) {
    %c0_i32 = arith.constant 0 : i32
    %c0_i32_0 = arith.constant 0 : i32
    %c0_i32_1 = arith.constant 0 : i32
    return %c0_i32, %c0_i32_0 : i32, i32
  }
  func.func @transform_2(%arg0: i32) -> (i32, i32) {
    %c0_i32 = arith.constant 0 : i32
    %c0_i32_0 = arith.constant 0 : i32
    %c0_i32_1 = arith.constant 0 : i32
    return %c0_i32, %c0_i32_0 : i32, i32
  }
  func.func @transform_3(%arg0: i32) -> (i32, i32) {
    %c0_i32 = arith.constant 0 : i32
    %c0_i32_0 = arith.constant 0 : i32
    %c0_i32_1 = arith.constant 0 : i32
    return %c0_i32, %c0_i32_0 : i32, i32
  }
  func.func @transform_4(%arg0: i32) -> (i32, i32) {
    %c0_i32 = arith.constant 0 : i32
    %c0_i32_0 = arith.constant 0 : i32
    %c0_i32_1 = arith.constant 0 : i32
    return %c0_i32, %c0_i32_0 : i32, i32
  }
  func.func @transform_5(%arg0: i32) -> (i32, i32) {
    %c0_i32 = arith.constant 0 : i32
    %c0_i32_0 = arith.constant 0 : i32
    return %arg0, %c0_i32 : i32, i32
  }
}

</mosaic_0001>

<bundles_post_ra>
// kernel: deeplab_forward.8
= control target key start
LH: loop header
LB: loop body
LE: loop exit
PB: predicated region body
PF: predicated region fallthrough
CT: control target
= control target key end

     0   :  { %8 = vsyncpa [#allocation3], 0  ;;  %s1739_s0 = inlined_call_operand.hbm [shape: bf16[512,128], index: 0, kind: input, shape index: {}]   ;;  %s1740_s1 = inlined_call_operand.hbm [shape: bf16[128,16], index: 1, kind: input, shape index: {}]   ;;  %s1741_s2 = inlined_call_operand.hbm [shape: f32[1,16], index: 2, kind: input, shape index: {}]   ;;  %s1742_s3 = inlined_call_operand.hbm [shape: bf16[512,16], index: 3, kind: output, shape index: {}]  }
   0x1   :  { %9 = vsyncpa [#allocation6], 0 }
   0x2   :  { %10 = vsyncpa [#allocation4], 0  ;;  %s1519_s12 = smov [#allocation5]   ;;  %s1520_s14 = smov [#allocation2]  }
   0x3   :  { %s28_s13 = sshll.u32 %s1519_s12, 4  ;;  %s16_s15 = sshll.u32 %s1520_s14, 4  ;;  %s29_s13 = int_to_ptr.vmem [resolvable:$true] %s28_s13  ;;  %s1545_s15 = int_to_ptr.vmem [resolvable:$true] %s16_s15 }
   0x4   :  { %s1425_s18 = scalar_lea.hbm %s1740_s1, 1024 }
   0x5   :  { %p1426_p0 = scmp.ne.s32.totalorder %s1740_s1, %s1425_s18  ;;  %p1429_p1 = scmp.lt.u32.totalorder %s1425_s18, %s1740_s1 }
   0x7   :  { %p1431_p2 = pnand %p1429_p1, %p1426_p0 }
   0x9   :  { %1434 = shalt.err (!%p1431_p2)
}
   0xa   :  { %s1435_s23 = scalar_lea.vmem %s29_s13, 1024  ;;  %p1440_p4 = scmp.lt.s32.totalorder %s29_s13, %s29_s13 }
   0xb   :  { %p1436_p3 = scmp.ne.s32.totalorder %s29_s13, %s1435_s23  ;;  %p1441_p5 = scmp.lt.s32.totalorder %s1435_s23, %s1435_s23 }
   0xd   :  { %p1442_p6 = por %p1441_p5, %p1440_p4 }
   0xf   :  { %p1443_p7 = pnand %p1442_p6, %p1436_p3 }
  0x11   :  { %1446 = shalt.err (!%p1443_p7)
}
  0x12   :  { %s1521_s24 = smov 64   ;;  %s1522_s25 = smov 4  }
  0x13   :  { %34 = dma.hbm_to_vmem [thread:$0]  %s1740_s1, 1024, %s29_s13, [#allocation6], %s1521_s24, %s1521_s24, %s1522_s25  }
  0x14   :  { %s1447_s30 = scalar_lea.hbm %s1739_s0, 4096 }
  0x15   :  { %p1448_p8 = scmp.ne.s32.totalorder %s1739_s0, %s1447_s30  ;;  %p1451_p9 = scmp.lt.u32.totalorder %s1447_s30, %s1739_s0 }
  0x17   :  { %p1453_p10 = pnand %p1451_p9, %p1448_p8 }
  0x19   :  { %1456 = shalt.err (!%p1453_p10)
}
  0x1a   :  { %s1457_s8 = scalar_lea.vmem %s1545_s15, 4096  ;;  %p1462_p12 = scmp.lt.s32.totalorder %s1545_s15, %s1545_s15 }
  0x1b   :  { %p1458_p11 = scmp.ne.s32.totalorder %s1545_s15, %s1457_s8  ;;  %p1463_p13 = scmp.lt.s32.totalorder %s1457_s8, %s1457_s8 }
  0x1d   :  { %p1464_p0 = por %p1463_p13, %p1462_p12 }
  0x1f   :  { %p1465_p1 = pnand %p1464_p0, %p1458_p11 }
  0x21   :  { %1468 = shalt.err (!%p1465_p1)
}
  0x22   :  { %22 = dma.hbm_to_vmem [thread:$0]  %s1739_s0, 4096, %s1545_s15, [#allocation3], %s1521_s24, %s1521_s24, %s1522_s25  }
  0x23   :  { %s1523_s10 = smov [#allocation7]   ;;  %s1469_s14 = scalar_lea.hbm %s1741_s2, 16 }
  0x24   :  { %s41_s11 = sshll.u32 %s1523_s10, 4  ;;  %p1470_p2 = scmp.ne.s32.totalorder %s1741_s2, %s1469_s14  ;;  %s42_s11 = int_to_ptr.vmem [resolvable:$true] %s41_s11 }
  0x25   :  { %p1473_p3 = scmp.lt.u32.totalorder %s1469_s14, %s1741_s2 }
  0x27   :  { %p1475_p4 = pnand %p1473_p3, %p1470_p2 }
  0x29   :  { %1478 = shalt.err (!%p1475_p4)
}
  0x2a   :  { %s1479_s20 = scalar_lea.vmem %s42_s11, 16  ;;  %s1483_s0 = scalar_lea.vmem %s42_s11, 32 }
  0x2b   :  { %p1480_p5 = scmp.ne.s32.totalorder %s42_s11, %s1479_s20  ;;  %p1484_p6 = scmp.lt.s32.totalorder %s42_s11, %s42_s11 }
  0x2c   :  { %p1485_p7 = scmp.lt.s32.totalorder %s1483_s0, %s1479_s20 }
  0x2e   :  { %p1486_p8 = por %p1485_p7, %p1484_p6 }
  0x30   :  { %p1487_p9 = pnand %p1486_p8, %p1480_p5 }
  0x32   :  { %1490 = shalt.err (!%p1487_p9)
}
  0x33   :  { %44 = dma.hbm_to_vmem [thread:$0]  %s1741_s2, 16, %s42_s11, [#allocation6]  }
  0x34   :  { %1513 = dma.done.wait [#allocation3], 4096  }
  0x35   :  { %1514 = vsyncadd [#allocation3], 4294963200 }
  0x36   :  { %1515 = dma.done.wait [#allocation6], 1040  }
  0x37   :  { %1516 = vsyncadd [#allocation6], 4294966256  ;;  %v1385_v0 = vld [vmem:[#allocation5] sm:$0xff]   ;;  %v1386_v1 = vld [vmem:[#allocation5 + $0x8] sm:$0xff]   ;;  %vm991_vm0 = vcmask 125952   ;;  %s1524_s2 = smov [#allocation8]  }
  0x38   :  { %1283 = vmatprep.subr.bf16.mxu0 %v1385_v0  ;;  %1363 = vmatprep.subr.bf16.mxu1 %v1385_v0  ;;  %v1387_v2 = vld [vmem:[#allocation5 + $0x10] sm:$0xff]   ;;  %v1388_v3 = vld [vmem:[#allocation5 + $0x18] sm:$0xff]   ;;  %v1393_v4 = vld [vmem:[#allocation2] sm:$0xff]   ;;  %s1061_s22 = sshll.u32 %s1524_s2, 4  ;;  %s1062_s22 = int_to_ptr.vmem [resolvable:$true] %s1061_s22 }
  0x39   :  { %1284 = vmatpush3.bf16.msra.mxu0 %v1385_v0  ;;  %1371 = vmatpush3.bf16.msra.mxu1 %v1385_v0  ;;  %v1394_v5 = vld [vmem:[#allocation2 + $0x80] sm:$0xff]   ;;  %v1390_v7 = vld [vmem:[#allocation5 + $0x28] sm:$0xff]   ;;  %v1391_v8 = vld [vmem:[#allocation5 + $0x30] sm:$0xff]   ;;  %s1491_s23 = scalar_lea.vmem %s1062_s22, 4096  ;;  %p1496_p11 = scmp.lt.s32.totalorder %s1062_s22, %s1062_s22 }
  0x3a   :  { %1285 = vmatprep.subr.bf16.mxu0 %v1386_v1  ;;  %1364 = vmatprep.subr.bf16.mxu1 %v1386_v1  ;;  %v1389_v6 = vld [vmem:[#allocation5 + $0x20] sm:$0xff]   ;;  %v1392_v9 = vld [vmem:[#allocation5 + $0x38] sm:$0xff]   ;;  %v1395_v10 = vld [vmem:[#allocation2 + $0x8] sm:$0xff]   ;;  %p1492_p10 = scmp.ne.s32.totalorder %s1062_s22, %s1491_s23  ;;  %p1497_p12 = scmp.lt.s32.totalorder %s1491_s23, %s1491_s23 }
  0x3b   :  { %1299 = vmatprep.mubr.bf16.mxu0 %v1393_v4  ;;  %1331 = vmatprep.mubr.bf16.mxu1 %v1394_v5  ;;  %v1396_v11 = vld [vmem:[#allocation2 + $0x88] sm:$0xff]   ;;  %v1397_v12 = vld [vmem:[#allocation2 + $0x10] sm:$0xff]   ;;  %v1399_v14 = vld [vmem:[#allocation2 + $0x18] sm:$0xff]  }
  0x3c   :  { %v1398_v13 = vld [vmem:[#allocation2 + $0x90] sm:$0xff]   ;;  %v1400_v15 = vld [vmem:[#allocation2 + $0x98] sm:$0xff]   ;;  %v1401_v16 = vld [vmem:[#allocation2 + $0x20] sm:$0xff]   ;;  %p1498_p13 = por %p1497_p12, %p1496_p11 }
  0x3d   :  { %1286 = vmatpush3.bf16.msra.mxu0 %v1386_v1  ;;  %1372 = vmatpush3.bf16.msra.mxu1 %v1386_v1  ;;  %v1402_v17 = vld [vmem:[#allocation2 + $0xa0] sm:$0xff]   ;;  %v1403_v18 = vld [vmem:[#allocation2 + $0x28] sm:$0xff]   ;;  %v1405_v20 = vld [vmem:[#allocation2 + $0x30] sm:$0xff]  }
  0x3e   :  { %1287 = vmatprep.subr.bf16.mxu0 %v1387_v2  ;;  %1365 = vmatprep.subr.bf16.mxu1 %v1387_v2  ;;  %v1404_v19 = vld [vmem:[#allocation2 + $0xa8] sm:$0xff]   ;;  %v1406_v21 = vld [vmem:[#allocation2 + $0xb0] sm:$0xff]   ;;  %v1407_v22 = vld [vmem:[#allocation2 + $0x38] sm:$0xff]   ;;  %p1499_p0 = pnand %p1498_p13, %p1492_p10 }
  0x3f   :  { %v1408_v23 = vld [vmem:[#allocation2 + $0xb8] sm:$0xff]   ;;  %v1409_v24 = vld [vmem:[#allocation2 + $0x40] sm:$0xff]   ;;  %v1411_v26 = vld [vmem:[#allocation2 + $0x48] sm:$0xff]  }
  0x40   :  { %v1410_v25 = vld [vmem:[#allocation2 + $0xc0] sm:$0xff]   ;;  %v1412_v27 = vld [vmem:[#allocation2 + $0xc8] sm:$0xff]   ;;  %v1413_v28 = vld [vmem:[#allocation2 + $0x50] sm:$0xff]  }
  0x41   :  { %1288 = vmatpush3.bf16.msra.mxu0 %v1387_v2  ;;  %1373 = vmatpush3.bf16.msra.mxu1 %v1387_v2  ;;  %v1414_v29 = vld [vmem:[#allocation2 + $0xd0] sm:$0xff]   ;;  %v1415_v30 = vld [vmem:[#allocation2 + $0x58] sm:$0xff]   ;;  %v1417_v32 = vld [vmem:[#allocation2 + $0x60] sm:$0xff]  }
  0x42   :  { %1289 = vmatprep.subr.bf16.mxu0 %v1388_v3  ;;  %1366 = vmatprep.subr.bf16.mxu1 %v1388_v3  ;;  %v1416_v31 = vld [vmem:[#allocation2 + $0xd8] sm:$0xff]   ;;  %v1418_v33 = vld [vmem:[#allocation2 + $0xe0] sm:$0xff]   ;;  %v1419_v34 = vld [vmem:[#allocation2 + $0x68] sm:$0xff]  }
  0x43   :  { %v1420_v35 = vld [vmem:[#allocation2 + $0xe8] sm:$0xff]   ;;  %v1421_v36 = vld [vmem:[#allocation2 + $0x70] sm:$0xff]   ;;  %v1423_v38 = vld [vmem:[#allocation2 + $0x78] sm:$0xff]  }
  0x44   :  { %v1422_v37 = vld [vmem:[#allocation2 + $0xf0] sm:$0xff]   ;;  %v1424_v39 = vld [vmem:[#allocation2 + $0xf8] sm:$0xff]   ;;  %v1594_v40 = vld [vmem:[#allocation7] ss:$0 sm:$0xff] }
  0x45   :  { %1290 = vmatpush3.bf16.msra.mxu0 %v1388_v3  ;;  %1374 = vmatpush3.bf16.msra.mxu1 %v1388_v3 }
  0x46   :  { %1291 = vmatprep.subr.bf16.mxu0 %v1389_v6  ;;  %1367 = vmatprep.subr.bf16.mxu1 %v1389_v6 }
  0x49   :  { %1292 = vmatpush3.bf16.msra.mxu0 %v1389_v6  ;;  %1375 = vmatpush3.bf16.msra.mxu1 %v1389_v6 }
  0x4a   :  { %1293 = vmatprep.subr.bf16.mxu0 %v1390_v7  ;;  %1368 = vmatprep.subr.bf16.mxu1 %v1390_v7 }
  0x4d   :  { %1294 = vmatpush3.bf16.msra.mxu0 %v1390_v7  ;;  %1376 = vmatpush3.bf16.msra.mxu1 %v1390_v7 }
  0x4e   :  { %1295 = vmatprep.subr.bf16.mxu0 %v1391_v8  ;;  %1369 = vmatprep.subr.bf16.mxu1 %v1391_v8 }
  0x51   :  { %1296 = vmatpush3.bf16.msra.mxu0 %v1391_v8  ;;  %1377 = vmatpush3.bf16.msra.mxu1 %v1391_v8 }
  0x52   :  { %1297 = vmatprep.subr.bf16.mxu0 %v1392_v9  ;;  %1370 = vmatprep.subr.bf16.mxu1 %v1392_v9 }
  0x55   :  { %1298 = vmatpush3.bf16.msra.mxu0 %v1392_v9  ;;  %1378 = vmatpush3.bf16.msra.mxu1 %v1392_v9 }
  0x58   :  { %1300 = vmatmul.mubr.bf16.vlgmr.msra.gmra.mrb[0].mxu0 %v1395_v10  ;;  %1332 = vmatmul.mubr.bf16.vlgmr.msra.gmra.mrb[0].mxu1 %v1396_v11 }
  0x59   :  { %1303 = vmatprep.mubr.bf16.mxu0 %v1397_v12  ;;  %1335 = vmatprep.mubr.bf16.mxu1 %v1398_v13 }
  0x60   :  { %1304 = vmatmul.mubr.bf16.gmra.mrb[4].mxu0 %v1399_v14  ;;  %1336 = vmatmul.mubr.bf16.gmra.mrb[4].mxu1 %v1400_v15 }
  0x61   :  { %1307 = vmatprep.mubr.bf16.mxu0 %v1401_v16  ;;  %1339 = vmatprep.mubr.bf16.mxu1 %v1402_v17 }
  0x68   :  { %1308 = vmatmul.mubr.bf16.gmra.mrb[8].mxu0 %v1403_v18  ;;  %1340 = vmatmul.mubr.bf16.gmra.mrb[8].mxu1 %v1404_v19 }
  0x69   :  { %1311 = vmatprep.mubr.bf16.mxu0 %v1405_v20  ;;  %1343 = vmatprep.mubr.bf16.mxu1 %v1406_v21 }
  0x70   :  { %1312 = vmatmul.mubr.bf16.gmra.mrb[12].mxu0 %v1407_v22  ;;  %1344 = vmatmul.mubr.bf16.gmra.mrb[12].mxu1 %v1408_v23 }
  0x71   :  { %1315 = vmatprep.mubr.bf16.mxu0 %v1409_v24  ;;  %1347 = vmatprep.mubr.bf16.mxu1 %v1410_v25 }
  0x78   :  { %1316 = vmatmul.mubr.bf16.gmra.mrb[16].mxu0 %v1411_v26  ;;  %1348 = vmatmul.mubr.bf16.gmra.mrb[16].mxu1 %v1412_v27 }
  0x79   :  { %1319 = vmatprep.mubr.bf16.mxu0 %v1413_v28  ;;  %1351 = vmatprep.mubr.bf16.mxu1 %v1414_v29 }
  0x80   :  { %1320 = vmatmul.mubr.bf16.gmra.mrb[20].mxu0 %v1415_v30  ;;  %1352 = vmatmul.mubr.bf16.gmra.mrb[20].mxu1 %v1416_v31 }
  0x81   :  { %1323 = vmatprep.mubr.bf16.mxu0 %v1417_v32  ;;  %1355 = vmatprep.mubr.bf16.mxu1 %v1418_v33 }
  0x88   :  { %1324 = vmatmul.mubr.bf16.gmra.mrb[24].mxu0 %v1419_v34  ;;  %1356 = vmatmul.mubr.bf16.gmra.mrb[24].mxu1 %v1420_v35 }
  0x89   :  { %1327 = vmatprep.mubr.bf16.mxu0 %v1421_v36  ;;  %1359 = vmatprep.mubr.bf16.mxu1 %v1422_v37 }
  0x90   :  { %1328 = vmatmul.mubr.bf16.gmra.mrb[28].mxu0 %v1423_v38  ;;  %1360 = vmatmul.mubr.bf16.gmra.mrb[28].mxu1 %v1424_v39 }
 0x12b   :  { %v1301_v41 = vpop.f32.mrb[0].mxu0  ;;  %v1333_v42 = vpop.f32.mrb[0].mxu1 }
 0x12c   :  { %v425_v43 = vadd.f32 %v1301_v41, %v1594_v40  ;;  %v553_v44 = vadd.f32 %v1333_v42, %v1594_v40  ;;  %v416_v45 = vpop.f32.mrb[1].mxu0  ;;  %v544_v46 = vpop.f32.mrb[1].mxu1 }
 0x12d   :  { %v417_v47 = vadd.f32 %v1594_v40, %v416_v45  ;;  %v545_v48 = vadd.f32 %v1594_v40, %v544_v46  ;;  %v1302_v49 = vpop.f32.mrb[2].mxu0  ;;  %v1334_v50 = vpop.f32.mrb[2].mxu1 }
 0x12e   :  { %v673_v51 = vmax.f32 %v425_v43, 0.0  ;;  %v705_v52 = vmax.f32 %v553_v44, 0.0  ;;  %v428_v53 = vadd.f32 %v1302_v49, %v1594_v40  ;;  %v556_v54 = vadd.f32 %v1334_v50, %v1594_v40  ;;  %v419_v55 = vpop.f32.mrb[3].mxu0  ;;  %v547_v56 = vpop.f32.mrb[3].mxu1 }
 0x12f   :  { %v671_v57 = vmax.f32 %v417_v47, 0.0  ;;  %v703_v58 = vmax.f32 %v545_v48, 0.0  ;;  %v420_v59 = vadd.f32 %v1594_v40, %v419_v55  ;;  %v548_v60 = vadd.f32 %v1594_v40, %v547_v56 }
 0x130   :  { %v1181_v61 = vpack.c.bf16 %v673_v51, %v673_v51  ;;  %v1213_v62 = vpack.c.bf16 %v705_v52, %v705_v52  ;;  %v674_v63 = vmax.f32 %v428_v53, 0.0  ;;  %v706_v0 = vmax.f32 %v556_v54, 0.0 }
 0x131   :  { %v1179_v1 = vpack.c.bf16 %v671_v57, %v671_v57  ;;  %v1211_v2 = vpack.c.bf16 %v703_v58, %v703_v58  ;;  %v672_v3 = vmax.f32 %v420_v59, 0.0  ;;  %v704_v4 = vmax.f32 %v548_v60, 0.0 }
 0x132   :  { %994 = vst.msk [vmem:[#allocation8 + $0x8] sm:$0xf] %vm991_vm0, %v1181_v61  ;;  %1026 = vst.msk [vmem:[#allocation8 + $0x88] sm:$0xf] %vm991_vm0, %v1213_v62  ;;  %v1182_v5 = vpack.c.bf16 %v674_v63, %v674_v63  ;;  %v1214_v6 = vpack.c.bf16 %v706_v0, %v706_v0 }
 0x133   :  { %992 = vst.msk [vmem:[#allocation8] sm:$0xf] %vm991_vm0, %v1179_v1  ;;  %1024 = vst.msk [vmem:[#allocation8 + $0x80] sm:$0xf] %vm991_vm0, %v1211_v2  ;;  %v1180_v7 = vpack.c.bf16 %v672_v3, %v672_v3  ;;  %v1212_v8 = vpack.c.bf16 %v704_v4, %v704_v4  ;;  %v1305_v9 = vpop.f32.mrb[4].mxu0  ;;  %v1337_v10 = vpop.f32.mrb[4].mxu1 }
 0x134   :  { %995 = vst.msk [vmem:[#allocation8 + $0xc] sm:$0xf] %vm991_vm0, %v1182_v5  ;;  %1027 = vst.msk [vmem:[#allocation8 + $0x8c] sm:$0xf] %vm991_vm0, %v1214_v6  ;;  %v441_v11 = vadd.f32 %v1305_v9, %v1594_v40  ;;  %v569_v12 = vadd.f32 %v1337_v10, %v1594_v40  ;;  %v432_v13 = vpop.f32.mrb[5].mxu0  ;;  %v560_v14 = vpop.f32.mrb[5].mxu1 }
 0x135   :  { %993 = vst.msk [vmem:[#allocation8 + $0x4] sm:$0xf] %vm991_vm0, %v1180_v7  ;;  %1025 = vst.msk [vmem:[#allocation8 + $0x84] sm:$0xf] %vm991_vm0, %v1212_v8  ;;  %v433_v15 = vadd.f32 %v1594_v40, %v432_v13  ;;  %v561_v16 = vadd.f32 %v1594_v40, %v560_v14  ;;  %v1306_v17 = vpop.f32.mrb[6].mxu0  ;;  %v1338_v18 = vpop.f32.mrb[6].mxu1 }
 0x136   :  { %v677_v19 = vmax.f32 %v441_v11, 0.0  ;;  %v709_v20 = vmax.f32 %v569_v12, 0.0  ;;  %v444_v21 = vadd.f32 %v1306_v17, %v1594_v40  ;;  %v572_v22 = vadd.f32 %v1338_v18, %v1594_v40  ;;  %v435_v23 = vpop.f32.mrb[7].mxu0  ;;  %v563_v24 = vpop.f32.mrb[7].mxu1 }
 0x137   :  { %v675_v25 = vmax.f32 %v433_v15, 0.0  ;;  %v707_v26 = vmax.f32 %v561_v16, 0.0  ;;  %v436_v27 = vadd.f32 %v1594_v40, %v435_v23  ;;  %v564_v28 = vadd.f32 %v1594_v40, %v563_v24 }
 0x138   :  { %v1185_v29 = vpack.c.bf16 %v677_v19, %v677_v19  ;;  %v1217_v30 = vpack.c.bf16 %v709_v20, %v709_v20  ;;  %v678_v31 = vmax.f32 %v444_v21, 0.0  ;;  %v710_v32 = vmax.f32 %v572_v22, 0.0 }
 0x139   :  { %v1183_v33 = vpack.c.bf16 %v675_v25, %v675_v25  ;;  %v1215_v34 = vpack.c.bf16 %v707_v26, %v707_v26  ;;  %v676_v35 = vmax.f32 %v436_v27, 0.0  ;;  %v708_v36 = vmax.f32 %v564_v28, 0.0 }
 0x13a   :  { %998 = vst.msk [vmem:[#allocation8 + $0x18] sm:$0xf] %vm991_vm0, %v1185_v29  ;;  %1030 = vst.msk [vmem:[#allocation8 + $0x98] sm:$0xf] %vm991_vm0, %v1217_v30  ;;  %v1186_v37 = vpack.c.bf16 %v678_v31, %v678_v31  ;;  %v1218_v38 = vpack.c.bf16 %v710_v32, %v710_v32 }
 0x13b   :  { %996 = vst.msk [vmem:[#allocation8 + $0x10] sm:$0xf] %vm991_vm0, %v1183_v33  ;;  %1028 = vst.msk [vmem:[#allocation8 + $0x90] sm:$0xf] %vm991_vm0, %v1215_v34  ;;  %v1184_v39 = vpack.c.bf16 %v676_v35, %v676_v35  ;;  %v1216_v41 = vpack.c.bf16 %v708_v36, %v708_v36  ;;  %v1309_v42 = vpop.f32.mrb[8].mxu0  ;;  %v1341_v43 = vpop.f32.mrb[8].mxu1 }
 0x13c   :  { %999 = vst.msk [vmem:[#allocation8 + $0x1c] sm:$0xf] %vm991_vm0, %v1186_v37  ;;  %1031 = vst.msk [vmem:[#allocation8 + $0x9c] sm:$0xf] %vm991_vm0, %v1218_v38  ;;  %v457_v44 = vadd.f32 %v1309_v42, %v1594_v40  ;;  %v585_v45 = vadd.f32 %v1341_v43, %v1594_v40  ;;  %v448_v46 = vpop.f32.mrb[9].mxu0  ;;  %v576_v47 = vpop.f32.mrb[9].mxu1 }
 0x13d   :  { %997 = vst.msk [vmem:[#allocation8 + $0x14] sm:$0xf] %vm991_vm0, %v1184_v39  ;;  %1029 = vst.msk [vmem:[#allocation8 + $0x94] sm:$0xf] %vm991_vm0, %v1216_v41  ;;  %v449_v48 = vadd.f32 %v1594_v40, %v448_v46  ;;  %v577_v49 = vadd.f32 %v1594_v40, %v576_v47  ;;  %v1310_v50 = vpop.f32.mrb[10].mxu0  ;;  %v1342_v51 = vpop.f32.mrb[10].mxu1 }
 0x13e   :  { %v681_v52 = vmax.f32 %v457_v44, 0.0  ;;  %v713_v53 = vmax.f32 %v585_v45, 0.0  ;;  %v460_v54 = vadd.f32 %v1310_v50, %v1594_v40  ;;  %v588_v55 = vadd.f32 %v1342_v51, %v1594_v40  ;;  %v451_v56 = vpop.f32.mrb[11].mxu0  ;;  %v579_v57 = vpop.f32.mrb[11].mxu1 }
 0x13f   :  { %v679_v58 = vmax.f32 %v449_v48, 0.0  ;;  %v711_v59 = vmax.f32 %v577_v49, 0.0  ;;  %v452_v60 = vadd.f32 %v1594_v40, %v451_v56  ;;  %v580_v61 = vadd.f32 %v1594_v40, %v579_v57 }
 0x140   :  { %v1189_v62 = vpack.c.bf16 %v681_v52, %v681_v52  ;;  %v1221_v63 = vpack.c.bf16 %v713_v53, %v713_v53  ;;  %v682_v0 = vmax.f32 %v460_v54, 0.0  ;;  %v714_v1 = vmax.f32 %v588_v55, 0.0 }
 0x141   :  { %v1187_v2 = vpack.c.bf16 %v679_v58, %v679_v58  ;;  %v1219_v3 = vpack.c.bf16 %v711_v59, %v711_v59  ;;  %v680_v4 = vmax.f32 %v452_v60, 0.0  ;;  %v712_v5 = vmax.f32 %v580_v61, 0.0 }
 0x142   :  { %1002 = vst.msk [vmem:[#allocation8 + $0x28] sm:$0xf] %vm991_vm0, %v1189_v62  ;;  %1034 = vst.msk [vmem:[#allocation8 + $0xa8] sm:$0xf] %vm991_vm0, %v1221_v63  ;;  %v1190_v6 = vpack.c.bf16 %v682_v0, %v682_v0  ;;  %v1222_v7 = vpack.c.bf16 %v714_v1, %v714_v1 }
 0x143   :  { %1000 = vst.msk [vmem:[#allocation8 + $0x20] sm:$0xf] %vm991_vm0, %v1187_v2  ;;  %1032 = vst.msk [vmem:[#allocation8 + $0xa0] sm:$0xf] %vm991_vm0, %v1219_v3  ;;  %v1188_v8 = vpack.c.bf16 %v680_v4, %v680_v4  ;;  %v1220_v9 = vpack.c.bf16 %v712_v5, %v712_v5  ;;  %v1313_v10 = vpop.f32.mrb[12].mxu0  ;;  %v1345_v11 = vpop.f32.mrb[12].mxu1 }
 0x144   :  { %1003 = vst.msk [vmem:[#allocation8 + $0x2c] sm:$0xf] %vm991_vm0, %v1190_v6  ;;  %1035 = vst.msk [vmem:[#allocation8 + $0xac] sm:$0xf] %vm991_vm0, %v1222_v7  ;;  %v473_v12 = vadd.f32 %v1313_v10, %v1594_v40  ;;  %v601_v13 = vadd.f32 %v1345_v11, %v1594_v40  ;;  %v464_v14 = vpop.f32.mrb[13].mxu0  ;;  %v592_v15 = vpop.f32.mrb[13].mxu1 }
 0x145   :  { %1001 = vst.msk [vmem:[#allocation8 + $0x24] sm:$0xf] %vm991_vm0, %v1188_v8  ;;  %1033 = vst.msk [vmem:[#allocation8 + $0xa4] sm:$0xf] %vm991_vm0, %v1220_v9  ;;  %v465_v16 = vadd.f32 %v1594_v40, %v464_v14  ;;  %v593_v17 = vadd.f32 %v1594_v40, %v592_v15  ;;  %v1314_v18 = vpop.f32.mrb[14].mxu0  ;;  %v1346_v19 = vpop.f32.mrb[14].mxu1 }
 0x146   :  { %v685_v20 = vmax.f32 %v473_v12, 0.0  ;;  %v717_v21 = vmax.f32 %v601_v13, 0.0  ;;  %v476_v22 = vadd.f32 %v1314_v18, %v1594_v40  ;;  %v604_v23 = vadd.f32 %v1346_v19, %v1594_v40  ;;  %v467_v24 = vpop.f32.mrb[15].mxu0  ;;  %v595_v25 = vpop.f32.mrb[15].mxu1 }
 0x147   :  { %v683_v26 = vmax.f32 %v465_v16, 0.0  ;;  %v715_v27 = vmax.f32 %v593_v17, 0.0  ;;  %v468_v28 = vadd.f32 %v1594_v40, %v467_v24  ;;  %v596_v29 = vadd.f32 %v1594_v40, %v595_v25 }
 0x148   :  { %v1193_v30 = vpack.c.bf16 %v685_v20, %v685_v20  ;;  %v1225_v31 = vpack.c.bf16 %v717_v21, %v717_v21  ;;  %v686_v32 = vmax.f32 %v476_v22, 0.0  ;;  %v718_v33 = vmax.f32 %v604_v23, 0.0 }
 0x149   :  { %v1191_v34 = vpack.c.bf16 %v683_v26, %v683_v26  ;;  %v1223_v35 = vpack.c.bf16 %v715_v27, %v715_v27  ;;  %v684_v36 = vmax.f32 %v468_v28, 0.0  ;;  %v716_v37 = vmax.f32 %v596_v29, 0.0 }
 0x14a   :  { %1006 = vst.msk [vmem:[#allocation8 + $0x38] sm:$0xf] %vm991_vm0, %v1193_v30  ;;  %1038 = vst.msk [vmem:[#allocation8 + $0xb8] sm:$0xf] %vm991_vm0, %v1225_v31  ;;  %v1194_v38 = vpack.c.bf16 %v686_v32, %v686_v32  ;;  %v1226_v39 = vpack.c.bf16 %v718_v33, %v718_v33 }
 0x14b   :  { %1004 = vst.msk [vmem:[#allocation8 + $0x30] sm:$0xf] %vm991_vm0, %v1191_v34  ;;  %1036 = vst.msk [vmem:[#allocation8 + $0xb0] sm:$0xf] %vm991_vm0, %v1223_v35  ;;  %v1192_v41 = vpack.c.bf16 %v684_v36, %v684_v36  ;;  %v1224_v42 = vpack.c.bf16 %v716_v37, %v716_v37  ;;  %v1317_v43 = vpop.f32.mrb[16].mxu0  ;;  %v1349_v44 = vpop.f32.mrb[16].mxu1 }
 0x14c   :  { %1007 = vst.msk [vmem:[#allocation8 + $0x3c] sm:$0xf] %vm991_vm0, %v1194_v38  ;;  %1039 = vst.msk [vmem:[#allocation8 + $0xbc] sm:$0xf] %vm991_vm0, %v1226_v39  ;;  %v489_v45 = vadd.f32 %v1317_v43, %v1594_v40  ;;  %v617_v46 = vadd.f32 %v1349_v44, %v1594_v40  ;;  %v480_v47 = vpop.f32.mrb[17].mxu0  ;;  %v608_v48 = vpop.f32.mrb[17].mxu1 }
 0x14d   :  { %1005 = vst.msk [vmem:[#allocation8 + $0x34] sm:$0xf] %vm991_vm0, %v1192_v41  ;;  %1037 = vst.msk [vmem:[#allocation8 + $0xb4] sm:$0xf] %vm991_vm0, %v1224_v42  ;;  %v481_v49 = vadd.f32 %v1594_v40, %v480_v47  ;;  %v609_v50 = vadd.f32 %v1594_v40, %v608_v48  ;;  %v1318_v51 = vpop.f32.mrb[18].mxu0  ;;  %v1350_v52 = vpop.f32.mrb[18].mxu1 }
 0x14e   :  { %v689_v53 = vmax.f32 %v489_v45, 0.0  ;;  %v721_v54 = vmax.f32 %v617_v46, 0.0  ;;  %v492_v55 = vadd.f32 %v1318_v51, %v1594_v40  ;;  %v620_v56 = vadd.f32 %v1350_v52, %v1594_v40  ;;  %v483_v57 = vpop.f32.mrb[19].mxu0  ;;  %v611_v58 = vpop.f32.mrb[19].mxu1 }
 0x14f   :  { %v687_v59 = vmax.f32 %v481_v49, 0.0  ;;  %v719_v60 = vmax.f32 %v609_v50, 0.0  ;;  %v484_v61 = vadd.f32 %v1594_v40, %v483_v57  ;;  %v612_v62 = vadd.f32 %v1594_v40, %v611_v58 }
 0x150   :  { %v1197_v63 = vpack.c.bf16 %v689_v53, %v689_v53  ;;  %v1229_v0 = vpack.c.bf16 %v721_v54, %v721_v54  ;;  %v690_v1 = vmax.f32 %v492_v55, 0.0  ;;  %v722_v2 = vmax.f32 %v620_v56, 0.0 }
 0x151   :  { %v1195_v3 = vpack.c.bf16 %v687_v59, %v687_v59  ;;  %v1227_v4 = vpack.c.bf16 %v719_v60, %v719_v60  ;;  %v688_v5 = vmax.f32 %v484_v61, 0.0  ;;  %v720_v6 = vmax.f32 %v612_v62, 0.0 }
 0x152   :  { %1010 = vst.msk [vmem:[#allocation8 + $0x48] sm:$0xf] %vm991_vm0, %v1197_v63  ;;  %1042 = vst.msk [vmem:[#allocation8 + $0xc8] sm:$0xf] %vm991_vm0, %v1229_v0  ;;  %v1198_v7 = vpack.c.bf16 %v690_v1, %v690_v1  ;;  %v1230_v8 = vpack.c.bf16 %v722_v2, %v722_v2 }
 0x153   :  { %1008 = vst.msk [vmem:[#allocation8 + $0x40] sm:$0xf] %vm991_vm0, %v1195_v3  ;;  %1040 = vst.msk [vmem:[#allocation8 + $0xc0] sm:$0xf] %vm991_vm0, %v1227_v4  ;;  %v1196_v9 = vpack.c.bf16 %v688_v5, %v688_v5  ;;  %v1228_v10 = vpack.c.bf16 %v720_v6, %v720_v6  ;;  %v1321_v11 = vpop.f32.mrb[20].mxu0  ;;  %v1353_v12 = vpop.f32.mrb[20].mxu1 }
 0x154   :  { %1011 = vst.msk [vmem:[#allocation8 + $0x4c] sm:$0xf] %vm991_vm0, %v1198_v7  ;;  %1043 = vst.msk [vmem:[#allocation8 + $0xcc] sm:$0xf] %vm991_vm0, %v1230_v8  ;;  %v505_v13 = vadd.f32 %v1321_v11, %v1594_v40  ;;  %v633_v14 = vadd.f32 %v1353_v12, %v1594_v40  ;;  %v496_v15 = vpop.f32.mrb[21].mxu0  ;;  %v624_v16 = vpop.f32.mrb[21].mxu1 }
 0x155   :  { %1009 = vst.msk [vmem:[#allocation8 + $0x44] sm:$0xf] %vm991_vm0, %v1196_v9  ;;  %1041 = vst.msk [vmem:[#allocation8 + $0xc4] sm:$0xf] %vm991_vm0, %v1228_v10  ;;  %v497_v17 = vadd.f32 %v1594_v40, %v496_v15  ;;  %v625_v18 = vadd.f32 %v1594_v40, %v624_v16  ;;  %v1322_v19 = vpop.f32.mrb[22].mxu0  ;;  %v1354_v20 = vpop.f32.mrb[22].mxu1 }
 0x156   :  { %v693_v21 = vmax.f32 %v505_v13, 0.0  ;;  %v725_v22 = vmax.f32 %v633_v14, 0.0  ;;  %v508_v23 = vadd.f32 %v1322_v19, %v1594_v40  ;;  %v636_v24 = vadd.f32 %v1354_v20, %v1594_v40  ;;  %v499_v25 = vpop.f32.mrb[23].mxu0  ;;  %v627_v26 = vpop.f32.mrb[23].mxu1 }
 0x157   :  { %v691_v27 = vmax.f32 %v497_v17, 0.0  ;;  %v723_v28 = vmax.f32 %v625_v18, 0.0  ;;  %v500_v29 = vadd.f32 %v1594_v40, %v499_v25  ;;  %v628_v30 = vadd.f32 %v1594_v40, %v627_v26 }
 0x158   :  { %v1201_v31 = vpack.c.bf16 %v693_v21, %v693_v21  ;;  %v1233_v32 = vpack.c.bf16 %v725_v22, %v725_v22  ;;  %v694_v33 = vmax.f32 %v508_v23, 0.0  ;;  %v726_v34 = vmax.f32 %v636_v24, 0.0 }
 0x159   :  { %v1199_v35 = vpack.c.bf16 %v691_v27, %v691_v27  ;;  %v1231_v36 = vpack.c.bf16 %v723_v28, %v723_v28  ;;  %v692_v37 = vmax.f32 %v500_v29, 0.0  ;;  %v724_v38 = vmax.f32 %v628_v30, 0.0 }
 0x15a   :  { %1014 = vst.msk [vmem:[#allocation8 + $0x58] sm:$0xf] %vm991_vm0, %v1201_v31  ;;  %1046 = vst.msk [vmem:[#allocation8 + $0xd8] sm:$0xf] %vm991_vm0, %v1233_v32  ;;  %v1202_v39 = vpack.c.bf16 %v694_v33, %v694_v33  ;;  %v1234_v41 = vpack.c.bf16 %v726_v34, %v726_v34 }
 0x15b   :  { %1012 = vst.msk [vmem:[#allocation8 + $0x50] sm:$0xf] %vm991_vm0, %v1199_v35  ;;  %1044 = vst.msk [vmem:[#allocation8 + $0xd0] sm:$0xf] %vm991_vm0, %v1231_v36  ;;  %v1200_v42 = vpack.c.bf16 %v692_v37, %v692_v37  ;;  %v1232_v43 = vpack.c.bf16 %v724_v38, %v724_v38  ;;  %v1325_v44 = vpop.f32.mrb[24].mxu0  ;;  %v1357_v45 = vpop.f32.mrb[24].mxu1 }
 0x15c   :  { %1015 = vst.msk [vmem:[#allocation8 + $0x5c] sm:$0xf] %vm991_vm0, %v1202_v39  ;;  %1047 = vst.msk [vmem:[#allocation8 + $0xdc] sm:$0xf] %vm991_vm0, %v1234_v41  ;;  %v521_v46 = vadd.f32 %v1325_v44, %v1594_v40  ;;  %v649_v47 = vadd.f32 %v1357_v45, %v1594_v40  ;;  %v512_v48 = vpop.f32.mrb[25].mxu0  ;;  %v640_v49 = vpop.f32.mrb[25].mxu1 }
 0x15d   :  { %1013 = vst.msk [vmem:[#allocation8 + $0x54] sm:$0xf] %vm991_vm0, %v1200_v42  ;;  %1045 = vst.msk [vmem:[#allocation8 + $0xd4] sm:$0xf] %vm991_vm0, %v1232_v43  ;;  %v513_v50 = vadd.f32 %v1594_v40, %v512_v48  ;;  %v641_v51 = vadd.f32 %v1594_v40, %v640_v49  ;;  %v1326_v52 = vpop.f32.mrb[26].mxu0  ;;  %v1358_v53 = vpop.f32.mrb[26].mxu1 }
 0x15e   :  { %v697_v54 = vmax.f32 %v521_v46, 0.0  ;;  %v729_v55 = vmax.f32 %v649_v47, 0.0  ;;  %v524_v56 = vadd.f32 %v1326_v52, %v1594_v40  ;;  %v652_v57 = vadd.f32 %v1358_v53, %v1594_v40  ;;  %v515_v58 = vpop.f32.mrb[27].mxu0  ;;  %v643_v59 = vpop.f32.mrb[27].mxu1 }
 0x15f   :  { %v695_v60 = vmax.f32 %v513_v50, 0.0  ;;  %v727_v61 = vmax.f32 %v641_v51, 0.0  ;;  %v516_v62 = vadd.f32 %v1594_v40, %v515_v58  ;;  %v644_v63 = vadd.f32 %v1594_v40, %v643_v59 }
 0x160   :  { %v1205_v0 = vpack.c.bf16 %v697_v54, %v697_v54  ;;  %v1237_v1 = vpack.c.bf16 %v729_v55, %v729_v55  ;;  %v698_v2 = vmax.f32 %v524_v56, 0.0  ;;  %v730_v3 = vmax.f32 %v652_v57, 0.0 }
 0x161   :  { %v1203_v4 = vpack.c.bf16 %v695_v60, %v695_v60  ;;  %v1235_v5 = vpack.c.bf16 %v727_v61, %v727_v61  ;;  %v696_v6 = vmax.f32 %v516_v62, 0.0  ;;  %v728_v7 = vmax.f32 %v644_v63, 0.0 }
 0x162   :  { %1018 = vst.msk [vmem:[#allocation8 + $0x68] sm:$0xf] %vm991_vm0, %v1205_v0  ;;  %1050 = vst.msk [vmem:[#allocation8 + $0xe8] sm:$0xf] %vm991_vm0, %v1237_v1  ;;  %v1206_v8 = vpack.c.bf16 %v698_v2, %v698_v2  ;;  %v1238_v9 = vpack.c.bf16 %v730_v3, %v730_v3 }
 0x163   :  { %1016 = vst.msk [vmem:[#allocation8 + $0x60] sm:$0xf] %vm991_vm0, %v1203_v4  ;;  %1048 = vst.msk [vmem:[#allocation8 + $0xe0] sm:$0xf] %vm991_vm0, %v1235_v5  ;;  %v1204_v10 = vpack.c.bf16 %v696_v6, %v696_v6  ;;  %v1236_v11 = vpack.c.bf16 %v728_v7, %v728_v7  ;;  %v1329_v12 = vpop.f32.mrb[28].mxu0  ;;  %v1361_v13 = vpop.f32.mrb[28].mxu1 }
 0x164   :  { %1019 = vst.msk [vmem:[#allocation8 + $0x6c] sm:$0xf] %vm991_vm0, %v1206_v8  ;;  %1051 = vst.msk [vmem:[#allocation8 + $0xec] sm:$0xf] %vm991_vm0, %v1238_v9  ;;  %v537_v14 = vadd.f32 %v1329_v12, %v1594_v40  ;;  %v665_v15 = vadd.f32 %v1361_v13, %v1594_v40  ;;  %v528_v16 = vpop.f32.mrb[29].mxu0  ;;  %v656_v17 = vpop.f32.mrb[29].mxu1 }
 0x165   :  { %1017 = vst.msk [vmem:[#allocation8 + $0x64] sm:$0xf] %vm991_vm0, %v1204_v10  ;;  %1049 = vst.msk [vmem:[#allocation8 + $0xe4] sm:$0xf] %vm991_vm0, %v1236_v11  ;;  %v529_v18 = vadd.f32 %v1594_v40, %v528_v16  ;;  %v657_v19 = vadd.f32 %v1594_v40, %v656_v17  ;;  %v1330_v20 = vpop.f32.mrb[30].mxu0  ;;  %v1362_v21 = vpop.f32.mrb[30].mxu1 }
 0x166   :  { %v701_v22 = vmax.f32 %v537_v14, 0.0  ;;  %v733_v23 = vmax.f32 %v665_v15, 0.0  ;;  %v540_v24 = vadd.f32 %v1330_v20, %v1594_v40  ;;  %v668_v25 = vadd.f32 %v1362_v21, %v1594_v40  ;;  %v531_v26 = vpop.f32.mrb[31].mxu0  ;;  %v659_v27 = vpop.f32.mrb[31].mxu1 }
 0x167   :  { %v699_v28 = vmax.f32 %v529_v18, 0.0  ;;  %v731_v29 = vmax.f32 %v657_v19, 0.0  ;;  %v532_v30 = vadd.f32 %v1594_v40, %v531_v26  ;;  %v660_v31 = vadd.f32 %v1594_v40, %v659_v27 }
 0x168   :  { %v1209_v32 = vpack.c.bf16 %v701_v22, %v701_v22  ;;  %v1241_v33 = vpack.c.bf16 %v733_v23, %v733_v23  ;;  %v702_v34 = vmax.f32 %v540_v24, 0.0  ;;  %v734_v35 = vmax.f32 %v668_v25, 0.0 }
 0x169   :  { %v1207_v36 = vpack.c.bf16 %v699_v28, %v699_v28  ;;  %v1239_v37 = vpack.c.bf16 %v731_v29, %v731_v29  ;;  %v700_v38 = vmax.f32 %v532_v30, 0.0  ;;  %v732_v39 = vmax.f32 %v660_v31, 0.0 }
 0x16a   :  { %1022 = vst.msk [vmem:[#allocation8 + $0x78] sm:$0xf] %vm991_vm0, %v1209_v32  ;;  %1054 = vst.msk [vmem:[#allocation8 + $0xf8] sm:$0xf] %vm991_vm0, %v1241_v33  ;;  %v1210_v41 = vpack.c.bf16 %v702_v34, %v702_v34  ;;  %v1242_v42 = vpack.c.bf16 %v734_v35, %v734_v35 }
 0x16b   :  { %1020 = vst.msk [vmem:[#allocation8 + $0x70] sm:$0xf] %vm991_vm0, %v1207_v36  ;;  %1052 = vst.msk [vmem:[#allocation8 + $0xf0] sm:$0xf] %vm991_vm0, %v1239_v37  ;;  %v1208_v40 = vpack.c.bf16 %v700_v38, %v700_v38  ;;  %v1240_v43 = vpack.c.bf16 %v732_v39, %v732_v39 }
 0x16c   :  { %1023 = vst.msk [vmem:[#allocation8 + $0x7c] sm:$0xf] %vm991_vm0, %v1210_v41  ;;  %1055 = vst.msk [vmem:[#allocation8 + $0xfc] sm:$0xf] %vm991_vm0, %v1242_v42 }
 0x16d   :  { %1021 = vst.msk [vmem:[#allocation8 + $0x74] sm:$0xf] %vm991_vm0, %v1208_v40  ;;  %1053 = vst.msk [vmem:[#allocation8 + $0xf4] sm:$0xf] %vm991_vm0, %v1240_v43 }
 0x16e   :  { %1502 = shalt.err (!%p1499_p0)
}
 0x16f   :  { %s1503_s28 = scalar_lea.hbm %s1742_s3, 4096 }
 0x170   :  { %p1504_p1 = scmp.ne.s32.totalorder %s1742_s3, %s1503_s28  ;;  %p1507_p2 = scmp.lt.u32.totalorder %s1503_s28, %s1742_s3 }
 0x172   :  { %p1509_p3 = pnand %p1507_p2, %p1504_p1 }
 0x174   :  { %1512 = shalt.err (!%p1509_p3)
}
 0x175   :  { %1067 = dma.vmem_to_hbm [thread:$0]  %s1062_s22, 4096, %s1742_s3, [#allocation4], %s1521_s24, %s1521_s24, %s1522_s25  }
 0x176   :  { %1517 = dma.done.wait [#allocation4], 4096  }
 0x177   :  { %1518 = vsyncadd [#allocation4], 4294963200 }
 0x178   :  { %1071 = vsyncpa [#allocation3], 1 }
 0x179   :  { %1072 = vsyncpa [#allocation6], 1 }
 0x17a   :  { %1073 = vsyncpa [#allocation4], 1 }

// kernel: deeplab_forward.9
= control target key start
LH: loop header
LB: loop body
LE: loop exit
PB: predicated region body
PF: predicated region fallthrough
CT: control target
= control target key end

     0   :  { %8 = vsyncpa [#allocation3], 0  ;;  %s901_s0 = inlined_call_operand.hbm [shape: bf16[128,256], index: 0, kind: input, shape index: {}]   ;;  %s902_s1 = inlined_call_operand.hbm [shape: bf16[256,24], index: 1, kind: input, shape index: {}]   ;;  %s903_s2 = inlined_call_operand.hbm [shape: f32[1,24], index: 2, kind: input, shape index: {}]   ;;  %s904_s3 = inlined_call_operand.hbm [shape: bf16[128,24], index: 3, kind: output, shape index: {}]  }
   0x1   :  { %9 = vsyncpa [#allocation6], 0 }
   0x2   :  { %10 = vsyncpa [#allocation4], 0  ;;  %s785_s12 = smov [#allocation5]   ;;  %s691_s16 = scalar_lea.hbm %s902_s1, 2048 }
   0x3   :  { %s28_s13 = sshll.u32 %s785_s12, 4  ;;  %p692_p0 = scmp.ne.s32.totalorder %s902_s1, %s691_s16  ;;  %s29_s13 = int_to_ptr.vmem [resolvable:$true] %s28_s13 }
   0x4   :  { %p695_p1 = scmp.lt.u32.totalorder %s691_s16, %s902_s1 }
   0x6   :  { %p697_p2 = pnand %p695_p1, %p692_p0 }
   0x8   :  { %700 = shalt.err (!%p697_p2)
}
   0x9   :  { %s701_s21 = scalar_lea.vmem %s29_s13, 2048  ;;  %p706_p4 = scmp.lt.s32.totalorder %s29_s13, %s29_s13 }
   0xa   :  { %p702_p3 = scmp.ne.s32.totalorder %s29_s13, %s701_s21  ;;  %p707_p5 = scmp.lt.s32.totalorder %s701_s21, %s701_s21 }
   0xc   :  { %p708_p6 = por %p707_p5, %p706_p4 }
   0xe   :  { %p709_p7 = pnand %p708_p6, %p702_p3 }
  0x10   :  { %712 = shalt.err (!%p709_p7)
}
  0x11   :  { %s786_s22 = smov 64   ;;  %s787_s23 = smov 4  }
  0x12   :  { %34 = dma.hbm_to_vmem [thread:$0]  %s902_s1, 2048, %s29_s13, [#allocation6], %s786_s22, %s786_s22, %s787_s23  }
  0x13   :  { %s788_s26 = smov [#allocation2]   ;;  %s713_s30 = scalar_lea.hbm %s901_s0, 2048 }
  0x14   :  { %s16_s27 = sshll.u32 %s788_s26, 4  ;;  %p714_p8 = scmp.ne.s32.totalorder %s901_s0, %s713_s30  ;;  %s17_s27 = int_to_ptr.vmem [resolvable:$true] %s16_s27 }
  0x15   :  { %p717_p9 = scmp.lt.u32.totalorder %s713_s30, %s901_s0 }
  0x17   :  { %p719_p10 = pnand %p717_p9, %p714_p8 }
  0x19   :  { %722 = shalt.err (!%p719_p10)
}
  0x1a   :  { %s723_s8 = scalar_lea.vmem %s17_s27, 2048  ;;  %p728_p12 = scmp.lt.s32.totalorder %s17_s27, %s17_s27 }
  0x1b   :  { %p724_p11 = scmp.ne.s32.totalorder %s17_s27, %s723_s8  ;;  %p729_p13 = scmp.lt.s32.totalorder %s723_s8, %s723_s8 }
  0x1d   :  { %p730_p0 = por %p729_p13, %p728_p12 }
  0x1f   :  { %p731_p1 = pnand %p730_p0, %p724_p11 }
  0x21   :  { %734 = shalt.err (!%p731_p1)
}
  0x22   :  { %s789_s1 = smov 128   ;;  %s790_s9 = smov 8  }
  0x23   :  { %22 = dma.hbm_to_vmem [thread:$0]  %s901_s0, 2048, %s17_s27, [#allocation3], %s789_s1, %s789_s1, %s790_s9  }
  0x24   :  { %s791_s12 = smov [#allocation7]   ;;  %s735_s16 = scalar_lea.hbm %s903_s2, 16 }
  0x25   :  { %s41_s13 = sshll.u32 %s791_s12, 4  ;;  %p736_p2 = scmp.ne.s32.totalorder %s903_s2, %s735_s16  ;;  %s42_s13 = int_to_ptr.vmem [resolvable:$true] %s41_s13 }
  0x26   :  { %p739_p3 = scmp.lt.u32.totalorder %s735_s16, %s903_s2 }
  0x28   :  { %p741_p4 = pnand %p739_p3, %p736_p2 }
  0x2a   :  { %744 = shalt.err (!%p741_p4)
}
  0x2b   :  { %s745_s21 = scalar_lea.vmem %s42_s13, 16  ;;  %s749_s0 = scalar_lea.vmem %s42_s13, 32 }
  0x2c   :  { %p746_p5 = scmp.ne.s32.totalorder %s42_s13, %s745_s21  ;;  %p750_p6 = scmp.lt.s32.totalorder %s42_s13, %s42_s13 }
  0x2d   :  { %p751_p7 = scmp.lt.s32.totalorder %s749_s0, %s745_s21 }
  0x2f   :  { %p752_p8 = por %p751_p7, %p750_p6 }
  0x31   :  { %p753_p9 = pnand %p752_p8, %p746_p5 }
  0x33   :  { %756 = shalt.err (!%p753_p9)
}
  0x34   :  { %44 = dma.hbm_to_vmem [thread:$0]  %s903_s2, 16, %s42_s13, [#allocation6]  }
  0x35   :  { %779 = dma.done.wait [#allocation3], 2048  }
  0x36   :  { %780 = vsyncadd [#allocation3], 4294965248 }
  0x37   :  { %781 = dma.done.wait [#allocation6], 2064  }
  0x38   :  { %782 = vsyncadd [#allocation6], 4294965232  ;;  %v651_v0 = vld [vmem:[#allocation5 + $0x40] sm:$0xff]   ;;  %v653_v2 = vld [vmem:[#allocation5 + $0x48] sm:$0xff]   ;;  %vm463_vm0 = vcmask 191488   ;;  %s792_s2 = smov [#allocation8]  }
  0x39   :  { %v652_v1 = vld [vmem:[#allocation5] sm:$0xff]   ;;  %563 = vmatprep.subr.bf16.mxu0 %v651_v0  ;;  %627 = vmatprep.subr.bf16.mxu1 %v651_v0  ;;  %v654_v3 = vld [vmem:[#allocation5 + $0x8] sm:$0xff]   ;;  %v655_v4 = vld [vmem:[#allocation5 + $0x50] sm:$0xff]   ;;  %s485_s26 = sshll.u32 %s792_s2, 4  ;;  %s486_s26 = int_to_ptr.vmem [resolvable:$true] %s485_s26 }
  0x3a   :  { %564 = vmatpush3.bf16.msra.mxu0 %v652_v1  ;;  %635 = vmatpush3.bf16.msra.mxu1 %v652_v1  ;;  %v656_v5 = vld [vmem:[#allocation5 + $0x10] sm:$0xff]   ;;  %v657_v6 = vld [vmem:[#allocation5 + $0x58] sm:$0xff]   ;;  %v659_v8 = vld [vmem:[#allocation5 + $0x60] sm:$0xff]   ;;  %s757_s27 = scalar_lea.vmem %s486_s26, 1024  ;;  %p762_p11 = scmp.lt.s32.totalorder %s486_s26, %s486_s26 }
  0x3b   :  { %565 = vmatprep.subr.bf16.mxu0 %v653_v2  ;;  %628 = vmatprep.subr.bf16.mxu1 %v653_v2  ;;  %v658_v7 = vld [vmem:[#allocation5 + $0x18] sm:$0xff]   ;;  %v660_v9 = vld [vmem:[#allocation5 + $0x20] sm:$0xff]   ;;  %v661_v10 = vld [vmem:[#allocation5 + $0x68] sm:$0xff]   ;;  %p758_p10 = scmp.ne.s32.totalorder %s486_s26, %s757_s27  ;;  %p763_p12 = scmp.lt.s32.totalorder %s757_s27, %s757_s27 }
  0x3c   :  { %v669_v11 = vld [vmem:[#allocation2 + $0x4] ss:$8 sps:$4 sm:$0xff]   ;;  %v663_v14 = vld [vmem:[#allocation5 + $0x70] sm:$0xff]   ;;  %v665_v16 = vld [vmem:[#allocation5 + $0x78] sm:$0xff]  }
  0x3d   :  { %v672_v12 = vld [vmem:[#allocation2 + $0x44] ss:$8 sps:$4 sm:$0xff]   ;;  %318 = vmatprep.mubr.bf16.mxu0 %v669_v11  ;;  %v664_v15 = vld [vmem:[#allocation5 + $0x30] sm:$0xff]   ;;  %v666_v17 = vld [vmem:[#allocation5 + $0x38] sm:$0xff]   ;;  %p764_p13 = por %p763_p12, %p762_p11 }
  0x3e   :  { %566 = vmatpush3.bf16.msra.mxu0 %v654_v3  ;;  %636 = vmatpush3.bf16.msra.mxu1 %v654_v3  ;;  %v662_v13 = vld [vmem:[#allocation5 + $0x28] sm:$0xff]   ;;  %v673_v20 = vld [vmem:[#allocation2 + $0x14] ss:$8 sps:$4 sm:$0xff]   ;;  %v677_v22 = vld [vmem:[#allocation2 + $0x10] ss:$8 sps:$4 sm:$0xff]  }
  0x3f   :  { %567 = vmatprep.subr.bf16.mxu0 %v655_v4  ;;  %629 = vmatprep.subr.bf16.mxu1 %v655_v4  ;;  %v667_v18 = vld [vmem:[#allocation2] ss:$8 sps:$4 sm:$0xff]   ;;  %v675_v21 = vld [vmem:[#allocation2 + $0x54] ss:$8 sps:$4 sm:$0xff]   ;;  %v678_v23 = vld [vmem:[#allocation2 + $0x50] ss:$8 sps:$4 sm:$0xff]   ;;  %p765_p0 = pnand %p764_p13, %p758_p10 }
  0x40   :  { %350 = vmatprep.mubr.bf16.mxu1 %v672_v12  ;;  %v670_v19 = vld [vmem:[#allocation2 + $0x40] ss:$8 sps:$4 sm:$0xff]   ;;  %v679_v24 = vld [vmem:[#allocation2 + $0x24] ss:$8 sps:$4 sm:$0xff]   ;;  %v685_v28 = vld [vmem:[#allocation2 + $0x34] ss:$8 sps:$4 sm:$0xff]  }
  0x41   :  { %v681_v25 = vld [vmem:[#allocation2 + $0x64] ss:$8 sps:$4 sm:$0xff]   ;;  %v683_v26 = vld [vmem:[#allocation2 + $0x20] ss:$8 sps:$4 sm:$0xff]   ;;  %v687_v29 = vld [vmem:[#allocation2 + $0x74] ss:$8 sps:$4 sm:$0xff]  }
  0x42   :  { %568 = vmatpush3.bf16.msra.mxu0 %v656_v5  ;;  %637 = vmatpush3.bf16.msra.mxu1 %v656_v5  ;;  %v684_v27 = vld [vmem:[#allocation2 + $0x60] ss:$8 sps:$4 sm:$0xff]   ;;  %v689_v30 = vld [vmem:[#allocation2 + $0x30] ss:$8 sps:$4 sm:$0xff]  }
  0x43   :  { %569 = vmatprep.subr.bf16.mxu0 %v657_v6  ;;  %630 = vmatprep.subr.bf16.mxu1 %v657_v6  ;;  %v690_v31 = vld [vmem:[#allocation2 + $0x70] ss:$8 sps:$4 sm:$0xff]   ;;  %v852_v34 = vld [vmem:[#allocation7] ss:$0 sm:$0xff] }
  0x46   :  { %570 = vmatpush3.bf16.msra.mxu0 %v658_v7  ;;  %638 = vmatpush3.bf16.msra.mxu1 %v658_v7 }
  0x47   :  { %571 = vmatprep.subr.bf16.mxu0 %v659_v8  ;;  %631 = vmatprep.subr.bf16.mxu1 %v659_v8 }
  0x4a   :  { %572 = vmatpush3.bf16.msra.mxu0 %v660_v9  ;;  %639 = vmatpush3.bf16.msra.mxu1 %v660_v9 }
  0x4b   :  { %573 = vmatprep.subr.bf16.mxu0 %v661_v10  ;;  %632 = vmatprep.subr.bf16.mxu1 %v661_v10 }
  0x4e   :  { %574 = vmatpush3.bf16.msra.mxu0 %v662_v13  ;;  %640 = vmatpush3.bf16.msra.mxu1 %v662_v13 }
  0x4f   :  { %575 = vmatprep.subr.bf16.mxu0 %v663_v14  ;;  %633 = vmatprep.subr.bf16.mxu1 %v663_v14 }
  0x52   :  { %576 = vmatpush3.bf16.msra.mxu0 %v664_v15  ;;  %641 = vmatpush3.bf16.msra.mxu1 %v664_v15 }
  0x53   :  { %577 = vmatprep.subr.bf16.mxu0 %v665_v16  ;;  %634 = vmatprep.subr.bf16.mxu1 %v665_v16 }
  0x56   :  { %578 = vmatpush3.bf16.msra.mxu0 %v666_v17  ;;  %642 = vmatpush3.bf16.msra.mxu1 %v666_v17 }
  0x59   :  { %319 = vmatmul.mubr.bf16.vlgmr.msra.gmra.mrb[0].mxu0 %v667_v18  ;;  %351 = vmatmul.mubr.bf16.vlgmr.msra.gmra.mrb[0].mxu1 %v670_v19 }
  0x5a   :  { %326 = vmatprep.mubr.bf16.mxu0 %v673_v20  ;;  %358 = vmatprep.mubr.bf16.mxu1 %v675_v21 }
  0x61   :  { %327 = vmatmul.mubr.bf16.gmra.mrb[4].mxu0 %v677_v22  ;;  %359 = vmatmul.mubr.bf16.gmra.mrb[4].mxu1 %v678_v23 }
  0x62   :  { %334 = vmatprep.mubr.bf16.mxu0 %v679_v24  ;;  %366 = vmatprep.mubr.bf16.mxu1 %v681_v25 }
  0x69   :  { %335 = vmatmul.mubr.bf16.gmra.mrb[8].mxu0 %v683_v26  ;;  %367 = vmatmul.mubr.bf16.gmra.mrb[8].mxu1 %v684_v27 }
  0x6a   :  { %342 = vmatprep.mubr.bf16.mxu0 %v685_v28  ;;  %374 = vmatprep.mubr.bf16.mxu1 %v687_v29 }
  0x71   :  { %343 = vmatmul.mubr.bf16.gmra.mrb[12].mxu0 %v689_v30  ;;  %375 = vmatmul.mubr.bf16.gmra.mrb[12].mxu1 %v690_v31 }
 0x12c   :  { %v579_v32 = vpop.f32.mrb[0].mxu0  ;;  %v603_v33 = vpop.f32.mrb[0].mxu1 }
 0x12d   :  { %v580_v35 = vpop.f32.mrb[1].mxu0  ;;  %v604_v36 = vpop.f32.mrb[1].mxu1 }
 0x12e   :  { %v581_v37 = vadd.f32 %v580_v35, %v579_v32  ;;  %v605_v38 = vadd.f32 %v604_v36, %v603_v33  ;;  %v582_v39 = vpop.f32.mrb[2].mxu0  ;;  %v606_v40 = vpop.f32.mrb[2].mxu1 }
 0x12f   :  { %v583_v41 = vpop.f32.mrb[3].mxu0  ;;  %v607_v42 = vpop.f32.mrb[3].mxu1 }
 0x130   :  { %v321_v43 = vadd.f32 %v581_v37, %v852_v34  ;;  %v353_v44 = vadd.f32 %v605_v38, %v852_v34  ;;  %v584_v45 = vadd.f32 %v583_v41, %v582_v39  ;;  %v608_v46 = vadd.f32 %v607_v42, %v606_v40 }
 0x132   :  { %v383_v47 = vmax.f32 %v321_v43, 0.0  ;;  %v391_v48 = vmax.f32 %v353_v44, 0.0  ;;  %v324_v49 = vadd.f32 %v584_v45, %v852_v34  ;;  %v356_v50 = vadd.f32 %v608_v46, %v852_v34 }
 0x134   :  { %v547_v51 = vpack.c.bf16 %v383_v47, %v383_v47  ;;  %v555_v52 = vpack.c.bf16 %v391_v48, %v391_v48  ;;  %v384_v53 = vmax.f32 %v324_v49, 0.0  ;;  %v392_v54 = vmax.f32 %v356_v50, 0.0  ;;  %v585_v55 = vpop.f32.mrb[4].mxu0  ;;  %v609_v56 = vpop.f32.mrb[4].mxu1 }
 0x135   :  { %v586_v57 = vpop.f32.mrb[5].mxu0  ;;  %v610_v58 = vpop.f32.mrb[5].mxu1 }
 0x136   :  { %464 = vst.msk [vmem:[#allocation8] sm:$0xf] %vm463_vm0, %v547_v51  ;;  %472 = vst.msk [vmem:[#allocation8 + $0x20] sm:$0xf] %vm463_vm0, %v555_v52  ;;  %v548_v59 = vpack.c.bf16 %v384_v53, %v384_v53  ;;  %v556_v60 = vpack.c.bf16 %v392_v54, %v392_v54  ;;  %v587_v61 = vadd.f32 %v586_v57, %v585_v55  ;;  %v588_v63 = vpop.f32.mrb[6].mxu0  ;;  %v612_v0 = vpop.f32.mrb[6].mxu1 }
 0x137   :  { %v611_v62 = vadd.f32 %v610_v58, %v609_v56  ;;  %v589_v1 = vpop.f32.mrb[7].mxu0  ;;  %v613_v2 = vpop.f32.mrb[7].mxu1 }
 0x138   :  { %465 = vst.msk [vmem:[#allocation8 + $0x4] sm:$0xf] %vm463_vm0, %v548_v59  ;;  %473 = vst.msk [vmem:[#allocation8 + $0x24] sm:$0xf] %vm463_vm0, %v556_v60  ;;  %v329_v3 = vadd.f32 %v587_v61, %v852_v34  ;;  %v590_v5 = vadd.f32 %v589_v1, %v588_v63  ;;  %v614_v6 = vadd.f32 %v613_v2, %v612_v0 }
 0x139   :  { %v361_v4 = vadd.f32 %v611_v62, %v852_v34 }
 0x13a   :  { %v385_v7 = vmax.f32 %v329_v3, 0.0  ;;  %v332_v9 = vadd.f32 %v590_v5, %v852_v34  ;;  %v364_v10 = vadd.f32 %v614_v6, %v852_v34 }
 0x13b   :  { %v393_v8 = vmax.f32 %v361_v4, 0.0 }
 0x13c   :  { %v549_v11 = vpack.c.bf16 %v385_v7, %v385_v7  ;;  %v386_v13 = vmax.f32 %v332_v9, 0.0  ;;  %v394_v14 = vmax.f32 %v364_v10, 0.0  ;;  %v591_v15 = vpop.f32.mrb[8].mxu0  ;;  %v615_v16 = vpop.f32.mrb[8].mxu1 }
 0x13d   :  { %v557_v12 = vpack.c.bf16 %v393_v8, %v393_v8  ;;  %v592_v17 = vpop.f32.mrb[9].mxu0  ;;  %v616_v18 = vpop.f32.mrb[9].mxu1 }
 0x13e   :  { %466 = vst.msk [vmem:[#allocation8 + $0x8] sm:$0xf] %vm463_vm0, %v549_v11  ;;  %v550_v19 = vpack.c.bf16 %v386_v13, %v386_v13  ;;  %v558_v20 = vpack.c.bf16 %v394_v14, %v394_v14  ;;  %v593_v21 = vadd.f32 %v592_v17, %v591_v15  ;;  %v617_v22 = vadd.f32 %v616_v18, %v615_v16  ;;  %v594_v23 = vpop.f32.mrb[10].mxu0  ;;  %v618_v24 = vpop.f32.mrb[10].mxu1 }
 0x13f   :  { %474 = vst.msk [vmem:[#allocation8 + $0x28] sm:$0xf] %vm463_vm0, %v557_v12  ;;  %v595_v25 = vpop.f32.mrb[11].mxu0  ;;  %v619_v26 = vpop.f32.mrb[11].mxu1 }
 0x140   :  { %467 = vst.msk [vmem:[#allocation8 + $0xc] sm:$0xf] %vm463_vm0, %v550_v19  ;;  %475 = vst.msk [vmem:[#allocation8 + $0x2c] sm:$0xf] %vm463_vm0, %v558_v20  ;;  %v337_v27 = vadd.f32 %v593_v21, %v852_v34  ;;  %v369_v28 = vadd.f32 %v617_v22, %v852_v34  ;;  %v596_v29 = vadd.f32 %v595_v25, %v594_v23 }
 0x141   :  { %v620_v30 = vadd.f32 %v619_v26, %v618_v24 }
 0x142   :  { %v387_v31 = vmax.f32 %v337_v27, 0.0  ;;  %v395_v32 = vmax.f32 %v369_v28, 0.0  ;;  %v340_v33 = vadd.f32 %v596_v29, %v852_v34 }
 0x143   :  { %v372_v35 = vadd.f32 %v620_v30, %v852_v34 }
 0x144   :  { %v551_v36 = vpack.c.bf16 %v387_v31, %v387_v31  ;;  %v559_v37 = vpack.c.bf16 %v395_v32, %v395_v32  ;;  %v388_v38 = vmax.f32 %v340_v33, 0.0  ;;  %v597_v40 = vpop.f32.mrb[12].mxu0  ;;  %v621_v41 = vpop.f32.mrb[12].mxu1 }
 0x145   :  { %v396_v39 = vmax.f32 %v372_v35, 0.0  ;;  %v598_v42 = vpop.f32.mrb[13].mxu0  ;;  %v622_v43 = vpop.f32.mrb[13].mxu1 }
 0x146   :  { %468 = vst.msk [vmem:[#allocation8 + $0x10] sm:$0xf] %vm463_vm0, %v551_v36  ;;  %476 = vst.msk [vmem:[#allocation8 + $0x30] sm:$0xf] %vm463_vm0, %v559_v37  ;;  %v552_v44 = vpack.c.bf16 %v388_v38, %v388_v38  ;;  %v599_v46 = vadd.f32 %v598_v42, %v597_v40  ;;  %v623_v47 = vadd.f32 %v622_v43, %v621_v41  ;;  %v600_v48 = vpop.f32.mrb[14].mxu0  ;;  %v624_v49 = vpop.f32.mrb[14].mxu1 }
 0x147   :  { %v560_v45 = vpack.c.bf16 %v396_v39, %v396_v39  ;;  %v601_v50 = vpop.f32.mrb[15].mxu0  ;;  %v625_v51 = vpop.f32.mrb[15].mxu1 }
 0x148   :  { %469 = vst.msk [vmem:[#allocation8 + $0x14] sm:$0xf] %vm463_vm0, %v552_v44  ;;  %v345_v52 = vadd.f32 %v599_v46, %v852_v34  ;;  %v377_v53 = vadd.f32 %v623_v47, %v852_v34  ;;  %v602_v54 = vadd.f32 %v601_v50, %v600_v48  ;;  %v626_v55 = vadd.f32 %v625_v51, %v624_v49 }
 0x149   :  { %477 = vst.msk [vmem:[#allocation8 + $0x34] sm:$0xf] %vm463_vm0, %v560_v45 }
 0x14a   :  { %v389_v56 = vmax.f32 %v345_v52, 0.0  ;;  %v397_v57 = vmax.f32 %v377_v53, 0.0  ;;  %v348_v58 = vadd.f32 %v602_v54, %v852_v34  ;;  %v380_v59 = vadd.f32 %v626_v55, %v852_v34 }
 0x14c   :  { %v553_v60 = vpack.c.bf16 %v389_v56, %v389_v56  ;;  %v561_v61 = vpack.c.bf16 %v397_v57, %v397_v57  ;;  %v390_v62 = vmax.f32 %v348_v58, 0.0  ;;  %v398_v63 = vmax.f32 %v380_v59, 0.0 }
 0x14e   :  { %470 = vst.msk [vmem:[#allocation8 + $0x18] sm:$0xf] %vm463_vm0, %v553_v60  ;;  %478 = vst.msk [vmem:[#allocation8 + $0x38] sm:$0xf] %vm463_vm0, %v561_v61  ;;  %v554_v0 = vpack.c.bf16 %v390_v62, %v390_v62  ;;  %v562_v1 = vpack.c.bf16 %v398_v63, %v398_v63 }
 0x150   :  { %471 = vst.msk [vmem:[#allocation8 + $0x1c] sm:$0xf] %vm463_vm0, %v554_v0  ;;  %479 = vst.msk [vmem:[#allocation8 + $0x3c] sm:$0xf] %vm463_vm0, %v562_v1 }
 0x151   :  { %768 = shalt.err (!%p765_p0)
}
 0x152   :  { %s769_s30 = scalar_lea.hbm %s904_s3, 1024 }
 0x153   :  { %p770_p1 = scmp.ne.s32.totalorder %s904_s3, %s769_s30  ;;  %p773_p2 = scmp.lt.u32.totalorder %s769_s30, %s904_s3 }
 0x155   :  { %p775_p3 = pnand %p773_p2, %p770_p1 }
 0x157   :  { %778 = shalt.err (!%p775_p3)
}
 0x158   :  { %491 = dma.vmem_to_hbm [thread:$0]  %s486_s26, 1024, %s904_s3, [#allocation4], %s786_s22, %s786_s22, %s787_s23  }
 0x159   :  { %783 = dma.done.wait [#allocation4], 1024  }
 0x15a   :  { %784 = vsyncadd [#allocation4], 4294966272 }
 0x15b   :  { %495 = vsyncpa [#allocation3], 1 }
 0x15c   :  { %496 = vsyncpa [#allocation6], 1 }
 0x15d   :  { %497 = vsyncpa [#allocation4], 1 }

// kernel: deeplab_forward.10
= control target key start
LH: loop header
LB: loop body
LE: loop exit
PB: predicated region body
PF: predicated region fallthrough
CT: control target
= control target key end

     0   :  { %8 = vsyncpa [#allocation3], 0  ;;  %s585_s0 = inlined_call_operand.hbm [shape: bf16[32,256], index: 0, kind: input, shape index: {}]   ;;  %s586_s1 = inlined_call_operand.hbm [shape: bf16[256,32], index: 1, kind: input, shape index: {}]   ;;  %s587_s2 = inlined_call_operand.hbm [shape: f32[1,32], index: 2, kind: input, shape index: {}]   ;;  %s588_s3 = inlined_call_operand.hbm [shape: bf16[32,32], index: 3, kind: output, shape index: {}]  }
   0x1   :  { %9 = vsyncpa [#allocation6], 0 }
   0x2   :  { %10 = vsyncpa [#allocation4], 0  ;;  %s503_s12 = smov [#allocation5]   ;;  %s409_s16 = scalar_lea.hbm %s586_s1, 2048 }
   0x3   :  { %s28_s13 = sshll.u32 %s503_s12, 4  ;;  %p410_p0 = scmp.ne.s32.totalorder %s586_s1, %s409_s16  ;;  %s29_s13 = int_to_ptr.vmem [resolvable:$true] %s28_s13 }
   0x4   :  { %p413_p1 = scmp.lt.u32.totalorder %s409_s16, %s586_s1 }
   0x6   :  { %p415_p2 = pnand %p413_p1, %p410_p0 }
   0x8   :  { %418 = shalt.err (!%p415_p2)
}
   0x9   :  { %s419_s21 = scalar_lea.vmem %s29_s13, 2048  ;;  %p424_p4 = scmp.lt.s32.totalorder %s29_s13, %s29_s13 }
   0xa   :  { %p420_p3 = scmp.ne.s32.totalorder %s29_s13, %s419_s21  ;;  %p425_p5 = scmp.lt.s32.totalorder %s419_s21, %s419_s21 }
   0xc   :  { %p426_p6 = por %p425_p5, %p424_p4 }
   0xe   :  { %p427_p7 = pnand %p426_p6, %p420_p3 }
  0x10   :  { %430 = shalt.err (!%p427_p7)
}
  0x11   :  { %s504_s22 = smov 64   ;;  %s505_s23 = smov 4  }
  0x12   :  { %34 = dma.hbm_to_vmem [thread:$0]  %s586_s1, 2048, %s29_s13, [#allocation6], %s504_s22, %s504_s22, %s505_s23  }
  0x13   :  { %s506_s26 = smov [#allocation2]   ;;  %s431_s30 = scalar_lea.hbm %s585_s0, 512 }
  0x14   :  { %s16_s27 = sshll.u32 %s506_s26, 4  ;;  %p432_p8 = scmp.ne.s32.totalorder %s585_s0, %s431_s30  ;;  %s17_s27 = int_to_ptr.vmem [resolvable:$true] %s16_s27 }
  0x15   :  { %p435_p9 = scmp.lt.u32.totalorder %s431_s30, %s585_s0 }
  0x17   :  { %p437_p10 = pnand %p435_p9, %p432_p8 }
  0x19   :  { %440 = shalt.err (!%p437_p10)
}
  0x1a   :  { %s441_s8 = scalar_lea.vmem %s17_s27, 512  ;;  %p446_p12 = scmp.lt.s32.totalorder %s17_s27, %s17_s27 }
  0x1b   :  { %p442_p11 = scmp.ne.s32.totalorder %s17_s27, %s441_s8  ;;  %p447_p13 = scmp.lt.s32.totalorder %s441_s8, %s441_s8 }
  0x1d   :  { %p448_p0 = por %p447_p13, %p446_p12 }
  0x1f   :  { %p449_p1 = pnand %p448_p0, %p442_p11 }
  0x21   :  { %452 = shalt.err (!%p449_p1)
}
  0x22   :  { %s507_s1 = smov 128   ;;  %s508_s9 = smov 8  }
  0x23   :  { %22 = dma.hbm_to_vmem [thread:$0]  %s585_s0, 512, %s17_s27, [#allocation3], %s507_s1, %s507_s1, %s508_s9  }
  0x24   :  { %s509_s12 = smov [#allocation7]   ;;  %s453_s16 = scalar_lea.hbm %s587_s2, 16 }
  0x25   :  { %s41_s13 = sshll.u32 %s509_s12, 4  ;;  %p454_p2 = scmp.ne.s32.totalorder %s587_s2, %s453_s16  ;;  %s42_s13 = int_to_ptr.vmem [resolvable:$true] %s41_s13 }
  0x26   :  { %p457_p3 = scmp.lt.u32.totalorder %s453_s16, %s587_s2 }
  0x28   :  { %p459_p4 = pnand %p457_p3, %p454_p2 }
  0x2a   :  { %462 = shalt.err (!%p459_p4)
}
  0x2b   :  { %s463_s21 = scalar_lea.vmem %s42_s13, 16  ;;  %s467_s0 = scalar_lea.vmem %s42_s13, 32 }
  0x2c   :  { %p464_p5 = scmp.ne.s32.totalorder %s42_s13, %s463_s21  ;;  %p468_p6 = scmp.lt.s32.totalorder %s42_s13, %s42_s13 }
  0x2d   :  { %p469_p7 = scmp.lt.s32.totalorder %s467_s0, %s463_s21 }
  0x2f   :  { %p470_p8 = por %p469_p7, %p468_p6 }
  0x31   :  { %p471_p9 = pnand %p470_p8, %p464_p5 }
  0x33   :  { %474 = shalt.err (!%p471_p9)
}
  0x34   :  { %44 = dma.hbm_to_vmem [thread:$0]  %s587_s2, 16, %s42_s13, [#allocation6]  }
  0x35   :  { %497 = dma.done.wait [#allocation3], 512  }
  0x36   :  { %498 = vsyncadd [#allocation3], 4294966784 }
  0x37   :  { %499 = dma.done.wait [#allocation6], 2064  }
  0x38   :  { %500 = vsyncadd [#allocation6], 4294965232  ;;  %v387_v0 = vld [vmem:[#allocation5 + $0x40] sm:$0xff]   ;;  %v389_v2 = vld [vmem:[#allocation5 + $0x48] sm:$0xff]   ;;  %vm283_vm0 = vcmask 257024   ;;  %s510_s2 = smov [#allocation8]  }
  0x39   :  { %v388_v1 = vld [vmem:[#allocation5] sm:$0xff]   ;;  %335 = vmatprep.subr.bf16.mxu0 %v387_v0  ;;  %363 = vmatprep.subr.bf16.mxu1 %v387_v0  ;;  %v390_v3 = vld [vmem:[#allocation5 + $0x8] sm:$0xff]   ;;  %v391_v4 = vld [vmem:[#allocation5 + $0x50] sm:$0xff]   ;;  %s293_s26 = sshll.u32 %s510_s2, 4  ;;  %s294_s26 = int_to_ptr.vmem [resolvable:$true] %s293_s26 }
  0x3a   :  { %336 = vmatpush3.bf16.msra.mxu0 %v388_v1  ;;  %371 = vmatpush3.bf16.msra.mxu1 %v388_v1  ;;  %v392_v5 = vld [vmem:[#allocation5 + $0x10] sm:$0xff]   ;;  %v393_v6 = vld [vmem:[#allocation5 + $0x58] sm:$0xff]   ;;  %v395_v8 = vld [vmem:[#allocation5 + $0x60] sm:$0xff]   ;;  %s475_s27 = scalar_lea.vmem %s294_s26, 256  ;;  %p480_p11 = scmp.lt.s32.totalorder %s294_s26, %s294_s26 }
  0x3b   :  { %337 = vmatprep.subr.bf16.mxu0 %v389_v2  ;;  %364 = vmatprep.subr.bf16.mxu1 %v389_v2  ;;  %v394_v7 = vld [vmem:[#allocation5 + $0x18] sm:$0xff]   ;;  %v396_v9 = vld [vmem:[#allocation5 + $0x20] sm:$0xff]   ;;  %v397_v10 = vld [vmem:[#allocation5 + $0x68] sm:$0xff]   ;;  %p476_p10 = scmp.ne.s32.totalorder %s294_s26, %s475_s27  ;;  %p481_p12 = scmp.lt.s32.totalorder %s475_s27, %s475_s27 }
  0x3c   :  { %v405_v11 = vld [vmem:[#allocation2 + $0x4] ss:$8 sps:$4 sm:$0xff]   ;;  %v408_v12 = vld [vmem:[#allocation2 + $0x14] ss:$8 sps:$4 sm:$0xff]   ;;  %v403_v18 = vld [vmem:[#allocation2] ss:$8 sps:$4 sm:$0xff]  }
  0x3d   :  { %v398_v13 = vld [vmem:[#allocation5 + $0x28] sm:$0xff]   ;;  %v399_v14 = vld [vmem:[#allocation5 + $0x70] sm:$0xff]   ;;  %246 = vmatprep.mubr.bf16.mxu0 %v405_v11  ;;  %254 = vmatprep.mubr.bf16.mxu1 %v408_v12  ;;  %v401_v16 = vld [vmem:[#allocation5 + $0x78] sm:$0xff]   ;;  %p482_p13 = por %p481_p12, %p480_p11 }
  0x3e   :  { %338 = vmatpush3.bf16.msra.mxu0 %v390_v3  ;;  %372 = vmatpush3.bf16.msra.mxu1 %v390_v3  ;;  %v400_v15 = vld [vmem:[#allocation5 + $0x30] sm:$0xff]   ;;  %v402_v17 = vld [vmem:[#allocation5 + $0x38] sm:$0xff]   ;;  %v306_v22 = vld [vmem:[#allocation7] ss:$0 sm:$0xff] }
  0x3f   :  { %339 = vmatprep.subr.bf16.mxu0 %v391_v4  ;;  %365 = vmatprep.subr.bf16.mxu1 %v391_v4  ;;  %v406_v19 = vld [vmem:[#allocation2 + $0x10] ss:$8 sps:$4 sm:$0xff]   ;;  %p483_p0 = pnand %p482_p13, %p476_p10 }
  0x42   :  { %340 = vmatpush3.bf16.msra.mxu0 %v392_v5  ;;  %373 = vmatpush3.bf16.msra.mxu1 %v392_v5 }
  0x43   :  { %341 = vmatprep.subr.bf16.mxu0 %v393_v6  ;;  %366 = vmatprep.subr.bf16.mxu1 %v393_v6 }
  0x46   :  { %342 = vmatpush3.bf16.msra.mxu0 %v394_v7  ;;  %374 = vmatpush3.bf16.msra.mxu1 %v394_v7 }
  0x47   :  { %343 = vmatprep.subr.bf16.mxu0 %v395_v8  ;;  %367 = vmatprep.subr.bf16.mxu1 %v395_v8 }
  0x4a   :  { %344 = vmatpush3.bf16.msra.mxu0 %v396_v9  ;;  %375 = vmatpush3.bf16.msra.mxu1 %v396_v9 }
  0x4b   :  { %345 = vmatprep.subr.bf16.mxu0 %v397_v10  ;;  %368 = vmatprep.subr.bf16.mxu1 %v397_v10 }
  0x4e   :  { %346 = vmatpush3.bf16.msra.mxu0 %v398_v13  ;;  %376 = vmatpush3.bf16.msra.mxu1 %v398_v13 }
  0x4f   :  { %347 = vmatprep.subr.bf16.mxu0 %v399_v14  ;;  %369 = vmatprep.subr.bf16.mxu1 %v399_v14 }
  0x52   :  { %348 = vmatpush3.bf16.msra.mxu0 %v400_v15  ;;  %377 = vmatpush3.bf16.msra.mxu1 %v400_v15 }
  0x53   :  { %349 = vmatprep.subr.bf16.mxu0 %v401_v16  ;;  %370 = vmatprep.subr.bf16.mxu1 %v401_v16 }
  0x56   :  { %350 = vmatpush3.bf16.msra.mxu0 %v402_v17  ;;  %378 = vmatpush3.bf16.msra.mxu1 %v402_v17 }
  0x59   :  { %247 = vmatmul.mubr.bf16.vlgmr.msra.gmra.mrb[0].mxu0 %v403_v18  ;;  %255 = vmatmul.mubr.bf16.vlgmr.msra.gmra.mrb[0].mxu1 %v406_v19 }
 0x12c   :  { %v351_v20 = vpop.f32.mrb[0].mxu0  ;;  %v357_v21 = vpop.f32.mrb[0].mxu1 }
 0x12d   :  { %v352_v23 = vpop.f32.mrb[1].mxu0  ;;  %v358_v24 = vpop.f32.mrb[1].mxu1 }
 0x12e   :  { %v353_v25 = vadd.f32 %v352_v23, %v351_v20  ;;  %v359_v26 = vadd.f32 %v358_v24, %v357_v21  ;;  %v354_v27 = vpop.f32.mrb[2].mxu0  ;;  %v360_v28 = vpop.f32.mrb[2].mxu1 }
 0x12f   :  { %v355_v29 = vpop.f32.mrb[3].mxu0  ;;  %v361_v30 = vpop.f32.mrb[3].mxu1 }
 0x130   :  { %v249_v31 = vadd.f32 %v353_v25, %v306_v22  ;;  %v257_v32 = vadd.f32 %v359_v26, %v306_v22  ;;  %v356_v33 = vadd.f32 %v355_v29, %v354_v27  ;;  %v362_v34 = vadd.f32 %v361_v30, %v360_v28 }
 0x132   :  { %v263_v35 = vmax.f32 %v249_v31, 0.0  ;;  %v265_v36 = vmax.f32 %v257_v32, 0.0  ;;  %v252_v37 = vadd.f32 %v356_v33, %v306_v22  ;;  %v260_v38 = vadd.f32 %v362_v34, %v306_v22 }
 0x134   :  { %v331_v39 = vpack.c.bf16 %v263_v35, %v263_v35  ;;  %v333_v40 = vpack.c.bf16 %v265_v36, %v265_v36  ;;  %v264_v41 = vmax.f32 %v252_v37, 0.0  ;;  %v266_v42 = vmax.f32 %v260_v38, 0.0 }
 0x136   :  { %284 = vst.msk [vmem:[#allocation8] sm:$0xf] %vm283_vm0, %v331_v39  ;;  %286 = vst.msk [vmem:[#allocation8 + $0x8] sm:$0xf] %vm283_vm0, %v333_v40  ;;  %v332_v43 = vpack.c.bf16 %v264_v41, %v264_v41  ;;  %v334_v44 = vpack.c.bf16 %v266_v42, %v266_v42 }
 0x138   :  { %285 = vst.msk [vmem:[#allocation8 + $0x4] sm:$0xf] %vm283_vm0, %v332_v43  ;;  %287 = vst.msk [vmem:[#allocation8 + $0xc] sm:$0xf] %vm283_vm0, %v334_v44 }
 0x139   :  { %486 = shalt.err (!%p483_p0)
}
 0x13a   :  { %s487_s30 = scalar_lea.hbm %s588_s3, 256 }
 0x13b   :  { %p488_p1 = scmp.ne.s32.totalorder %s588_s3, %s487_s30  ;;  %p491_p2 = scmp.lt.u32.totalorder %s487_s30, %s588_s3 }
 0x13d   :  { %p493_p3 = pnand %p491_p2, %p488_p1 }
 0x13f   :  { %496 = shalt.err (!%p493_p3)
}
 0x140   :  { %299 = dma.vmem_to_hbm [thread:$0]  %s294_s26, 256, %s588_s3, [#allocation4], %s504_s22, %s504_s22, %s505_s23  }
 0x141   :  { %501 = dma.done.wait [#allocation4], 256  }
 0x142   :  { %502 = vsyncadd [#allocation4], 4294967040 }
 0x143   :  { %303 = vsyncpa [#allocation3], 1 }
 0x144   :  { %304 = vsyncpa [#allocation6], 1 }
 0x145   :  { %305 = vsyncpa [#allocation4], 1 }

// kernel: deeplab_forward.11
= control target key start
LH: loop header
LB: loop body
LE: loop exit
PB: predicated region body
PF: predicated region fallthrough
CT: control target
= control target key end

     0   :  { %8 = vsyncpa [#allocation3], 0  ;;  %s649_s0 = inlined_call_operand.hbm [shape: bf16[8,384], index: 0, kind: input, shape index: {}]   ;;  %s650_s1 = inlined_call_operand.hbm [shape: bf16[384,48], index: 1, kind: input, shape index: {}]   ;;  %s651_s2 = inlined_call_operand.hbm [shape: f32[1,48], index: 2, kind: input, shape index: {}]   ;;  %s652_s3 = inlined_call_operand.hbm [shape: bf16[8,48], index: 3, kind: output, shape index: {}]  }
   0x1   :  { %9 = vsyncpa [#allocation6], 0 }
   0x2   :  { %10 = vsyncpa [#allocation4], 0  ;;  %s573_s12 = smov [#allocation5]   ;;  %s479_s16 = scalar_lea.hbm %s650_s1, 3072 }
   0x3   :  { %s26_s13 = sshll.u32 %s573_s12, 4  ;;  %p480_p0 = scmp.ne.s32.totalorder %s650_s1, %s479_s16  ;;  %s27_s13 = int_to_ptr.vmem [resolvable:$true] %s26_s13 }
   0x4   :  { %p483_p1 = scmp.lt.u32.totalorder %s479_s16, %s650_s1 }
   0x6   :  { %p485_p2 = pnand %p483_p1, %p480_p0 }
   0x8   :  { %488 = shalt.err (!%p485_p2)
}
   0x9   :  { %s489_s21 = scalar_lea.vmem %s27_s13, 3072  ;;  %p494_p4 = scmp.lt.s32.totalorder %s27_s13, %s27_s13 }
   0xa   :  { %p490_p3 = scmp.ne.s32.totalorder %s27_s13, %s489_s21  ;;  %p495_p5 = scmp.lt.s32.totalorder %s489_s21, %s489_s21 }
   0xc   :  { %p496_p6 = por %p495_p5, %p494_p4 }
   0xe   :  { %p497_p7 = pnand %p496_p6, %p490_p3 }
  0x10   :  { %500 = shalt.err (!%p497_p7)
}
  0x11   :  { %s574_s22 = smov 64   ;;  %s575_s23 = smov 4  }
  0x12   :  { %32 = dma.hbm_to_vmem [thread:$0]  %s650_s1, 3072, %s27_s13, [#allocation6], %s574_s22, %s574_s22, %s575_s23  }
  0x13   :  { %s576_s26 = smov [#allocation2]   ;;  %s577_s28 = smov [#allocation7]  }
  0x14   :  { %s17_s27 = sshll.u32 %s576_s26, 4  ;;  %s39_s29 = sshll.u32 %s577_s28, 4  ;;  %s18_s27 = int_to_ptr.vmem [resolvable:$true] %s17_s27  ;;  %s40_s29 = int_to_ptr.vmem [resolvable:$true] %s39_s29 }
  0x15   :  { %s501_s5 = scalar_lea.hbm %s649_s0, 192 }
  0x16   :  { %p502_p8 = scmp.ne.s32.totalorder %s649_s0, %s501_s5  ;;  %p505_p9 = scmp.lt.u32.totalorder %s501_s5, %s649_s0 }
  0x18   :  { %p507_p10 = pnand %p505_p9, %p502_p8 }
  0x1a   :  { %510 = shalt.err (!%p507_p10)
}
  0x1b   :  { %s511_s1 = scalar_lea.vmem %s18_s27, 192  ;;  %p516_p12 = scmp.lt.s32.totalorder %s18_s27, %s18_s27 }
  0x1c   :  { %p512_p11 = scmp.ne.s32.totalorder %s18_s27, %s511_s1  ;;  %p517_p13 = scmp.lt.s32.totalorder %s511_s1, %s511_s1 }
  0x1e   :  { %p518_p0 = por %p517_p13, %p516_p12 }
  0x20   :  { %p519_p1 = pnand %p518_p0, %p512_p11 }
  0x22   :  { %522 = shalt.err (!%p519_p1)
}
  0x23   :  { %20 = dma.hbm_to_vmem [thread:$0]  %s649_s0, 192, %s18_s27, [#allocation3]  }
  0x24   :  { %s523_s14 = scalar_lea.hbm %s651_s2, 16 }
  0x25   :  { %p524_p2 = scmp.ne.s32.totalorder %s651_s2, %s523_s14  ;;  %p527_p3 = scmp.lt.u32.totalorder %s523_s14, %s651_s2 }
  0x27   :  { %p529_p4 = pnand %p527_p3, %p524_p2 }
  0x29   :  { %532 = shalt.err (!%p529_p4)
}
  0x2a   :  { %s533_s19 = scalar_lea.vmem %s40_s29, 16  ;;  %s537_s20 = scalar_lea.vmem %s40_s29, 32 }
  0x2b   :  { %p534_p5 = scmp.ne.s32.totalorder %s40_s29, %s533_s19  ;;  %p538_p6 = scmp.lt.s32.totalorder %s40_s29, %s40_s29 }
  0x2c   :  { %p539_p7 = scmp.lt.s32.totalorder %s537_s20, %s533_s19 }
  0x2e   :  { %p540_p8 = por %p539_p7, %p538_p6 }
  0x30   :  { %p541_p9 = pnand %p540_p8, %p534_p5 }
  0x32   :  { %544 = shalt.err (!%p541_p9)
}
  0x33   :  { %42 = dma.hbm_to_vmem [thread:$0]  %s651_s2, 16, %s40_s29, [#allocation6]  }
  0x34   :  { %567 = dma.done.wait [#allocation3], 192  }
  0x35   :  { %568 = vsyncadd [#allocation3], 4294967104 }
  0x36   :  { %569 = dma.done.wait [#allocation6], 3088  }
  0x37   :  { %570 = vsyncadd [#allocation6], 4294964208  ;;  %v578_v0 = vmov 0.0   ;;  %vm579_vm0 = vmmov 0   ;;  %v452_v1 = vld [vmem:[#allocation5 + $0x40] sm:$0xff]   ;;  %v455_v4 = vld [vmem:[#allocation5 + $0x48] sm:$0xff]  }
  0x38   :  { %424 = vmatprep.subr.bf16.mxu1 %v578_v0  ;;  %440 = vmatprep.mubr.msk.bf16.mxu1 %vm579_vm0, %v578_v0  ;;  %v453_v2 = vld [vmem:[#allocation5] sm:$0xff]   ;;  %v456_v5 = vld [vmem:[#allocation5 + $0x8] sm:$0xff]   ;;  %v458_v7 = vld [vmem:[#allocation5 + $0x50] sm:$0xff]   ;;  %s580_s2 = smov [#allocation8]   ;;  %vm347_vm1 = vcmask 388096  }
  0x39   :  { %393 = vmatprep.subr.bf16.mxu0 %v452_v1  ;;  %v454_v3 = vld [vmem:[#allocation5 + $0x80] sm:$0xff]   ;;  %v457_v6 = vld [vmem:[#allocation5 + $0x88] sm:$0xff]   ;;  %v459_v8 = vld [vmem:[#allocation5 + $0x10] sm:$0xff]   ;;  %s355_s22 = sshll.u32 %s580_s2, 4  ;;  %s356_s22 = int_to_ptr.vmem [resolvable:$true] %s355_s22 }
  0x3a   :  { %394 = vmatpush3.bf16.msra.mxu0 %v453_v2  ;;  %425 = vmatpush3.bf16.msra.mxu1 %v454_v3  ;;  %v460_v9 = vld [vmem:[#allocation5 + $0x90] sm:$0xff]   ;;  %v461_v10 = vld [vmem:[#allocation5 + $0x58] sm:$0xff]   ;;  %v464_v13 = vld [vmem:[#allocation5 + $0x60] sm:$0xff]   ;;  %s545_s23 = scalar_lea.vmem %s356_s22, 64  ;;  %p550_p11 = scmp.lt.s32.totalorder %s356_s22, %s356_s22 }
  0x3b   :  { %395 = vmatprep.subr.bf16.mxu0 %v455_v4  ;;  %426 = vmatprep.subr.bf16.mxu1 %v578_v0  ;;  %v462_v11 = vld [vmem:[#allocation5 + $0x18] sm:$0xff]   ;;  %v465_v14 = vld [vmem:[#allocation5 + $0x20] sm:$0xff]   ;;  %v467_v16 = vld [vmem:[#allocation5 + $0x68] sm:$0xff]   ;;  %p546_p10 = scmp.ne.s32.totalorder %s356_s22, %s545_s23  ;;  %p551_p12 = scmp.lt.s32.totalorder %s545_s23, %s545_s23 }
  0x3c   :  { %v463_v12 = vld [vmem:[#allocation5 + $0x98] sm:$0xff]   ;;  %v466_v15 = vld [vmem:[#allocation5 + $0xa0] sm:$0xff]   ;;  %v468_v17 = vld [vmem:[#allocation5 + $0x28] sm:$0xff]  }
  0x3d   :  { %v469_v18 = vld [vmem:[#allocation5 + $0xa8] sm:$0xff]   ;;  %v470_v19 = vld [vmem:[#allocation5 + $0x70] sm:$0xff]   ;;  %v473_v23 = vld [vmem:[#allocation5 + $0x78] sm:$0xff]   ;;  %p552_p13 = por %p551_p12, %p550_p11 }
  0x3e   :  { %396 = vmatpush3.bf16.msra.mxu0 %v456_v5  ;;  %427 = vmatpush3.bf16.msra.mxu1 %v457_v6  ;;  %v471_v20 = vld [vmem:[#allocation5 + $0x30] sm:$0xff]   ;;  %v474_v25 = vld [vmem:[#allocation5 + $0x38] sm:$0xff]   ;;  %v365_v31 = vld [vmem:[#allocation7] ss:$0 sm:$0xff] }
  0x3f   :  { %397 = vmatprep.subr.bf16.mxu0 %v458_v7  ;;  %428 = vmatprep.subr.bf16.mxu1 %v578_v0  ;;  %v53_v21 = vld [vmem:[#allocation2] sm:$0xff]  ;;  %v478_v28 = vld [vmem:[#allocation2 + $0x8] ss:$0 sps:$4 sm:$0xff]   ;;  %p553_p0 = pnand %p552_p13, %p546_p10 }
  0x40   :  { %v472_v22 = vld [vmem:[#allocation5 + $0xb0] sm:$0xff]   ;;  %v367_v24 = vcombine.high %v53_v21, %v53_v21  ;;  %v477_v26 = vld [vmem:[#allocation5 + $0xb8] sm:$0xff]   ;;  %v366_v27 = vcombine.low %v53_v21, %v53_v21 }
  0x42   :  { %398 = vmatpush3.bf16.msra.mxu0 %v459_v8  ;;  %429 = vmatpush3.bf16.msra.mxu1 %v460_v9 }
  0x43   :  { %399 = vmatprep.subr.bf16.mxu0 %v461_v10  ;;  %430 = vmatprep.subr.bf16.mxu1 %v578_v0 }
  0x44   :  { %297 = vmatprep.mubr.bf16.mxu0 %v367_v24 }
  0x46   :  { %400 = vmatpush3.bf16.msra.mxu0 %v462_v11  ;;  %431 = vmatpush3.bf16.msra.mxu1 %v463_v12 }
  0x47   :  { %401 = vmatprep.subr.bf16.mxu0 %v464_v13  ;;  %432 = vmatprep.subr.bf16.mxu1 %v578_v0 }
  0x4a   :  { %402 = vmatpush3.bf16.msra.mxu0 %v465_v14  ;;  %433 = vmatpush3.bf16.msra.mxu1 %v466_v15 }
  0x4b   :  { %403 = vmatprep.subr.bf16.mxu0 %v467_v16  ;;  %434 = vmatprep.subr.bf16.mxu1 %v578_v0 }
  0x4e   :  { %404 = vmatpush3.bf16.msra.mxu0 %v468_v17  ;;  %435 = vmatpush3.bf16.msra.mxu1 %v469_v18 }
  0x4f   :  { %405 = vmatprep.subr.bf16.mxu0 %v470_v19  ;;  %436 = vmatprep.subr.bf16.mxu1 %v578_v0 }
  0x52   :  { %406 = vmatpush3.bf16.msra.mxu0 %v471_v20  ;;  %437 = vmatpush3.bf16.msra.mxu1 %v472_v22 }
  0x53   :  { %407 = vmatprep.subr.bf16.mxu0 %v473_v23  ;;  %438 = vmatprep.subr.bf16.mxu1 %v578_v0 }
  0x56   :  { %408 = vmatpush3.bf16.msra.mxu0 %v474_v25  ;;  %439 = vmatpush3.bf16.msra.mxu1 %v477_v26 }
  0x59   :  { %298 = vmatmul.mubr.bf16.vlgmr.msra.gmra.mrb[0].mxu0 %v366_v27  ;;  %441 = vmatmul.mubr.bf16.vlgmr.msra.gmra.mrb[0].mxu1 %v478_v28 }
 0x12c   :  { %v409_v29 = vpop.f32.mrb[0].mxu0  ;;  %v339_v32 = vpop.f32.mrb[0].mxu1 }
 0x12d   :  { %v410_v30 = vpop.f32.mrb[1].mxu0  ;;  %v442_v35 = vpop.f32.mrb[1].mxu1 }
 0x12e   :  { %v411_v33 = vadd.f32 %v410_v30, %v409_v29  ;;  %v412_v34 = vpop.f32.mrb[2].mxu0  ;;  %v342_v37 = vpop.f32.mrb[2].mxu1 }
 0x12f   :  { %v413_v36 = vpop.f32.mrb[3].mxu0  ;;  %v443_v39 = vpop.f32.mrb[3].mxu1 }
 0x130   :  { %v300_v38 = vadd.f32 %v411_v33, %v365_v31 }
 0x132   :  { %v340_v40 = vadd.f32 %v339_v32, %v300_v38 }
 0x134   :  { %v345_v41 = vmax.f32 %v340_v40, 0.0 }
 0x136   :  { %v346_v42 = vpack.c.bf16 %v345_v41, %v345_v41 }
 0x138   :  { %348 = vst.msk [vmem:[#allocation8] sm:$0xf] %vm347_vm1, %v346_v42 }
 0x139   :  { %556 = shalt.err (!%p553_p0)
}
 0x13a   :  { %s557_s26 = scalar_lea.hbm %s652_s3, 64 }
 0x13b   :  { %p558_p1 = scmp.ne.s32.totalorder %s652_s3, %s557_s26  ;;  %p561_p2 = scmp.lt.u32.totalorder %s557_s26, %s652_s3 }
 0x13d   :  { %p563_p3 = pnand %p561_p2, %p558_p1 }
 0x13f   :  { %566 = shalt.err (!%p563_p3)
}
 0x140   :  { %358 = dma.vmem_to_hbm [thread:$0]  %s356_s22, 64, %s652_s3, [#allocation4]  }
 0x141   :  { %571 = dma.done.wait [#allocation4], 64  }
 0x142   :  { %572 = vsyncadd [#allocation4], 4294967232 }
 0x143   :  { %362 = vsyncpa [#allocation3], 1 }
 0x144   :  { %363 = vsyncpa [#allocation6], 1 }
 0x145   :  { %364 = vsyncpa [#allocation4], 1 }

// kernel: deeplab_forward.13
= control target key start
LH: loop header
LB: loop body
LE: loop exit
PB: predicated region body
PF: predicated region fallthrough
CT: control target
= control target key end

     0   :  { %8 = vsyncpa [#allocation3], 0  ;;  %s737_s0 = inlined_call_operand.hbm [shape: bf16[128,128], index: 0, kind: input, shape index: {}]   ;;  %s738_s1 = inlined_call_operand.hbm [shape: bf16[128,16], index: 1, kind: input, shape index: {}]   ;;  %s739_s2 = inlined_call_operand.hbm [shape: f32[1,16], index: 2, kind: input, shape index: {}]   ;;  %s740_s3 = inlined_call_operand.hbm [shape: bf16[128,16], index: 3, kind: output, shape index: {}]  }
   0x1   :  { %9 = vsyncpa [#allocation6], 0 }
   0x2   :  { %10 = vsyncpa [#allocation4], 0  ;;  %s631_s12 = smov [#allocation5]   ;;  %s632_s14 = smov [#allocation2]  }
   0x3   :  { %s28_s13 = sshll.u32 %s631_s12, 4  ;;  %s16_s15 = sshll.u32 %s632_s14, 4  ;;  %s29_s13 = int_to_ptr.vmem [resolvable:$true] %s28_s13  ;;  %s657_s15 = int_to_ptr.vmem [resolvable:$true] %s16_s15 }
   0x4   :  { %s537_s18 = scalar_lea.hbm %s738_s1, 1024 }
   0x5   :  { %p538_p0 = scmp.ne.s32.totalorder %s738_s1, %s537_s18  ;;  %p541_p1 = scmp.lt.u32.totalorder %s537_s18, %s738_s1 }
   0x7   :  { %p543_p2 = pnand %p541_p1, %p538_p0 }
   0x9   :  { %546 = shalt.err (!%p543_p2)
}
   0xa   :  { %s547_s23 = scalar_lea.vmem %s29_s13, 1024  ;;  %p552_p4 = scmp.lt.s32.totalorder %s29_s13, %s29_s13 }
   0xb   :  { %p548_p3 = scmp.ne.s32.totalorder %s29_s13, %s547_s23  ;;  %p553_p5 = scmp.lt.s32.totalorder %s547_s23, %s547_s23 }
   0xd   :  { %p554_p6 = por %p553_p5, %p552_p4 }
   0xf   :  { %p555_p7 = pnand %p554_p6, %p548_p3 }
  0x11   :  { %558 = shalt.err (!%p555_p7)
}
  0x12   :  { %s633_s24 = smov 64   ;;  %s634_s25 = smov 4  }
  0x13   :  { %34 = dma.hbm_to_vmem [thread:$0]  %s738_s1, 1024, %s29_s13, [#allocation6], %s633_s24, %s633_s24, %s634_s25  }
  0x14   :  { %s559_s30 = scalar_lea.hbm %s737_s0, 1024 }
  0x15   :  { %p560_p8 = scmp.ne.s32.totalorder %s737_s0, %s559_s30  ;;  %p563_p9 = scmp.lt.u32.totalorder %s559_s30, %s737_s0 }
  0x17   :  { %p565_p10 = pnand %p563_p9, %p560_p8 }
  0x19   :  { %568 = shalt.err (!%p565_p10)
}
  0x1a   :  { %s569_s8 = scalar_lea.vmem %s657_s15, 1024  ;;  %p574_p12 = scmp.lt.s32.totalorder %s657_s15, %s657_s15 }
  0x1b   :  { %p570_p11 = scmp.ne.s32.totalorder %s657_s15, %s569_s8  ;;  %p575_p13 = scmp.lt.s32.totalorder %s569_s8, %s569_s8 }
  0x1d   :  { %p576_p0 = por %p575_p13, %p574_p12 }
  0x1f   :  { %p577_p1 = pnand %p576_p0, %p570_p11 }
  0x21   :  { %580 = shalt.err (!%p577_p1)
}
  0x22   :  { %22 = dma.hbm_to_vmem [thread:$0]  %s737_s0, 1024, %s657_s15, [#allocation3], %s633_s24, %s633_s24, %s634_s25  }
  0x23   :  { %s635_s10 = smov [#allocation7]   ;;  %s581_s14 = scalar_lea.hbm %s739_s2, 16 }
  0x24   :  { %s41_s11 = sshll.u32 %s635_s10, 4  ;;  %p582_p2 = scmp.ne.s32.totalorder %s739_s2, %s581_s14  ;;  %s42_s11 = int_to_ptr.vmem [resolvable:$true] %s41_s11 }
  0x25   :  { %p585_p3 = scmp.lt.u32.totalorder %s581_s14, %s739_s2 }
  0x27   :  { %p587_p4 = pnand %p585_p3, %p582_p2 }
  0x29   :  { %590 = shalt.err (!%p587_p4)
}
  0x2a   :  { %s591_s20 = scalar_lea.vmem %s42_s11, 16  ;;  %s595_s0 = scalar_lea.vmem %s42_s11, 32 }
  0x2b   :  { %p592_p5 = scmp.ne.s32.totalorder %s42_s11, %s591_s20  ;;  %p596_p6 = scmp.lt.s32.totalorder %s42_s11, %s42_s11 }
  0x2c   :  { %p597_p7 = scmp.lt.s32.totalorder %s595_s0, %s591_s20 }
  0x2e   :  { %p598_p8 = por %p597_p7, %p596_p6 }
  0x30   :  { %p599_p9 = pnand %p598_p8, %p592_p5 }
  0x32   :  { %602 = shalt.err (!%p599_p9)
}
  0x33   :  { %44 = dma.hbm_to_vmem [thread:$0]  %s739_s2, 16, %s42_s11, [#allocation6]  }
  0x34   :  { %625 = dma.done.wait [#allocation3], 1024  }
  0x35   :  { %626 = vsyncadd [#allocation3], 4294966272 }
  0x36   :  { %627 = dma.done.wait [#allocation6], 1040  }
  0x37   :  { %628 = vsyncadd [#allocation6], 4294966256  ;;  %v521_v0 = vld [vmem:[#allocation5] sm:$0xff]   ;;  %v522_v1 = vld [vmem:[#allocation5 + $0x8] sm:$0xff]   ;;  %vm367_vm0 = vcmask 125952   ;;  %s636_s2 = smov [#allocation8]  }
  0x38   :  { %467 = vmatprep.subr.bf16.mxu0 %v521_v0  ;;  %499 = vmatprep.subr.bf16.mxu1 %v521_v0  ;;  %v523_v2 = vld [vmem:[#allocation5 + $0x10] sm:$0xff]   ;;  %v524_v3 = vld [vmem:[#allocation5 + $0x18] sm:$0xff]   ;;  %v529_v4 = vld [vmem:[#allocation2] sm:$0xff]   ;;  %s389_s22 = sshll.u32 %s636_s2, 4  ;;  %s390_s22 = int_to_ptr.vmem [resolvable:$true] %s389_s22 }
  0x39   :  { %468 = vmatpush3.bf16.msra.mxu0 %v521_v0  ;;  %507 = vmatpush3.bf16.msra.mxu1 %v521_v0  ;;  %v530_v5 = vld [vmem:[#allocation2 + $0x20] sm:$0xff]   ;;  %v526_v7 = vld [vmem:[#allocation5 + $0x28] sm:$0xff]   ;;  %v527_v8 = vld [vmem:[#allocation5 + $0x30] sm:$0xff]   ;;  %s603_s23 = scalar_lea.vmem %s390_s22, 1024  ;;  %p608_p11 = scmp.lt.s32.totalorder %s390_s22, %s390_s22 }
  0x3a   :  { %469 = vmatprep.subr.bf16.mxu0 %v522_v1  ;;  %500 = vmatprep.subr.bf16.mxu1 %v522_v1  ;;  %v525_v6 = vld [vmem:[#allocation5 + $0x20] sm:$0xff]   ;;  %v528_v9 = vld [vmem:[#allocation5 + $0x38] sm:$0xff]   ;;  %v531_v10 = vld [vmem:[#allocation2 + $0x8] sm:$0xff]   ;;  %p604_p10 = scmp.ne.s32.totalorder %s390_s22, %s603_s23  ;;  %p609_p12 = scmp.lt.s32.totalorder %s603_s23, %s603_s23 }
  0x3b   :  { %483 = vmatprep.mubr.bf16.mxu0 %v529_v4  ;;  %491 = vmatprep.mubr.bf16.mxu1 %v530_v5  ;;  %v532_v11 = vld [vmem:[#allocation2 + $0x28] sm:$0xff]   ;;  %v533_v12 = vld [vmem:[#allocation2 + $0x10] sm:$0xff]   ;;  %v535_v14 = vld [vmem:[#allocation2 + $0x18] sm:$0xff]  }
  0x3c   :  { %v534_v13 = vld [vmem:[#allocation2 + $0x30] sm:$0xff]   ;;  %v536_v15 = vld [vmem:[#allocation2 + $0x38] sm:$0xff]   ;;  %v402_v16 = vld [vmem:[#allocation7] ss:$0 sm:$0xff]  ;;  %p610_p13 = por %p609_p12, %p608_p11 }
  0x3d   :  { %470 = vmatpush3.bf16.msra.mxu0 %v522_v1  ;;  %508 = vmatpush3.bf16.msra.mxu1 %v522_v1 }
  0x3e   :  { %471 = vmatprep.subr.bf16.mxu0 %v523_v2  ;;  %501 = vmatprep.subr.bf16.mxu1 %v523_v2  ;;  %p611_p0 = pnand %p610_p13, %p604_p10 }
  0x41   :  { %472 = vmatpush3.bf16.msra.mxu0 %v523_v2  ;;  %509 = vmatpush3.bf16.msra.mxu1 %v523_v2 }
  0x42   :  { %473 = vmatprep.subr.bf16.mxu0 %v524_v3  ;;  %502 = vmatprep.subr.bf16.mxu1 %v524_v3 }
  0x45   :  { %474 = vmatpush3.bf16.msra.mxu0 %v524_v3  ;;  %510 = vmatpush3.bf16.msra.mxu1 %v524_v3 }
  0x46   :  { %475 = vmatprep.subr.bf16.mxu0 %v525_v6  ;;  %503 = vmatprep.subr.bf16.mxu1 %v525_v6 }
  0x49   :  { %476 = vmatpush3.bf16.msra.mxu0 %v525_v6  ;;  %511 = vmatpush3.bf16.msra.mxu1 %v525_v6 }
  0x4a   :  { %477 = vmatprep.subr.bf16.mxu0 %v526_v7  ;;  %504 = vmatprep.subr.bf16.mxu1 %v526_v7 }
  0x4d   :  { %478 = vmatpush3.bf16.msra.mxu0 %v526_v7  ;;  %512 = vmatpush3.bf16.msra.mxu1 %v526_v7 }
  0x4e   :  { %479 = vmatprep.subr.bf16.mxu0 %v527_v8  ;;  %505 = vmatprep.subr.bf16.mxu1 %v527_v8 }
  0x51   :  { %480 = vmatpush3.bf16.msra.mxu0 %v527_v8  ;;  %513 = vmatpush3.bf16.msra.mxu1 %v527_v8 }
  0x52   :  { %481 = vmatprep.subr.bf16.mxu0 %v528_v9  ;;  %506 = vmatprep.subr.bf16.mxu1 %v528_v9 }
  0x55   :  { %482 = vmatpush3.bf16.msra.mxu0 %v528_v9  ;;  %514 = vmatpush3.bf16.msra.mxu1 %v528_v9 }
  0x58   :  { %484 = vmatmul.mubr.bf16.vlgmr.msra.gmra.mrb[0].mxu0 %v531_v10  ;;  %492 = vmatmul.mubr.bf16.vlgmr.msra.gmra.mrb[0].mxu1 %v532_v11 }
  0x59   :  { %487 = vmatprep.mubr.bf16.mxu0 %v533_v12  ;;  %495 = vmatprep.mubr.bf16.mxu1 %v534_v13 }
  0x60   :  { %488 = vmatmul.mubr.bf16.gmra.mrb[4].mxu0 %v535_v14  ;;  %496 = vmatmul.mubr.bf16.gmra.mrb[4].mxu1 %v536_v15 }
 0x12b   :  { %v485_v17 = vpop.f32.mrb[0].mxu0  ;;  %v493_v18 = vpop.f32.mrb[0].mxu1 }
 0x12c   :  { %v233_v19 = vadd.f32 %v485_v17, %v402_v16  ;;  %v265_v20 = vadd.f32 %v493_v18, %v402_v16  ;;  %v224_v21 = vpop.f32.mrb[1].mxu0  ;;  %v256_v22 = vpop.f32.mrb[1].mxu1 }
 0x12d   :  { %v225_v23 = vadd.f32 %v402_v16, %v224_v21  ;;  %v257_v24 = vadd.f32 %v402_v16, %v256_v22  ;;  %v486_v25 = vpop.f32.mrb[2].mxu0  ;;  %v494_v26 = vpop.f32.mrb[2].mxu1 }
 0x12e   :  { %v289_v27 = vmax.f32 %v233_v19, 0.0  ;;  %v297_v28 = vmax.f32 %v265_v20, 0.0  ;;  %v236_v29 = vadd.f32 %v486_v25, %v402_v16  ;;  %v268_v30 = vadd.f32 %v494_v26, %v402_v16  ;;  %v227_v31 = vpop.f32.mrb[3].mxu0  ;;  %v259_v32 = vpop.f32.mrb[3].mxu1 }
 0x12f   :  { %v287_v33 = vmax.f32 %v225_v23, 0.0  ;;  %v295_v34 = vmax.f32 %v257_v24, 0.0  ;;  %v228_v35 = vadd.f32 %v402_v16, %v227_v31  ;;  %v260_v36 = vadd.f32 %v402_v16, %v259_v32 }
 0x130   :  { %v437_v37 = vpack.c.bf16 %v289_v27, %v289_v27  ;;  %v445_v38 = vpack.c.bf16 %v297_v28, %v297_v28  ;;  %v290_v39 = vmax.f32 %v236_v29, 0.0  ;;  %v298_v40 = vmax.f32 %v268_v30, 0.0 }
 0x131   :  { %v435_v41 = vpack.c.bf16 %v287_v33, %v287_v33  ;;  %v443_v42 = vpack.c.bf16 %v295_v34, %v295_v34  ;;  %v288_v43 = vmax.f32 %v228_v35, 0.0  ;;  %v296_v44 = vmax.f32 %v260_v36, 0.0 }
 0x132   :  { %370 = vst.msk [vmem:[#allocation8 + $0x8] sm:$0xf] %vm367_vm0, %v437_v37  ;;  %378 = vst.msk [vmem:[#allocation8 + $0x28] sm:$0xf] %vm367_vm0, %v445_v38  ;;  %v438_v45 = vpack.c.bf16 %v290_v39, %v290_v39  ;;  %v446_v46 = vpack.c.bf16 %v298_v40, %v298_v40 }
 0x133   :  { %368 = vst.msk [vmem:[#allocation8] sm:$0xf] %vm367_vm0, %v435_v41  ;;  %376 = vst.msk [vmem:[#allocation8 + $0x20] sm:$0xf] %vm367_vm0, %v443_v42  ;;  %v436_v47 = vpack.c.bf16 %v288_v43, %v288_v43  ;;  %v444_v48 = vpack.c.bf16 %v296_v44, %v296_v44  ;;  %v489_v49 = vpop.f32.mrb[4].mxu0  ;;  %v497_v50 = vpop.f32.mrb[4].mxu1 }
 0x134   :  { %371 = vst.msk [vmem:[#allocation8 + $0xc] sm:$0xf] %vm367_vm0, %v438_v45  ;;  %379 = vst.msk [vmem:[#allocation8 + $0x2c] sm:$0xf] %vm367_vm0, %v446_v46  ;;  %v249_v51 = vadd.f32 %v489_v49, %v402_v16  ;;  %v281_v52 = vadd.f32 %v497_v50, %v402_v16  ;;  %v240_v53 = vpop.f32.mrb[5].mxu0  ;;  %v272_v54 = vpop.f32.mrb[5].mxu1 }
 0x135   :  { %369 = vst.msk [vmem:[#allocation8 + $0x4] sm:$0xf] %vm367_vm0, %v436_v47  ;;  %377 = vst.msk [vmem:[#allocation8 + $0x24] sm:$0xf] %vm367_vm0, %v444_v48  ;;  %v241_v55 = vadd.f32 %v402_v16, %v240_v53  ;;  %v273_v56 = vadd.f32 %v402_v16, %v272_v54  ;;  %v490_v57 = vpop.f32.mrb[6].mxu0  ;;  %v498_v58 = vpop.f32.mrb[6].mxu1 }
 0x136   :  { %v293_v59 = vmax.f32 %v249_v51, 0.0  ;;  %v301_v60 = vmax.f32 %v281_v52, 0.0  ;;  %v252_v61 = vadd.f32 %v490_v57, %v402_v16  ;;  %v284_v62 = vadd.f32 %v498_v58, %v402_v16  ;;  %v243_v63 = vpop.f32.mrb[7].mxu0  ;;  %v275_v0 = vpop.f32.mrb[7].mxu1 }
 0x137   :  { %v291_v1 = vmax.f32 %v241_v55, 0.0  ;;  %v299_v2 = vmax.f32 %v273_v56, 0.0  ;;  %v244_v3 = vadd.f32 %v402_v16, %v243_v63  ;;  %v276_v4 = vadd.f32 %v402_v16, %v275_v0 }
 0x138   :  { %v441_v5 = vpack.c.bf16 %v293_v59, %v293_v59  ;;  %v449_v6 = vpack.c.bf16 %v301_v60, %v301_v60  ;;  %v294_v7 = vmax.f32 %v252_v61, 0.0  ;;  %v302_v8 = vmax.f32 %v284_v62, 0.0 }
 0x139   :  { %v439_v9 = vpack.c.bf16 %v291_v1, %v291_v1  ;;  %v447_v10 = vpack.c.bf16 %v299_v2, %v299_v2  ;;  %v292_v11 = vmax.f32 %v244_v3, 0.0  ;;  %v300_v12 = vmax.f32 %v276_v4, 0.0 }
 0x13a   :  { %374 = vst.msk [vmem:[#allocation8 + $0x18] sm:$0xf] %vm367_vm0, %v441_v5  ;;  %382 = vst.msk [vmem:[#allocation8 + $0x38] sm:$0xf] %vm367_vm0, %v449_v6  ;;  %v442_v13 = vpack.c.bf16 %v294_v7, %v294_v7  ;;  %v450_v14 = vpack.c.bf16 %v302_v8, %v302_v8 }
 0x13b   :  { %372 = vst.msk [vmem:[#allocation8 + $0x10] sm:$0xf] %vm367_vm0, %v439_v9  ;;  %380 = vst.msk [vmem:[#allocation8 + $0x30] sm:$0xf] %vm367_vm0, %v447_v10  ;;  %v440_v15 = vpack.c.bf16 %v292_v11, %v292_v11  ;;  %v448_v16 = vpack.c.bf16 %v300_v12, %v300_v12 }
 0x13c   :  { %375 = vst.msk [vmem:[#allocation8 + $0x1c] sm:$0xf] %vm367_vm0, %v442_v13  ;;  %383 = vst.msk [vmem:[#allocation8 + $0x3c] sm:$0xf] %vm367_vm0, %v450_v14 }
 0x13d   :  { %373 = vst.msk [vmem:[#allocation8 + $0x14] sm:$0xf] %vm367_vm0, %v440_v15  ;;  %381 = vst.msk [vmem:[#allocation8 + $0x34] sm:$0xf] %vm367_vm0, %v448_v16 }
 0x13e   :  { %614 = shalt.err (!%p611_p0)
}
 0x13f   :  { %s615_s28 = scalar_lea.hbm %s740_s3, 1024 }
 0x140   :  { %p616_p1 = scmp.ne.s32.totalorder %s740_s3, %s615_s28  ;;  %p619_p2 = scmp.lt.u32.totalorder %s615_s28, %s740_s3 }
 0x142   :  { %p621_p3 = pnand %p619_p2, %p616_p1 }
 0x144   :  { %624 = shalt.err (!%p621_p3)
}
 0x145   :  { %395 = dma.vmem_to_hbm [thread:$0]  %s390_s22, 1024, %s740_s3, [#allocation4], %s633_s24, %s633_s24, %s634_s25  }
 0x146   :  { %629 = dma.done.wait [#allocation4], 1024  }
 0x147   :  { %630 = vsyncadd [#allocation4], 4294966272 }
 0x148   :  { %399 = vsyncpa [#allocation3], 1 }
 0x149   :  { %400 = vsyncpa [#allocation6], 1 }
 0x14a   :  { %401 = vsyncpa [#allocation4], 1 }

// kernel: deeplab_forward.12
= control target key start
LH: loop header
LB: loop body
LE: loop exit
PB: predicated region body
PF: predicated region fallthrough
CT: control target
= control target key end

     0   :  { %s4072_s0 = inlined_call_operand.hbm [shape: bf16[2,8,128], index: 0, kind: input, shape index: {}]   ;;  %s4073_s1 = inlined_call_operand.hbm [shape: bf16[3,2,8,512], index: 1, kind: input, shape index: {}]   ;;  %s4074_s2 = inlined_call_operand.hbm [shape: bf16[2,1,128], index: 2, kind: input, shape index: {}]   ;;  %s4075_s3 = inlined_call_operand.hbm [shape: bf16[128,128], index: 3, kind: input, shape index: {}]   ;;  %s4076_s4 = inlined_call_operand.hbm [shape: bf16[3,512,128], index: 4, kind: input, shape index: {}]   ;;  %s4077_s5 = inlined_call_operand.hbm [shape: bf16[128,128], index: 5, kind: input, shape index: {}]   ;;  %s4078_s6 = inlined_call_operand.hbm [shape: f32[1,128], index: 6, kind: input, shape index: {}]   ;;  %s4079_s7 = inlined_call_operand.hbm [shape: f32[1,128], index: 7, kind: input, shape index: {}]   ;;  %s4080_s8 = inlined_call_operand.hbm [shape: bf16[128,32], index: 8, kind: input, shape index: {}]   ;;  %s4081_s9 = inlined_call_operand.hbm [shape: bf16[128,32], index: 9, kind: input, shape index: {}]   ;;  %s4082_s10 = inlined_call_operand.hbm [shape: f32[1,32], index: 10, kind: input, shape index: {}]   ;;  %s4083_s11 = inlined_call_operand.hbm [shape: bf16[2,8,32], index: 11, kind: output, shape index: {}]  }
   0x1   :  { %4109 = sst [smem:[#allocation35_spill]] %s4072_s0 }
   0x2   :  { %4110 = sst [smem:[#allocation36_spill]] %s4073_s1 }
   0x3   :  { %4111 = sst [smem:[#allocation37_spill]] %s4074_s2 }
   0x4   :  { %4112 = sst [smem:[#allocation38_spill]] %s4075_s3 }
   0x5   :  { %4113 = sst [smem:[#allocation39_spill]] %s4077_s5 }
   0x6   :  { %4114 = sst [smem:[#allocation40_spill]] %s4079_s7 }
   0x7   :  { %4115 = sst [smem:[#allocation41_spill]] %s4081_s9 }
   0x8   :  { %4116 = sst [smem:[#allocation42_spill]] %s4083_s11 }
   0x9   :  { %16 = vsyncpa [#allocation3], 0 }
   0xa   :  { %18 = vsyncpa [#allocation3 + $0x1], 0 }
   0xb   :  { %19 = vsyncpa [#allocation6], 0 }
   0xc   :  { %21 = vsyncpa [#allocation6 + $0x1], 0 }
   0xd   :  { %22 = vsyncpa [#allocation9], 0 }
   0xe   :  { %23 = vsyncpa [#allocation12], 0 }
   0xf   :  { %24 = vsyncpa [#allocation15], 0 }
  0x10   :  { %25 = vsyncpa [#allocation18], 0 }
  0x11   :  { %26 = vsyncpa [#allocation4], 0 }
  0x12   :  { %28 = vsyncpa [#allocation4 + $0x1], 0  ;;  %s3554_s17 = smov 0   ;;  %s3556_s18 = smov 0  }
  0x13   :  { %s3558_s19 = smov 0   ;;  %s3560_s20 = smov 0  }
  0x14   :  { %s3562_s21 = smov 0   ;;  %s3564_s22 = smov 0  }
  0x15 LB: > { %4117 = sst [smem:[#allocation28_spill]] %s3461_s19  ;;  %s3585_s23 = sadd.s32 4294967295, %s3473_s22   ;;  %s3473_s22 = sphi %s3564_s22, %s34_s22   ;;  %s3469_s21 = sphi %s3562_s21, %s4172_s21   ;;  %s3465_s20 = sphi %s3560_s20, %s4171_s20   ;;  %s3461_s19 = sphi %s3558_s19, %s4167_s19   ;;  %s3457_s18 = sphi %s3556_s18, %s4170_s18   ;;  %s3453_s17 = sphi %s3554_s17, %s4169_s17  }
  0x16   : > { %4118 = sst [smem:[#allocation29_spill]] %s3465_s20  ;;  %p2330_p0 = scmp.ge.s32.totalorder %s3473_s22, 1 }
  0x17   : > { %4119 = sst [smem:[#allocation30_spill]] %s3473_s22  ;;  %p4088_p1 = scmp.eq.s32.totalorder %s3585_s23, 0 }
  0x18   : > { %p329_p2 = scmp.lt.s32.totalorder %s3473_s22, 3  ;;  %s3475_s25 = smov [#allocation8]  }
  0x19   : > { %s341_s26 = sshll.u32 %s3475_s25, 4  ;;  %s3476_s28 = smov [#allocation11]   ;;  %s3594_s26 = int_to_ptr.vmem [resolvable:$true] %s341_s26 }
  0x1a   : > { %p3590_p3 = pnand %p2330_p0, %p329_p2  ;;  %s367_s29 = sshll.u32 %s3476_s28, 4  ;;  %s3605_s29 = int_to_ptr.vmem [resolvable:$true] %s367_s29 }
  0x1b   : > { %s3477_s30 = smov [#allocation14]   ;;  %s4123_s3 = sld [smem:[#allocation38_spill]] }
  0x1c   : > { %s4120_s24 = scalar_select %p3590_p3, 1, 0 }
  0x1d   : > { %p2797_p4 = pneg %p3590_p3  ;;  %s3607_s12 = sshll.u32 %s3477_s30, 4  ;;  %s393_s12 = int_to_ptr.vmem [resolvable:$true] %s3607_s12 }
  0x1e   : > { %4121 = sst [smem:[#allocation31_spill]] %s4120_s24 }
  0x1f   : > { %p3601_p6 = pnand %p2797_p4, %p4088_p1 }
  0x21   : > { %s4122_s27 = scalar_select %p3601_p6, 1, 0 }
  0x22   : > { %s3057_s15 = scalar_lea.hbm %s4123_s3, 1024  ;;  %p3617_p8 = pneg %p3601_p6 }
  0x23   : > { %p3058_p7 = scmp.ne.s32.totalorder %s4123_s3, %s3057_s15  ;;  %p3064_p11 = scmp.lt.u32.totalorder %s3057_s15, %s4123_s3 }
  0x24   : > { %s4124_s11 = scalar_select %p3617_p8, 1, 0 }
  0x25   : > { %p3060_p9 = pnand %p3617_p8, %p3058_p7 }
  0x27   : > { %p3061_p10 = pneg %p3060_p9 }
  0x29   : > { %p3066_p12 = pnand %p3064_p11, %p3061_p10 }
  0x2b   : > { %3069 = shalt.err (!%p3066_p12)
}
  0x2c   : > { %s3070_s13 = scalar_lea.vmem %s3594_s26, 1024  ;;  %p3078_p4 = scmp.lt.s32.totalorder %s3594_s26, %s3594_s26 }
  0x2d   : > { %p3071_p13 = scmp.ne.s32.totalorder %s3594_s26, %s3070_s13  ;;  %p3079_p5 = scmp.lt.s32.totalorder %s3070_s13, %s3070_s13 }
  0x2f   : > { %p3073_p0 = pnand %p3071_p13, %p3617_p8  ;;  %p3080_p7 = por %p3079_p5, %p3078_p4 }
  0x31   : > { %p3074_p2 = pneg %p3073_p0 }
  0x33   : > { %p3081_p9 = pnand %p3080_p7, %p3074_p2 }
  0x35   : > { %3084 = shalt.err (!%p3081_p9)
}
  0x36   : > { %s4090_s14 = smov 64   ;;  %s4092_s15 = smov 4  }
  0x37   : > { %2800 = dma.hbm_to_vmem [thread:$0]  (!%p3601_p6), %s4123_s3, 1024, %s3594_s26, [#allocation9], %s4090_s14, %s4090_s14, %s4092_s15  }
  0x38   : > { %s4125_s5 = sld [smem:[#allocation39_spill]] }
  0x3e   : > { %s3085_s13 = scalar_lea.hbm %s4125_s5, 1024 }
  0x3f   : > { %p3086_p5 = scmp.ne.s32.totalorder %s4125_s5, %s3085_s13  ;;  %p3092_p12 = scmp.lt.u32.totalorder %s3085_s13, %s4125_s5 }
  0x41   : > { %p3088_p10 = pnand %p3086_p5, %p3617_p8 }
  0x43   : > { %p3089_p11 = pneg %p3088_p10 }
  0x45   : > { %p3094_p13 = pnand %p3092_p12, %p3089_p11 }
  0x47   : > { %3097 = shalt.err (!%p3094_p13)
}
  0x48   : > { %s3098_s26 = scalar_lea.vmem %s3605_s29, 1024  ;;  %p3106_p7 = scmp.lt.s32.totalorder %s3605_s29, %s3605_s29 }
  0x49   : > { %p3099_p0 = scmp.ne.s32.totalorder %s3605_s29, %s3098_s26  ;;  %p3107_p9 = scmp.lt.s32.totalorder %s3098_s26, %s3098_s26 }
  0x4b   : > { %p3101_p2 = pnand %p3099_p0, %p3617_p8  ;;  %p3108_p5 = por %p3107_p9, %p3106_p7 }
  0x4d   : > { %p3102_p4 = pneg %p3101_p2 }
  0x4f   : > { %p3109_p10 = pnand %p3108_p5, %p3102_p4 }
  0x51   : > { %3112 = shalt.err (!%p3109_p10)
}
  0x52   : > { %2806 = dma.hbm_to_vmem [thread:$0]  (!%p3601_p6), %s4125_s5, 1024, %s3605_s29, [#allocation12], %s4090_s14, %s4090_s14, %s4092_s15  }
  0x53   : > { %s4126_s7 = sld [smem:[#allocation40_spill]] }
  0x59   : > { %s3113_s16 = scalar_lea.hbm %s4126_s7, 16 }
  0x5a   : > { %p3114_p11 = scmp.ne.s32.totalorder %s4126_s7, %s3113_s16  ;;  %p3120_p0 = scmp.lt.u32.totalorder %s3113_s16, %s4126_s7 }
  0x5c   : > { %p3116_p12 = pnand %p3114_p11, %p3617_p8 }
  0x5e   : > { %p3117_p13 = pneg %p3116_p12 }
  0x60   : > { %p3122_p2 = pnand %p3120_p0, %p3117_p13 }
  0x62   : > { %3125 = shalt.err (!%p3122_p2)
}
  0x63   : > { %s3126_s26 = scalar_lea.vmem %s393_s12, 16  ;;  %s3133_s29 = scalar_lea.vmem %s393_s12, 32 }
  0x64   : > { %p3127_p4 = scmp.ne.s32.totalorder %s393_s12, %s3126_s26  ;;  %p3134_p5 = scmp.lt.s32.totalorder %s393_s12, %s393_s12 }
  0x65   : > { %p3135_p10 = scmp.lt.s32.totalorder %s3133_s29, %s3126_s26 }
  0x66   : > { %p3129_p7 = pnand %p3127_p4, %p3617_p8 }
  0x67   : > { %p3136_p1 = por %p3135_p10, %p3134_p5 }
  0x68   : > { %p3130_p9 = pneg %p3129_p7 }
  0x6a   : > { %p3137_p3 = pnand %p3136_p1, %p3130_p9 }
  0x6c   : > { %3140 = shalt.err (!%p3137_p3)
}
  0x6d   : > { %2812 = dma.hbm_to_vmem [thread:$0]  (!%p3601_p6), %s4126_s7, 16, %s393_s12, [#allocation15]  }
  0x6e   : > { %s3480_s20 = smov [#allocation17]   ;;  %s4127_s9 = sld [smem:[#allocation41_spill]] }
  0x6f   : > { %s415_s24 = sshll.u32 %s3480_s20, 4  ;;  %s416_s24 = int_to_ptr.vmem [resolvable:$true] %s415_s24 }
  0x74   : > { %s3141_s28 = scalar_lea.hbm %s4127_s9, 1024 }
  0x75   : > { %p3142_p11 = scmp.ne.s32.totalorder %s4127_s9, %s3141_s28  ;;  %p3148_p12 = scmp.lt.u32.totalorder %s3141_s28, %s4127_s9 }
  0x77   : > { %p3144_p1 = pnand %p3142_p11, %p3617_p8 }
  0x79   : > { %p3145_p3 = pneg %p3144_p1 }
  0x7b   : > { %p3150_p13 = pnand %p3148_p12, %p3145_p3 }
  0x7d   : > { %3153 = shalt.err (!%p3150_p13)
}
  0x7e   : > { %s3154_s12 = scalar_lea.vmem %s416_s24, 1024  ;;  %p3162_p7 = scmp.lt.s32.totalorder %s416_s24, %s416_s24 }
  0x7f   : > { %p3155_p0 = scmp.ne.s32.totalorder %s416_s24, %s3154_s12  ;;  %p3163_p9 = scmp.lt.s32.totalorder %s3154_s12, %s3154_s12 }
  0x81   : > { %p3157_p2 = pnand %p3155_p0, %p3617_p8  ;;  %p3164_p5 = por %p3163_p9, %p3162_p7 }
  0x83   : > { %p3158_p4 = pneg %p3157_p2 }
  0x85   : > { %p3165_p10 = pnand %p3164_p5, %p3158_p4 }
  0x87   : > { %3168 = shalt.err (!%p3165_p10)
}
  0x88   : > { %2818 = dma.hbm_to_vmem [thread:$0]  (!%p3601_p6), %s4127_s9, 1024, %s416_s24, [#allocation18], %s4090_s14, %s4090_s14, %s4092_s15  }
  0x89   : > { %s2329_s20 = sadd.s32 4294967294, %s3473_s22   ;;  %s46_s16 = sadd.s32 1, %s3469_s21 }
  0x8a   : > { %p48_p11 = scmp.ge.s32.totalorder %s46_s16, 2  ;;  %s55_s25 = sadd.s32 1, %s3461_s19 }
  0x8b   : > { %p62_p1 = scmp.ne.s32.totalorder %s3461_s19, %s3457_s18  ;;  %p63_p3 = scmp.eq.s32.totalorder %s3473_s22, 0 }
  0x8c   : > { %s4174_s16 = smov (%p48_p11, %s46_s16), 0  ;;  %p68_p13 = scmp.ne.s32.totalorder %s3457_s18, %s3453_s17 }
  0x8d   : > { %4128 = sst [smem:[#allocation32_spill]] %s4174_s16  ;;  %p3715_p12 = por %p63_p3, %p62_p1 }
  0x8e   : > { %s50_s24 = ssub.s32 %s3469_s21, %s4174_s16  ;;  %p316_p0 = scmp.eq.s32.totalorder %s3585_s23, 1 }
  0x8f   : > { %p53_p2 = scmp.eq.s32.totalorder %s50_s24, 0  ;;  %p4130_p4 = scmp.eq.s32.totalorder %s3585_s23, 0 }
  0x90   : > { %p3730_p9 = por %p316_p0, %p62_p1  ;;  %p322_p5 = scmp.eq.s32.totalorder %s2329_s20, 1 }
  0x91   : > { %p3726_p7 = por %p4130_p4, %p68_p13  ;;  %p2844_p11 = scmp.lt.s32.totalorder %s3473_s22, 2 }
  0x92   : > { %s4132_s13 = scalar_select %p3730_p9, 1, 0 }
  0x93   : > { %s4131_s30 = scalar_select %p3726_p7, 1, 0 }
  0x94   : > { %s3735_s26 = scalar_select %p53_p2, %s3461_s19, %s55_s25  }
  0x95   : > { %p3737_p10 = por %p322_p5, %p68_p13  ;;  %s3743_s12 = sand.u32 1, %s3461_s19  }
  0x96   : > { %4133 = sst [smem:[#allocation33_spill]] %s3735_s26  ;;  %s459_s0 = sand.u32 1, %s3473_s22  }
  0x97   : > { %s4134_s29 = scalar_select %p3737_p10, 1, 0 }
  0x98   : > { %p3748_p3 = pnand %p2844_p11, %p3715_p12  ;;  %s2755_s24 = smul.u32 48, %s3743_s12 }
  0x99   : > { %4135 = sst [smem:[#allocation34_spill]] %s4134_s29  ;;  %s2506_s14 = sshll.u32 %s3469_s21, 8 }
  0x9a   : > { %s4136_s2 = scalar_select %p3748_p3, 1, 0 }
  0x9b   : > { %s4137_s1 = sld [smem:[#allocation36_spill]]  ;;  %s463_s3 = scalar_lea.vmem [#allocation5], %s2755_s24 }
  0x9c   : > { %s472_s5 = sshll.u32 %s463_s3, 4  ;;  %s3761_s28 = scalar_lea.sflag [#allocation6], %s459_s0  ;;  %s3759_s5 = int_to_ptr.vmem [resolvable:$true] %s472_s5 }
  0x9d   : > { %p3767_p12 = pneg %p3748_p3 }
  0x9f   : > { %s4138_s9 = scalar_select %p3767_p12, 1, 0 }
  0xa1   : > { %s3757_s15 = scalar_lea.hbm %s4137_s1, %s2506_s14  ;;  %s3174_s24 = scalar_lea.hbm %s4137_s1, 1536 }
  0xa2   : > { %s3169_s7 = scalar_lea.hbm %s3757_s15, 768  ;;  %p3175_p2 = scmp.lt.u32.totalorder %s3757_s15, %s4137_s1 }
  0xa3   : > { %p3170_p1 = scmp.ne.s32.totalorder %s3757_s15, %s3169_s7  ;;  %p3176_p4 = scmp.lt.u32.totalorder %s3174_s24, %s3169_s7 }
  0xa4   : > { %p3178_p11 = scmp.lt.u32.totalorder %s3169_s7, %s3757_s15 }
  0xa5   : > { %p3172_p13 = pnand %p3767_p12, %p3170_p1  ;;  %p3177_p5 = por %p3176_p4, %p3175_p2 }
  0xa7   : > { %p3173_p0 = pneg %p3172_p13  ;;  %p3179_p10 = por %p3178_p11, %p3177_p5 }
  0xa9   : > { %p3180_p9 = pnand %p3179_p10, %p3173_p0 }
  0xab   : > { %3183 = shalt.err (!%p3180_p9)
}
  0xac   : > { %s3184_s0 = scalar_lea.vmem %s3759_s5, 768  ;;  %s3481_s14 = smov [#allocation5]  }
  0xad   : > { %p3185_p1 = scmp.ne.s32.totalorder %s3759_s5, %s3184_s0  ;;  %s3189_s20 = sshll.u32 %s3481_s14, 4  ;;  %s3190_s20 = int_to_ptr.vmem [resolvable:$false] %s3189_s20 }
  0xae   : > { %s3191_s3 = scalar_lea.vmem %s3190_s20, 1536  ;;  %p3192_p6 = scmp.lt.s32.totalorder %s3759_s5, %s3190_s20 }
  0xaf   : > { %p3187_p13 = pnand %p3185_p1, %p3767_p12  ;;  %p3193_p8 = scmp.lt.s32.totalorder %s3191_s3, %s3184_s0 }
  0xb1   : > { %p3188_p7 = pneg %p3187_p13  ;;  %p3194_p2 = por %p3193_p8, %p3192_p6 }
  0xb3   : > { %p3195_p4 = pnand %p3194_p2, %p3188_p7 }
  0xb5   : > { %3198 = shalt.err (!%p3195_p4)
}
  0xb6   : > { %s3482_s7 = smov 512   ;;  %s3483_s24 = smov 256  }
  0xb7   : > { %s3484_s25 = smov 16   ;;  %s3485_s1 = smov [#allocation10]  }
  0xb8   : > { %2828 = dma.hbm_to_vmem [thread:$0]  (!%p3748_p3), %s3757_s15, 768, %s3759_s5, %s3761_s28, %s3482_s7, %s3483_s24, %s3484_s25  }
  0xb9   : > { %s354_s16 = sshll.u32 %s3485_s1, 4  ;;  %s3486_s14 = smov [#allocation13]   ;;  %s355_s16 = int_to_ptr.vmem [resolvable:$true] %s354_s16 }
  0xba   : > { %s381_s26 = sshll.u32 %s3486_s14, 4  ;;  %s3199_s3 = scalar_lea.hbm %s4076_s4, 12288  ;;  %s3791_s26 = int_to_ptr.vmem [resolvable:$true] %s381_s26 }
  0xbb   : > { %p3200_p6 = scmp.ne.s32.totalorder %s4076_s4, %s3199_s3  ;;  %p4139_p8 = scmp.ne.s32.totalorder %s4124_s11, 0 }
  0xbc   : > { %p3206_p10 = scmp.lt.u32.totalorder %s3199_s3, %s4076_s4 }
  0xbd   : > { %p3202_p7 = pnand %p3200_p6, %p4139_p8 }
  0xbf   : > { %p3203_p9 = pneg %p3202_p7 }
  0xc1   : > { %p3208_p0 = pnand %p3206_p10, %p3203_p9 }
  0xc3   : > { %3211 = shalt.err (!%p3208_p0)
}
  0xc4   : > { %s3212_s1 = scalar_lea.vmem %s355_s16, 12288  ;;  %p3220_p13 = scmp.lt.s32.totalorder %s355_s16, %s355_s16 }
  0xc5   : > { %p3213_p5 = scmp.ne.s32.totalorder %s355_s16, %s3212_s1  ;;  %p3221_p2 = scmp.lt.s32.totalorder %s3212_s1, %s3212_s1 }
  0xc7   : > { %p3215_p11 = pnand %p3213_p5, %p4139_p8  ;;  %p3222_p4 = por %p3221_p2, %p3220_p13 }
  0xc9   : > { %p3216_p1 = pneg %p3215_p11 }
  0xcb   : > { %p3223_p3 = pnand %p3222_p4, %p3216_p1 }
  0xcd   : > { %3226 = shalt.err (!%p3223_p3)
}
  0xce   : > { %p4140_p6 = scmp.ne.s32.totalorder %s4122_s27, 0  ;;  %s4141_s19 = smov 4  }
  0xcf   : > { %s4142_s22 = smov 64   ;;  %s3227_s25 = scalar_lea.hbm %s4078_s6, 16 }
  0xd0   : > { %2803 = dma.hbm_to_vmem [thread:$0]  (!%p4140_p6), %s4076_s4, 12288, %s355_s16, [#allocation9], %s4142_s22, %s4142_s22, %s4141_s19  }
  0xd1   : > { %p3228_p7 = scmp.ne.s32.totalorder %s4078_s6, %s3227_s25  ;;  %p3234_p10 = scmp.lt.u32.totalorder %s3227_s25, %s4078_s6 }
  0xd3   : > { %p3230_p3 = pnand %p3228_p7, %p4139_p8 }
  0xd5   : > { %p3231_p9 = pneg %p3230_p3 }
  0xd7   : > { %p3236_p0 = pnand %p3234_p10, %p3231_p9 }
  0xd9   : > { %3239 = shalt.err (!%p3236_p0)
}
  0xda   : > { %s3240_s16 = scalar_lea.vmem %s3791_s26, 16  ;;  %s3247_s5 = scalar_lea.vmem %s3791_s26, 32 }
  0xdb   : > { %p3241_p5 = scmp.ne.s32.totalorder %s3791_s26, %s3240_s16  ;;  %p3248_p13 = scmp.lt.s32.totalorder %s3791_s26, %s3791_s26 }
  0xdc   : > { %p3249_p2 = scmp.lt.s32.totalorder %s3247_s5, %s3240_s16 }
  0xdd   : > { %p3243_p11 = pnand %p3241_p5, %p4139_p8 }
  0xde   : > { %p3250_p4 = por %p3249_p2, %p3248_p13 }
  0xdf   : > { %p3244_p1 = pneg %p3243_p11 }
  0xe1   : > { %p3251_p7 = pnand %p3250_p4, %p3244_p1 }
  0xe3   : > { %3254 = shalt.err (!%p3251_p7)
}
  0xe4   : > { %2809 = dma.hbm_to_vmem [thread:$0]  (!%p4140_p6), %s4078_s6, 16, %s3791_s26, [#allocation12]  }
  0xe5   : > { %s3487_s29 = smov [#allocation16]   ;;  %s3488_s24 = smov [#allocation19]  }
  0xe6   : > { %s402_s7 = sshll.u32 %s3487_s29, 4  ;;  %s429_s25 = sshll.u32 %s3488_s24, 4  ;;  %s403_s7 = int_to_ptr.vmem [resolvable:$true] %s402_s7  ;;  %s3838_s25 = int_to_ptr.vmem [resolvable:$true] %s429_s25 }
  0xe7   : > { %s3255_s20 = scalar_lea.hbm %s4080_s8, 1024 }
  0xe8   : > { %p3256_p3 = scmp.ne.s32.totalorder %s4080_s8, %s3255_s20  ;;  %p3262_p0 = scmp.lt.u32.totalorder %s3255_s20, %s4080_s8 }
  0xea   : > { %p3258_p9 = pnand %p3256_p3, %p4139_p8 }
  0xec   : > { %p3259_p10 = pneg %p3258_p9 }
  0xee   : > { %p3264_p5 = pnand %p3262_p0, %p3259_p10 }
  0xf0   : > { %3267 = shalt.err (!%p3264_p5)
}
  0xf1   : > { %s3268_s1 = scalar_lea.vmem %s403_s7, 1024  ;;  %p3276_p2 = scmp.lt.s32.totalorder %s403_s7, %s403_s7 }
  0xf2   : > { %p3269_p11 = scmp.ne.s32.totalorder %s403_s7, %s3268_s1  ;;  %p3277_p4 = scmp.lt.s32.totalorder %s3268_s1, %s3268_s1 }
  0xf4   : > { %p3271_p1 = pnand %p3269_p11, %p4139_p8  ;;  %p3278_p7 = por %p3277_p4, %p3276_p2 }
  0xf6   : > { %p3272_p13 = pneg %p3271_p1 }
  0xf8   : > { %p3279_p12 = pnand %p3278_p7, %p3272_p13 }
  0xfa   : > { %3282 = shalt.err (!%p3279_p12)
}
  0xfb   : > { %2815 = dma.hbm_to_vmem [thread:$0]  (!%p4140_p6), %s4080_s8, 1024, %s403_s7, [#allocation15], %s4142_s22, %s4142_s22, %s4141_s19  }
  0xfc   : > { %s3283_s0 = scalar_lea.hbm %s4082_s10, 16 }
  0xfd   : > { %p3284_p3 = scmp.ne.s32.totalorder %s4082_s10, %s3283_s0  ;;  %p3290_p10 = scmp.lt.u32.totalorder %s3283_s0, %s4082_s10 }
  0xff   : > { %p3286_p12 = pnand %p3284_p3, %p4139_p8 }
 0x101   : > { %p3287_p9 = pneg %p3286_p12 }
 0x103   : > { %p3292_p0 = pnand %p3290_p10, %p3287_p9 }
 0x105   : > { %3295 = shalt.err (!%p3292_p0)
}
 0x106   : > { %s3296_s19 = scalar_lea.vmem %s3838_s25, 16  ;;  %s3303_s22 = scalar_lea.vmem %s3838_s25, 32 }
 0x107   : > { %p3297_p5 = scmp.ne.s32.totalorder %s3838_s25, %s3296_s19  ;;  %p3304_p13 = scmp.lt.s32.totalorder %s3838_s25, %s3838_s25 }
 0x108   : > { %p3305_p2 = scmp.lt.s32.totalorder %s3303_s22, %s3296_s19 }
 0x109   : > { %p3299_p11 = pnand %p3297_p5, %p4139_p8 }
 0x10a   : > { %p3306_p4 = por %p3305_p2, %p3304_p13 }
 0x10b   : > { %p3300_p1 = pneg %p3299_p11 }
 0x10d   : > { %p3307_p7 = pnand %p3306_p4, %p3300_p1 }
 0x10f   : > { %3310 = shalt.err (!%p3307_p7)
}
 0x110   : > { %2821 = dma.hbm_to_vmem [thread:$0]  (!%p4140_p6), %s4082_s10, 16, %s3838_s25, [#allocation18]  }
 0x111   : > { %s2340_s11 = sshll.u32 %s3743_s12, 2  ;;  %s2341_s1 = sshll.u32 %s3469_s21, 6 }
 0x112   : > { %s4143_s24 = sld [smem:[#allocation35_spill]]  ;;  %s444_s27 = scalar_lea.vmem [#allocation2], %s2340_s11 }
 0x113   : > { %s452_s0 = sshll.u32 %s444_s27, 4  ;;  %s441_s20 = scalar_lea.sflag [#allocation3], %s3743_s12  ;;  %s453_s0 = int_to_ptr.vmem [resolvable:$true] %s452_s0 }
 0x114   : > { %p4144_p3 = scmp.ne.s32.totalorder %s4138_s9, 0 }
 0x118   : > { %s3890_s14 = scalar_lea.hbm %s4143_s24, %s2341_s1  ;;  %s3316_s5 = scalar_lea.hbm %s4143_s24, 128 }
 0x119   : > { %s3311_s3 = scalar_lea.hbm %s3890_s14, 64  ;;  %p3317_p9 = scmp.lt.u32.totalorder %s3890_s14, %s4143_s24 }
 0x11a   : > { %p3312_p8 = scmp.ne.s32.totalorder %s3890_s14, %s3311_s3  ;;  %p3318_p10 = scmp.lt.u32.totalorder %s3316_s5, %s3311_s3 }
 0x11b   : > { %p3320_p5 = scmp.lt.u32.totalorder %s3311_s3, %s3890_s14 }
 0x11c   : > { %p3314_p12 = pnand %p3312_p8, %p4144_p3  ;;  %p3319_p0 = por %p3318_p10, %p3317_p9 }
 0x11e   : > { %p3315_p6 = pneg %p3314_p12  ;;  %p3321_p11 = por %p3320_p5, %p3319_p0 }
 0x120   : > { %p3322_p1 = pnand %p3321_p11, %p3315_p6 }
 0x122   : > { %3325 = shalt.err (!%p3322_p1)
}
 0x123   : > { %s3326_s7 = scalar_lea.vmem %s453_s0, 64  ;;  %s3489_s26 = smov [#allocation2]  }
 0x124   : > { %p3327_p13 = scmp.ne.s32.totalorder %s453_s0, %s3326_s7  ;;  %s3331_s11 = sshll.u32 %s3489_s26, 4  ;;  %s3332_s11 = int_to_ptr.vmem [resolvable:$false] %s3331_s11 }
 0x125   : > { %s3333_s1 = scalar_lea.vmem %s3332_s11, 128  ;;  %p3334_p7 = scmp.lt.s32.totalorder %s453_s0, %s3332_s11 }
 0x126   : > { %p3329_p2 = pnand %p3327_p13, %p4144_p3  ;;  %p3335_p8 = scmp.lt.s32.totalorder %s3333_s1, %s3326_s7 }
 0x128   : > { %p3330_p4 = pneg %p3329_p2  ;;  %p3336_p12 = por %p3335_p8, %p3334_p7 }
 0x12a   : > { %p3337_p9 = pnand %p3336_p12, %p3330_p4 }
 0x12c   : > { %3340 = shalt.err (!%p3337_p9)
}
 0x12d   : > { %p4145_p10 = scmp.ne.s32.totalorder %s4136_s2, 0  ;;  %s2344_s15 = sshll.u32 %s3469_s21, 4 }
 0x12e   : > { %s485_s29 = scalar_lea.vmem [#allocation7], %s3743_s12  ;;  %s4146_s16 = sld [smem:[#allocation37_spill]] }
 0x12f   : > { %2825 = dma.hbm_to_vmem [thread:$0]  (!%p4145_p10), %s3890_s14, 64, %s453_s0, %s441_s20  }
 0x130   : > { %s492_s27 = sshll.u32 %s485_s29, 4  ;;  %s493_s27 = int_to_ptr.vmem [resolvable:$true] %s492_s27 }
 0x134   : > { %s490_s5 = scalar_lea.hbm %s4146_s16, %s2344_s15  ;;  %s3346_s26 = scalar_lea.hbm %s4146_s16, 32 }
 0x135   : > { %s3341_s19 = scalar_lea.hbm %s490_s5, 16  ;;  %p3347_p11 = scmp.lt.u32.totalorder %s490_s5, %s4146_s16 }
 0x136   : > { %p3342_p6 = scmp.ne.s32.totalorder %s490_s5, %s3341_s19  ;;  %p3348_p1 = scmp.lt.u32.totalorder %s3346_s26, %s3341_s19 }
 0x137   : > { %p3350_p2 = scmp.lt.u32.totalorder %s3341_s19, %s490_s5 }
 0x138   : > { %p3344_p0 = pnand %p3342_p6, %p4144_p3  ;;  %p3349_p13 = por %p3348_p1, %p3347_p11 }
 0x13a   : > { %p3345_p5 = pneg %p3344_p0  ;;  %p3351_p4 = por %p3350_p2, %p3349_p13 }
 0x13c   : > { %p3352_p7 = pnand %p3351_p4, %p3345_p5 }
 0x13e   : > { %3355 = shalt.err (!%p3352_p7)
}
 0x13f   : > { %s3356_s12 = scalar_lea.vmem %s493_s27, 16  ;;  %s3490_s14 = smov [#allocation7]  }
 0x140   : > { %p3357_p8 = scmp.ne.s32.totalorder %s493_s27, %s3356_s12  ;;  %s3361_s0 = sshll.u32 %s3490_s14, 4  ;;  %s3362_s0 = int_to_ptr.vmem [resolvable:$false] %s3361_s0 }
 0x141   : > { %s3363_s20 = scalar_lea.vmem %s3362_s0, 32  ;;  %p3364_p6 = scmp.lt.s32.totalorder %s493_s27, %s3362_s0 }
 0x142   : > { %p3359_p12 = pnand %p3357_p8, %p4144_p3  ;;  %p3365_p0 = scmp.lt.s32.totalorder %s3363_s20, %s3356_s12 }
 0x144   : > { %p3360_p9 = pneg %p3359_p12  ;;  %p3366_p10 = por %p3365_p0, %p3364_p6 }
 0x146   : > { %p3367_p1 = pnand %p3366_p10, %p3360_p9 }
 0x148   : > { %3370 = shalt.err (!%p3367_p1)
}
 0x149   : > { %p4147_p11 = scmp.ne.s32.totalorder %s4136_s2, 0  ;;  %s4148_s15 = sld [smem:[#allocation31_spill]] }
 0x14b   : > { %2831 = dma.hbm_to_vmem [thread:$0]  (!%p4147_p11), %s490_s5, 16, %s493_s27, %s3761_s28  }
 0x14f   : > { %p4149_p5 = scmp.ne.s32.totalorder %s4148_s15, 0 }
 0x150   : > { %s3931_s9 = sand.u32 (!%p4149_p5), 1, %s3457_s18   ;;  %p4150_p3 = scmp.ne.s32.totalorder (!%p4149_p5), %s4131_s30, 0 }
 0x151   : > { %501 = sbr.rel (%p4149_p5) target bundleno = 950 (0x3b6), region = 64  ;;  %s2346_s29 = sshll.u32 (!%p4149_p5), %s3931_s9, 2 }
 0x152   : > { %s504_s3 = scalar_lea.sflag (!%p4149_p5), [#allocation3], %s3931_s9  ;;  %s3937_s25 = scalar_lea.vmem (!%p4149_p5), [#allocation2], %s2346_s29 }
 0x158   : > { %3424 = dma.done.wait (%p4150_p3), %s504_s3, 64  }
 0x159   : > { %3426 = vsyncadd (%p4150_p3), %s504_s3, 4294967232  ;;  %s512_s2 = sand.u32 1, %s3585_s23   ;;  %s2756_s28 = smul.u32 48, %s3931_s9 }
 0x15a   : > { %s513_s27 = scalar_lea.sflag [#allocation6], %s512_s2 }
 0x15b   : > { %s3945_s5 = scalar_lea.vmem [#allocation5], %s2756_s28 }
 0x15c   : > { %3428 = dma.done.wait (%p4150_p3), %s513_s27, 784  }
 0x15d   : > { %3430 = vsyncadd (%p4150_p3), %s513_s27, 4294966512  ;;  %s524_s19 = scalar_lea.vmem [#allocation7], %s3931_s9  ;;  %p4151_p10 = scmp.eq.s32.totalorder %s3585_s23, 0 }
 0x15f   : > { %3432 = dma.done.wait (%p4151_p10), [#allocation9], 13312   ;;  %p4152_p13 = pmov %p4151_p10 }
 0x160   : > { %p4153_p2 = pmov %p4151_p10 }
 0x161   : > { %3434 = vsyncadd (%p4152_p13), [#allocation9], 4294953984 }
 0x162   : > { %3436 = dma.done.wait (%p4153_p2), [#allocation12], 1040   ;;  %p4154_p4 = pmov %p4153_p2 }
 0x163   : > { %p4155_p7 = pmov %p4153_p2 }
 0x164   : > { %3438 = vsyncadd (%p4154_p4), [#allocation12], 4294966256 }
 0x165   : > { %3440 = dma.done.wait (%p4155_p7), [#allocation15], 1040   ;;  %p4156_p8 = pmov %p4153_p2 }
 0x166   : > { %p4157_p12 = pmov %p4153_p2 }
 0x167   : > { %3442 = vsyncadd (%p4156_p8), [#allocation15], 4294966256 }
 0x168   : > { %3444 = dma.done.wait (%p4157_p12), [#allocation18], 1040   ;;  %p4158_p9 = pmov %p4153_p2 }
 0x169   : > { %v2917_v0 = vld [vmem:[#allocation10 + $0x40] sm:$0xff]   ;;  %v2921_v4 = vld [vmem:[#allocation10 + $0x48] sm:$0xff]   ;;  %v2925_v8 = vld [vmem:[#allocation10 + $0x50] sm:$0xff]   ;;  %v3491_v39 = vmov 0.0   ;;  %vm3492_vm0 = vmmov 0   ;;  %s4159_s23 = sld [smem:[#allocation29_spill]] }
 0x16a   : > { %3446 = vsyncadd (%p4158_p9), [#allocation18], 4294966256  ;;  %v2918_v1 = vld [vmem:[#allocation10 + $0xc0] sm:$0xff]   ;;  %2507 = vmatprep.subr.bf16.mxu0 %v2917_v0  ;;  %v2922_v5 = vld [vmem:[#allocation10 + $0xc8] sm:$0xff]   ;;  %s603_s22 = scalar_lea.vmem [#allocation20], %s2346_s29  ;;  %vm2112_vm1 = vcmask 257024  }
 0x16b   : > { %v2919_v2 = vld [vmem:[#allocation10] sm:$0xff]   ;;  %2529 = vmatprep.subr.bf16.mxu1 %v2918_v1  ;;  %v2923_v6 = vld [vmem:[#allocation10 + $0x8] sm:$0xff]   ;;  %v2926_v9 = vld [vmem:[#allocation10 + $0xd0] sm:$0xff]   ;;  %s2129_s7 = sshll.u32 %s603_s22, 4  ;;  %s4160_s1 = sld [smem:[#allocation42_spill]]  ;;  %s4025_s7 = int_to_ptr.vmem [resolvable:$true] %s2129_s7 }
 0x16c   : > { %v2920_v3 = vld [vmem:[#allocation10 + $0x80] sm:$0xff]   ;;  %2508 = vmatpush3.bf16.msra.mxu0 %v2919_v2  ;;  %v2924_v7 = vld [vmem:[#allocation10 + $0x88] sm:$0xff]   ;;  %v2927_v10 = vld [vmem:[#allocation10 + $0x10] sm:$0xff]   ;;  %s2115_s14 = scalar_lea.sflag [#allocation4], %s3931_s9  ;;  %s3371_s0 = scalar_lea.vmem %s4025_s7, 64 }
 0x16d   : > { %2530 = vmatpush3.bf16.msra.mxu1 %v2920_v3  ;;  %2509 = vmatprep.subr.bf16.mxu0 %v2921_v4  ;;  %v2928_v11 = vld [vmem:[#allocation10 + $0x90] sm:$0xff]   ;;  %v2929_v12 = vld [vmem:[#allocation10 + $0x58] sm:$0xff]   ;;  %v2933_v16 = vld [vmem:[#allocation10 + $0x60] sm:$0xff]   ;;  %p3372_p6 = scmp.ne.s32.totalorder %s4025_s7, %s3371_s0  ;;  %p4161_p0 = scmp.ne.s32.totalorder %s4132_s13, 0 }
 0x16e   : > { %2531 = vmatprep.subr.bf16.mxu1 %v2922_v5  ;;  %v2930_v13 = vld [vmem:[#allocation10 + $0xd8] sm:$0xff]   ;;  %v2934_v17 = vld [vmem:[#allocation10 + $0xe0] sm:$0xff]   ;;  %v2937_v20 = vld [vmem:[#allocation10 + $0x68] sm:$0xff]   ;;  %s3493_s20 = smov [#allocation20]  }
 0x16f   : > { %v2931_v14 = vld [vmem:[#allocation10 + $0x18] sm:$0xff]   ;;  %v2935_v18 = vld [vmem:[#allocation10 + $0x20] sm:$0xff]   ;;  %v2938_v21 = vld [vmem:[#allocation10 + $0xe8] sm:$0xff]   ;;  %s2503_s30 = sshll.u32 %s4159_s23, 6  ;;  %p3373_p1 = pnand %p3372_p6, %p4161_p0 }
 0x170   : > { %2510 = vmatpush3.bf16.msra.mxu0 %v2923_v6  ;;  %v2932_v15 = vld [vmem:[#allocation10 + $0x98] sm:$0xff]   ;;  %v2936_v19 = vld [vmem:[#allocation10 + $0xa0] sm:$0xff]   ;;  %v2939_v22 = vld [vmem:[#allocation10 + $0x28] sm:$0xff]   ;;  %s3375_s15 = sshll.u32 %s3493_s20, 4  ;;  %s3376_s15 = int_to_ptr.vmem [resolvable:$false] %s3375_s15 }
 0x171   : > { %2532 = vmatpush3.bf16.msra.mxu1 %v2924_v7  ;;  %2511 = vmatprep.subr.bf16.mxu0 %v2925_v8  ;;  %v2940_v23 = vld [vmem:[#allocation10 + $0xa8] sm:$0xff]   ;;  %v2941_v24 = vld [vmem:[#allocation10 + $0x70] sm:$0xff]   ;;  %v2945_v28 = vld [vmem:[#allocation10 + $0x78] sm:$0xff]   ;;  %s4023_s12 = scalar_lea.hbm %s4160_s1, %s2503_s30  ;;  %p3374_p11 = pneg %p3373_p1 }
 0x172   : > { %2533 = vmatprep.subr.bf16.mxu1 %v2926_v9  ;;  %v2942_v25 = vld [vmem:[#allocation10 + $0xf0] sm:$0xff]   ;;  %v2946_v29 = vld [vmem:[#allocation10 + $0xf8] sm:$0xff]   ;;  %v2953_v38 = vld [vmem:[#allocation8] sm:$0xff]   ;;  %s3377_s29 = scalar_lea.vmem %s3376_s15, 128  ;;  %p3378_p5 = scmp.lt.s32.totalorder %s4025_s7, %s3376_s15 }
 0x173   : > { %v2943_v26 = vld [vmem:[#allocation10 + $0x30] sm:$0xff]   ;;  %v2947_v30 = vld [vmem:[#allocation10 + $0x38] sm:$0xff]   ;;  %v2954_v40 = vld [vmem:[#allocation10 + $0x140] sm:$0xff]   ;;  %p3379_p3 = scmp.lt.s32.totalorder %s3377_s29, %s3371_s0 }
 0x174   : > { %2512 = vmatpush3.bf16.msra.mxu0 %v2927_v10  ;;  %v2944_v27 = vld [vmem:[#allocation10 + $0xb0] sm:$0xff]   ;;  %v2948_v31 = vld [vmem:[#allocation10 + $0xb8] sm:$0xff]   ;;  %v2955_v41 = vld [vmem:[#allocation10 + $0x100] sm:$0xff]  }
 0x175   : > { %2534 = vmatpush3.bf16.msra.mxu1 %v2928_v11  ;;  %2513 = vmatprep.subr.bf16.mxu0 %v2929_v12  ;;  %v622_v32 = vld [vmem:[%s3945_s5] sm:$0xff]  ;;  %v623_v33 = vld [vmem:[%s3945_s5 + $0x8] sm:$0xff]  ;;  %v2400_v61 = vld [vmem:[%s3945_s5 + $0x10] sm:$0xff]  ;;  %p3380_p10 = por %p3379_p3, %p3378_p5 }
 0x176   : > { %2535 = vmatprep.subr.bf16.mxu1 %v2930_v13  ;;  %v2356_v34 = vcombine.low %v622_v32, %v622_v32  ;;  %v2357_v35 = vcombine.high %v622_v32, %v622_v32  ;;  %v2358_v36 = vcombine.low %v623_v33, %v623_v33  ;;  %v2359_v37 = vcombine.high %v623_v33, %v623_v33  ;;  %v2956_v42 = vld [vmem:[#allocation8 + $0x8] sm:$0xff]   ;;  %v2960_v45 = vld [vmem:[#allocation10 + $0x150] sm:$0xff]   ;;  %v2963_v48 = vld [vmem:[#allocation10 + $0x158] sm:$0xff]  }
 0x177   : > { %v2957_v43 = vld [vmem:[#allocation10 + $0x148] sm:$0xff]   ;;  %v2959_v46 = vld [vmem:[#allocation8 + $0x10] sm:$0xff]   ;;  %v2962_v49 = vld [vmem:[#allocation8 + $0x18] sm:$0xff]   ;;  %v2403_v63 = vcombine.high %v2400_v61, %v2400_v61  ;;  %v2402_v5 = vcombine.low %v2400_v61, %v2400_v61  ;;  %p3381_p13 = pnand %p3380_p10, %p3374_p11 }
 0x178   : > { %2514 = vmatpush3.bf16.msra.mxu0 %v2931_v14  ;;  %926 = vmatprep.mubr.bf16.mxu0 %v2357_v35  ;;  %v2958_v44 = vld [vmem:[#allocation10 + $0x108] sm:$0xff]   ;;  %v2961_v47 = vld [vmem:[#allocation10 + $0x110] sm:$0xff]   ;;  %v2964_v50 = vld [vmem:[#allocation10 + $0x118] sm:$0xff]  }
 0x179   : > { %2536 = vmatpush3.bf16.msra.mxu1 %v2932_v15  ;;  %2515 = vmatprep.subr.bf16.mxu0 %v2933_v16  ;;  %v2966_v51 = vld [vmem:[#allocation10 + $0x160] sm:$0xff]   ;;  %v2969_v54 = vld [vmem:[#allocation10 + $0x168] sm:$0xff]   ;;  %v2972_v57 = vld [vmem:[#allocation10 + $0x170] sm:$0xff]  }
 0x17a   : > { %2537 = vmatprep.subr.bf16.mxu1 %v2934_v17  ;;  %966 = vmatprep.mubr.bf16.mxu1 %v2359_v37  ;;  %v2965_v52 = vld [vmem:[#allocation8 + $0x20] sm:$0xff]   ;;  %v2968_v55 = vld [vmem:[#allocation8 + $0x28] sm:$0xff]   ;;  %v2971_v58 = vld [vmem:[#allocation8 + $0x30] sm:$0xff]  }
 0x17b   : > { %v2967_v53 = vld [vmem:[#allocation10 + $0x120] sm:$0xff]   ;;  %v2970_v56 = vld [vmem:[#allocation10 + $0x128] sm:$0xff]   ;;  %v2973_v59 = vld [vmem:[#allocation10 + $0x130] sm:$0xff]  }
 0x17c   : > { %2516 = vmatpush3.bf16.msra.mxu0 %v2935_v18  ;;  %v2975_v60 = vld [vmem:[#allocation10 + $0x178] sm:$0xff]   ;;  %v2977_v1 = vld [vmem:[#allocation10 + $0x1c0] sm:$0xff]   ;;  %v2983_v7 = vld [vmem:[#allocation10 + $0x1c8] sm:$0xff]  }
 0x17d   : > { %2538 = vmatpush3.bf16.msra.mxu1 %v2936_v19  ;;  %2517 = vmatprep.subr.bf16.mxu0 %v2937_v20  ;;  %v2974_v62 = vld [vmem:[#allocation8 + $0x38] sm:$0xff]   ;;  %v2981_v3 = vld [vmem:[#allocation10 + $0x240] sm:$0xff]   ;;  %v2985_v8 = vld [vmem:[#allocation10 + $0x248] sm:$0xff]  }
 0x17e   : > { %2539 = vmatprep.subr.bf16.mxu1 %v2938_v21  ;;  %v2976_v0 = vld [vmem:[#allocation10 + $0x138] sm:$0xff]   ;;  %v2978_v4 = vld [vmem:[#allocation10 + $0x180] sm:$0xff]   ;;  %v2984_v9 = vld [vmem:[#allocation10 + $0x188] sm:$0xff]  }
 0x17f   : > { %v605_v2 = vld [vmem:[%s3937_s25] sm:$0xf]  ;;  %v2982_v6 = vld [vmem:[#allocation10 + $0x200] sm:$0xff]   ;;  %v2986_v10 = vld [vmem:[#allocation10 + $0x208] sm:$0xff]  }
 0x180   : > { %2518 = vmatpush3.bf16.msra.mxu0 %v2939_v22  ;;  %v2987_v11 = vld [vmem:[#allocation10 + $0x1d0] sm:$0xff]   ;;  %v2991_v15 = vld [vmem:[#allocation10 + $0x1d8] sm:$0xff]   ;;  %v2995_v19 = vld [vmem:[#allocation10 + $0x1e0] sm:$0xff]  }
 0x181   : > { %2540 = vmatpush3.bf16.msra.mxu1 %v2940_v23  ;;  %2519 = vmatprep.subr.bf16.mxu0 %v2941_v24  ;;  %v2989_v12 = vld [vmem:[#allocation10 + $0x250] sm:$0xff]   ;;  %v2993_v16 = vld [vmem:[#allocation10 + $0x258] sm:$0xff]   ;;  %v2997_v20 = vld [vmem:[#allocation10 + $0x260] sm:$0xff]  }
 0x182   : > { %2541 = vmatprep.subr.bf16.mxu1 %v2942_v25  ;;  %v2988_v13 = vld [vmem:[#allocation10 + $0x190] sm:$0xff]   ;;  %v2992_v17 = vld [vmem:[#allocation10 + $0x198] sm:$0xff]   ;;  %v2996_v21 = vld [vmem:[#allocation10 + $0x1a0] sm:$0xff]  }
 0x183   : > { %v2990_v14 = vld [vmem:[#allocation10 + $0x210] sm:$0xff]   ;;  %v2994_v18 = vld [vmem:[#allocation10 + $0x218] sm:$0xff]   ;;  %v2998_v22 = vld [vmem:[#allocation10 + $0x220] sm:$0xff]  }
 0x184   : > { %2520 = vmatpush3.bf16.msra.mxu0 %v2943_v26  ;;  %v2999_v23 = vld [vmem:[#allocation10 + $0x1e8] sm:$0xff]   ;;  %v3007_v33 = vld [vmem:[#allocation10 + $0x1f8] sm:$0xff]  }
 0x185   : > { %2542 = vmatpush3.bf16.msra.mxu1 %v2944_v27  ;;  %2521 = vmatprep.subr.bf16.mxu0 %v2945_v28  ;;  %v3001_v24 = vld [vmem:[#allocation10 + $0x268] sm:$0xff]   ;;  %v3003_v27 = vld [vmem:[#allocation10 + $0x1f0] sm:$0xff]  }
 0x186   : > { %2543 = vmatprep.subr.bf16.mxu1 %v2946_v29  ;;  %v3000_v25 = vld [vmem:[#allocation10 + $0x1a8] sm:$0xff]   ;;  %v3005_v28 = vld [vmem:[#allocation10 + $0x270] sm:$0xff]  }
 0x187   : > { %v3002_v26 = vld [vmem:[#allocation10 + $0x228] sm:$0xff]   ;;  %v3004_v29 = vld [vmem:[#allocation10 + $0x1b0] sm:$0xff]  }
 0x188   : > { %2522 = vmatpush3.bf16.msra.mxu0 %v2947_v30  ;;  %v2401_v30 = vld [vmem:[%s3945_s5 + $0x18] sm:$0xff]  ;;  %v2438_v35 = vld [vmem:[%s3945_s5 + $0x20] sm:$0xff] }
 0x189   : > { %2544 = vmatpush3.bf16.msra.mxu1 %v2948_v31  ;;  %2675 = vmatprep.subr.bf16.mxu0 %v3491_v39  ;;  %v3006_v31 = vld [vmem:[#allocation10 + $0x230] sm:$0xff]   ;;  %v2405_v32 = vcombine.high %v2401_v30, %v2401_v30  ;;  %v2441_v37 = vcombine.high %v2438_v35, %v2438_v35  ;;  %v3032_v61 = vld [vmem:[#allocation11 + $0x28] sm:$0xff]  }
 0x18a   : > { %2560 = vmatprep.subr.bf16.mxu1 %v2954_v40  ;;  %v3013_v40 = vld [vmem:[#allocation10 + $0x2c0] sm:$0xff]  }
 0x18b   : > { %927 = vmatmul.mubr.bf16.vlgmr.msra.gmra.mrb[0].mxu0 %v2356_v34  ;;  %v3009_v34 = vld [vmem:[#allocation10 + $0x278] sm:$0xff]  }
 0x18c   : > { %967 = vmatmul.mubr.bf16.vlgmr.msra.gmra.mrb[0].mxu1 %v2358_v36  ;;  %2676 = vmatpush3.bf16.msra.mxu0 %v2953_v38  ;;  %v3008_v36 = vld [vmem:[#allocation10 + $0x1b8] sm:$0xff]  }
 0x18d   : > { %2561 = vmatpush3.bf16.msra.mxu1 %v2955_v41  ;;  %2677 = vmatprep.subr.bf16.mxu0 %v3491_v39  ;;  %v3012_v38 = vld [vmem:[#allocation10 + $0x238] sm:$0xff]   ;;  %v2404_v41 = vcombine.low %v2401_v30, %v2401_v30 }
 0x18e   : > { %2562 = vmatprep.subr.bf16.mxu1 %v2957_v43  ;;  %2691 = vmatprep.mubr.msk.bf16.mxu0 %vm3492_vm0, %v3491_v39  ;;  %v2440_v43 = vcombine.low %v2438_v35, %v2438_v35 }
 0x18f   : > { %1368 = vmatprep.mubr.bf16.mxu1 %v2403_v63  ;;  %v3034_v63 = vld [vmem:[#allocation10 + $0x2b0] sm:$0xff]  }
 0x190   : > { %2678 = vmatpush3.bf16.msra.mxu0 %v2956_v42  ;;  %v3014_v42 = vld [vmem:[#allocation10 + $0x280] sm:$0xff]  }
 0x191   : > { %2563 = vmatpush3.bf16.msra.mxu1 %v2958_v44  ;;  %2679 = vmatprep.subr.bf16.mxu0 %v3491_v39  ;;  %v3017_v44 = vld [vmem:[#allocation11] sm:$0xff]  }
 0x192   : > { %2564 = vmatprep.subr.bf16.mxu1 %v2960_v45  ;;  %v3018_v45 = vld [vmem:[#allocation10 + $0x2c8] sm:$0xff]  }
 0x194   : > { %2680 = vmatpush3.bf16.msra.mxu0 %v2959_v46  ;;  %v3019_v46 = vld [vmem:[#allocation10 + $0x288] sm:$0xff]  }
 0x195   : > { %2565 = vmatpush3.bf16.msra.mxu1 %v2961_v47  ;;  %2681 = vmatprep.subr.bf16.mxu0 %v3491_v39  ;;  %v3020_v47 = vld [vmem:[#allocation11 + $0x8] sm:$0xff]  }
 0x196   : > { %2566 = vmatprep.subr.bf16.mxu1 %v2963_v48  ;;  %v3021_v48 = vld [vmem:[#allocation10 + $0x2d0] sm:$0xff]  }
 0x198   : > { %2682 = vmatpush3.bf16.msra.mxu0 %v2962_v49  ;;  %v3022_v49 = vld [vmem:[#allocation10 + $0x290] sm:$0xff]  }
 0x199   : > { %2567 = vmatpush3.bf16.msra.mxu1 %v2964_v50  ;;  %2683 = vmatprep.subr.bf16.mxu0 %v3491_v39  ;;  %v3023_v50 = vld [vmem:[#allocation11 + $0x10] sm:$0xff]  }
 0x19a   : > { %2568 = vmatprep.subr.bf16.mxu1 %v2966_v51  ;;  %v3024_v51 = vld [vmem:[#allocation10 + $0x2d8] sm:$0xff]  }
 0x19c   : > { %2684 = vmatpush3.bf16.msra.mxu0 %v2965_v52  ;;  %v3025_v52 = vld [vmem:[#allocation10 + $0x298] sm:$0xff]  }
 0x19d   : > { %2569 = vmatpush3.bf16.msra.mxu1 %v2967_v53  ;;  %2685 = vmatprep.subr.bf16.mxu0 %v3491_v39  ;;  %v3026_v53 = vld [vmem:[#allocation11 + $0x18] sm:$0xff]  }
 0x19e   : > { %2570 = vmatprep.subr.bf16.mxu1 %v2969_v54  ;;  %v3027_v54 = vld [vmem:[#allocation10 + $0x2e0] sm:$0xff]  }
 0x1a0   : > { %2686 = vmatpush3.bf16.msra.mxu0 %v2968_v55  ;;  %v3028_v55 = vld [vmem:[#allocation10 + $0x2a0] sm:$0xff]  }
 0x1a1   : > { %2571 = vmatpush3.bf16.msra.mxu1 %v2970_v56  ;;  %2687 = vmatprep.subr.bf16.mxu0 %v3491_v39  ;;  %v2439_v56 = vld [vmem:[%s3945_s5 + $0x28] sm:$0xff] }
 0x1a2   : > { %2572 = vmatprep.subr.bf16.mxu1 %v2972_v57  ;;  %v3029_v57 = vld [vmem:[#allocation11 + $0x20] sm:$0xff]  }
 0x1a4   : > { %2688 = vmatpush3.bf16.msra.mxu0 %v2971_v58  ;;  %v3030_v58 = vld [vmem:[#allocation10 + $0x2e8] sm:$0xff]  }
 0x1a5   : > { %2573 = vmatpush3.bf16.msra.mxu1 %v2973_v59  ;;  %2689 = vmatprep.subr.bf16.mxu0 %v3491_v39  ;;  %v2443_v59 = vcombine.high %v2439_v56, %v2439_v56 }
 0x1a6   : > { %2574 = vmatprep.subr.bf16.mxu1 %v2975_v60  ;;  %v3031_v60 = vld [vmem:[#allocation10 + $0x2a8] sm:$0xff]  }
 0x1a8   : > { %2690 = vmatpush3.bf16.msra.mxu0 %v2974_v62  ;;  %v3033_v62 = vld [vmem:[#allocation10 + $0x2f0] sm:$0xff]  }
 0x1a9   : > { %2575 = vmatpush3.bf16.msra.mxu1 %v2976_v0  ;;  %2582 = vmatprep.subr.bf16.mxu0 %v2977_v1  ;;  %v3035_v0 = vld [vmem:[#allocation11 + $0x30] sm:$0xff]   ;;  %v3036_v1 = vld [vmem:[#allocation10 + $0x2f8] sm:$0xff]  }
 0x1aa   : > { %2604 = vmatprep.subr.bf16.mxu1 %v2981_v3  ;;  %v3040_v3 = vld [vmem:[#allocation11 + $0x38] sm:$0xff]  }
 0x1ab   : > { %2692 = vmatmul.mubr.bf16.vlgmr.msra.gmra.mrb[4].mxu0 %v605_v2  ;;  %v3037_v2 = vld [vmem:[#allocation10 + $0x2b8] sm:$0xff]  }
 0x1ac   : > { %2583 = vmatpush3.bf16.msra.mxu0 %v2978_v4  ;;  %1369 = vmatmul.mubr.bf16.vlgmr.msra.gmra.mrb[4].mxu1 %v2402_v5  ;;  %v2442_v4 = vcombine.low %v2439_v56, %v2439_v56  ;;  %v1798_v5 = vld [vmem:[%s524_s19] sm:$0x1] }
 0x1ad   : > { %2605 = vmatpush3.bf16.msra.mxu1 %v2982_v6  ;;  %2584 = vmatprep.subr.bf16.mxu0 %v2983_v7  ;;  %v3041_v6 = vld [vmem:[#allocation17] sm:$0xff]  }
 0x1ae   : > { %2606 = vmatprep.subr.bf16.mxu1 %v2985_v8  ;;  %1408 = vmatprep.mubr.bf16.mxu0 %v2405_v32  ;;  %v3043_v7 = vld [vmem:[#allocation16] sm:$0xff]   ;;  %v3042_v8 = vld [vmem:[#allocation17 + $0x8] sm:$0xff]  }
 0x1af   : > { %1723 = vmatprep.mubr.bf16.mxu1 %v2441_v37 }
 0x1b0   : > { %2585 = vmatpush3.bf16.msra.mxu0 %v2984_v9  ;;  %v3045_v9 = vld [vmem:[#allocation16 + $0x8] sm:$0xff]  }
 0x1b1   : > { %2607 = vmatpush3.bf16.msra.mxu1 %v2986_v10  ;;  %2586 = vmatprep.subr.bf16.mxu0 %v2987_v11  ;;  %v3044_v10 = vld [vmem:[#allocation17 + $0x10] sm:$0xff]  }
 0x1b2   : > { %2608 = vmatprep.subr.bf16.mxu1 %v2989_v12  ;;  %v3047_v11 = vld [vmem:[#allocation16 + $0x10] sm:$0xff]   ;;  %v3046_v12 = vld [vmem:[#allocation17 + $0x18] sm:$0xff]  }
 0x1b4   : > { %2587 = vmatpush3.bf16.msra.mxu0 %v2988_v13  ;;  %v3049_v13 = vld [vmem:[#allocation16 + $0x18] sm:$0xff]  }
 0x1b5   : > { %2609 = vmatpush3.bf16.msra.mxu1 %v2990_v14  ;;  %2588 = vmatprep.subr.bf16.mxu0 %v2991_v15  ;;  %v3048_v14 = vld [vmem:[#allocation17 + $0x20] sm:$0xff]  }
 0x1b6   : > { %2610 = vmatprep.subr.bf16.mxu1 %v2993_v16  ;;  %v3051_v15 = vld [vmem:[#allocation16 + $0x20] sm:$0xff]   ;;  %v3050_v16 = vld [vmem:[#allocation17 + $0x28] sm:$0xff]  }
 0x1b8   : > { %2589 = vmatpush3.bf16.msra.mxu0 %v2992_v17  ;;  %v3052_v17 = vld [vmem:[#allocation17 + $0x30] sm:$0xff]  }
 0x1b9   : > { %2611 = vmatpush3.bf16.msra.mxu1 %v2994_v18  ;;  %2590 = vmatprep.subr.bf16.mxu0 %v2995_v19  ;;  %v3053_v18 = vld [vmem:[#allocation16 + $0x28] sm:$0xff]   ;;  %v3054_v19 = vld [vmem:[#allocation17 + $0x38] sm:$0xff]  }
 0x1ba   : > { %2612 = vmatprep.subr.bf16.mxu1 %v2997_v20  ;;  %v3055_v20 = vld [vmem:[#allocation16 + $0x30] sm:$0xff]  }
 0x1bc   : > { %2591 = vmatpush3.bf16.msra.mxu0 %v2996_v21  ;;  %v3056_v21 = vld [vmem:[#allocation16 + $0x38] sm:$0xff]  }
 0x1bd   : > { %2613 = vmatpush3.bf16.msra.mxu1 %v2998_v22  ;;  %2592 = vmatprep.subr.bf16.mxu0 %v2999_v23 }
 0x1be   : > { %2614 = vmatprep.subr.bf16.mxu1 %v3001_v24 }
 0x1c0   : > { %2593 = vmatpush3.bf16.msra.mxu0 %v3000_v25 }
 0x1c1   : > { %2615 = vmatpush3.bf16.msra.mxu1 %v3002_v26  ;;  %2594 = vmatprep.subr.bf16.mxu0 %v3003_v27 }
 0x1c2   : > { %2616 = vmatprep.subr.bf16.mxu1 %v3005_v28 }
 0x1c4   : > { %2595 = vmatpush3.bf16.msra.mxu0 %v3004_v29 }
 0x1c5   : > { %2617 = vmatpush3.bf16.msra.mxu1 %v3006_v31  ;;  %2596 = vmatprep.subr.bf16.mxu0 %v3007_v33 }
 0x1c6   : > { %2618 = vmatprep.subr.bf16.mxu1 %v3009_v34 }
 0x1c8   : > { %2597 = vmatpush3.bf16.msra.mxu0 %v3008_v36 }
 0x1c9   : > { %2619 = vmatpush3.bf16.msra.mxu1 %v3012_v38  ;;  %2626 = vmatprep.subr.bf16.mxu0 %v3013_v40 }
 0x1ca   : > { %2695 = vmatprep.subr.bf16.mxu1 %v3491_v39 }
 0x1cb   : > { %1409 = vmatmul.mubr.bf16.vlgmr.msra.gmra.mrb[8].mxu0 %v2404_v41 }
 0x1cc   : > { %2627 = vmatpush3.bf16.msra.mxu0 %v3014_v42  ;;  %1724 = vmatmul.mubr.bf16.vlgmr.msra.gmra.mrb[8].mxu1 %v2440_v43 }
 0x1cd   : > { %2696 = vmatpush3.bf16.msra.mxu1 %v3017_v44  ;;  %2628 = vmatprep.subr.bf16.mxu0 %v3018_v45 }
 0x1ce   : > { %2697 = vmatprep.subr.bf16.mxu1 %v3491_v39  ;;  %2711 = vmatprep.mubr.msk.bf16.mxu1 %vm3492_vm0, %v3491_v39 }
 0x1cf   : > { %1763 = vmatprep.mubr.bf16.mxu0 %v2443_v59 }
 0x1d0   : > { %2629 = vmatpush3.bf16.msra.mxu0 %v3019_v46 }
 0x1d1   : > { %2698 = vmatpush3.bf16.msra.mxu1 %v3020_v47  ;;  %2630 = vmatprep.subr.bf16.mxu0 %v3021_v48 }
 0x1d2   : > { %2699 = vmatprep.subr.bf16.mxu1 %v3491_v39 }
 0x1d4   : > { %2631 = vmatpush3.bf16.msra.mxu0 %v3022_v49 }
 0x1d5   : > { %2700 = vmatpush3.bf16.msra.mxu1 %v3023_v50  ;;  %2632 = vmatprep.subr.bf16.mxu0 %v3024_v51 }
 0x1d6   : > { %2701 = vmatprep.subr.bf16.mxu1 %v3491_v39 }
 0x1d8   : > { %2633 = vmatpush3.bf16.msra.mxu0 %v3025_v52 }
 0x1d9   : > { %2702 = vmatpush3.bf16.msra.mxu1 %v3026_v53  ;;  %2634 = vmatprep.subr.bf16.mxu0 %v3027_v54 }
 0x1da   : > { %2703 = vmatprep.subr.bf16.mxu1 %v3491_v39 }
 0x1dc   : > { %2635 = vmatpush3.bf16.msra.mxu0 %v3028_v55  ;;  %v1815_v55 = vld [vmem:[#allocation14] sm:$0x1] }
 0x1dd   : > { %2704 = vmatpush3.bf16.msra.mxu1 %v3029_v57  ;;  %2636 = vmatprep.subr.bf16.mxu0 %v3030_v58 }
 0x1de   : > { %2705 = vmatprep.subr.bf16.mxu1 %v3491_v39 }
 0x1e0   : > { %2637 = vmatpush3.bf16.msra.mxu0 %v3031_v60 }
 0x1e1   : > { %2706 = vmatpush3.bf16.msra.mxu1 %v3032_v61  ;;  %2638 = vmatprep.subr.bf16.mxu0 %v3033_v62 }
 0x1e2   : > { %2707 = vmatprep.subr.bf16.mxu1 %v3491_v39 }
 0x1e4   : > { %2639 = vmatpush3.bf16.msra.mxu0 %v3034_v63 }
 0x1e5   : > { %2708 = vmatpush3.bf16.msra.mxu1 %v3035_v0  ;;  %2640 = vmatprep.subr.bf16.mxu0 %v3036_v1 }
 0x1e6   : > { %2709 = vmatprep.subr.bf16.mxu1 %v3491_v39 }
 0x1e8   : > { %2641 = vmatpush3.bf16.msra.mxu0 %v3037_v2 }
 0x1e9   : > { %2710 = vmatpush3.bf16.msra.mxu1 %v3040_v3  ;;  %2715 = vmatprep.subr.bf16.mxu0 %v3491_v39 }
 0x1ea   : > { %2735 = vmatprep.subr.bf16.mxu1 %v3491_v39 }
 0x1eb   : > { %1764 = vmatmul.mubr.bf16.vlgmr.msra.gmra.mrb[12].mxu0 %v2442_v4  ;;  %v2476_v4 = vld [vmem:[#allocation13] ss:$0 sm:$0xff] }
 0x1ec   : > { %2712 = vmatmul.mubr.bf16.vlgmr.msra.gmra.mrb[12].mxu1 %v1798_v5  ;;  %2731 = vmatprep.mubr.msk.bf16.mxu0 %vm3492_vm0, %v3491_v39 }
 0x1ed   : > { %2751 = vmatprep.mubr.msk.bf16.mxu1 %vm3492_vm0, %v3491_v39  ;;  %2716 = vmatpush3.bf16.msra.mxu0 %v3041_v6 }
 0x1ee   : > { %2736 = vmatpush3.bf16.msra.mxu1 %v3043_v7  ;;  %2717 = vmatprep.subr.bf16.mxu0 %v3491_v39 }
 0x1ef   : > { %2737 = vmatprep.subr.bf16.mxu1 %v3491_v39 }
 0x1f1   : > { %2718 = vmatpush3.bf16.msra.mxu0 %v3042_v8 }
 0x1f2   : > { %2738 = vmatpush3.bf16.msra.mxu1 %v3045_v9  ;;  %2719 = vmatprep.subr.bf16.mxu0 %v3491_v39 }
 0x1f3   : > { %2739 = vmatprep.subr.bf16.mxu1 %v3491_v39 }
 0x1f5   : > { %2720 = vmatpush3.bf16.msra.mxu0 %v3044_v10  ;;  %v2010_v10 = vlaneseq }
 0x1f6   : > { %2740 = vmatpush3.bf16.msra.mxu1 %v3047_v11  ;;  %2721 = vmatprep.subr.bf16.mxu0 %v3491_v39 }
 0x1f7   : > { %2741 = vmatprep.subr.bf16.mxu1 %v3491_v39  ;;  %v2011_v11 = vshrl.u32 %v2010_v10, 7 }
 0x1f9   : > { %2722 = vmatpush3.bf16.msra.mxu0 %v3046_v12  ;;  %v2012_v12 = vsub.s32 0, %v2011_v11 }
 0x1fa   : > { %2742 = vmatpush3.bf16.msra.mxu1 %v3049_v13  ;;  %2723 = vmatprep.subr.bf16.mxu0 %v3491_v39 }
 0x1fb   : > { %2743 = vmatprep.subr.bf16.mxu1 %v3491_v39 }
 0x1fd   : > { %2724 = vmatpush3.bf16.msra.mxu0 %v3048_v14 }
 0x1fe   : > { %2744 = vmatpush3.bf16.msra.mxu1 %v3051_v15  ;;  %2725 = vmatprep.subr.bf16.mxu0 %v3491_v39 }
 0x1ff   : > { %2745 = vmatprep.subr.bf16.mxu1 %v3491_v39 }
 0x201   : > { %2726 = vmatpush3.bf16.msra.mxu0 %v3050_v16 }
 0x202   : > { %2727 = vmatprep.subr.bf16.mxu0 %v3491_v39  ;;  %2746 = vmatpush3.bf16.msra.mxu1 %v3053_v18 }
 0x203   : > { %2747 = vmatprep.subr.bf16.mxu1 %v3491_v39 }
 0x205   : > { %2728 = vmatpush3.bf16.msra.mxu0 %v3052_v17 }
 0x206   : > { %2729 = vmatprep.subr.bf16.mxu0 %v3491_v39  ;;  %2748 = vmatpush3.bf16.msra.mxu1 %v3055_v20 }
 0x207   : > { %2749 = vmatprep.subr.bf16.mxu1 %v3491_v39 }
 0x209   : > { %2730 = vmatpush3.bf16.msra.mxu0 %v3054_v19  ;;  %v2501_v19 = vld [vmem:[#allocation19] ss:$0 sm:$0xff] }
 0x20a   : > { %2750 = vmatpush3.bf16.msra.mxu1 %v3056_v21 }
 0x25e   : > { %v2523_v22 = vpop.f32.mrb[0].mxu0 }
 0x25f   : > { %v2545_v23 = vpop.f32.mrb[0].mxu1  ;;  %v2524_v24 = vpop.f32.mrb[1].mxu0 }
 0x260   : > { %v2546_v25 = vpop.f32.mrb[1].mxu1  ;;  %v2525_v26 = vadd.f32 %v2524_v24, %v2523_v22  ;;  %v2526_v28 = vpop.f32.mrb[2].mxu0 }
 0x261   : > { %v2547_v27 = vadd.f32 %v2546_v25, %v2545_v23  ;;  %v2548_v29 = vpop.f32.mrb[2].mxu1  ;;  %v2527_v30 = vpop.f32.mrb[3].mxu0 }
 0x262   : > { %v2549_v31 = vpop.f32.mrb[3].mxu1 }
 0x263   : > { %v969_v32 = vadd.f32 %v2547_v27, %v2525_v26 }
 0x27e   : > { %v1056_v33 = vpop.f32.mrb[4].mxu0 }
 0x27f   : > { %v1057_v34 = vadd.f32 %v1056_v33, %v969_v32  ;;  %v2693_v35 = vpop.f32.mrb[5].mxu0  ;;  %v2576_v36 = vpop.f32.mrb[4].mxu1 }
 0x280   : > { %v1059_v37 = vpop.f32.mrb[6].mxu0  ;;  %v2577_v38 = vpop.f32.mrb[5].mxu1 }
 0x281   : > { %v2694_v39 = vpop.f32.mrb[7].mxu0  ;;  %v2578_v40 = vadd.f32 %v2577_v38, %v2576_v36  ;;  %v2579_v41 = vpop.f32.mrb[6].mxu1 }
 0x282   : > { %v2580_v42 = vpop.f32.mrb[7].mxu1 }
 0x29e   : > { %v2598_v43 = vpop.f32.mrb[8].mxu0 }
 0x29f   : > { %v2599_v44 = vpop.f32.mrb[9].mxu0  ;;  %v2620_v45 = vpop.f32.mrb[8].mxu1 }
 0x2a0   : > { %v2600_v46 = vadd.f32 %v2599_v44, %v2598_v43  ;;  %v2601_v47 = vpop.f32.mrb[10].mxu0  ;;  %v2621_v48 = vpop.f32.mrb[9].mxu1 }
 0x2a1   : > { %v2602_v49 = vpop.f32.mrb[11].mxu0  ;;  %v2622_v50 = vadd.f32 %v2621_v48, %v2620_v45  ;;  %v2623_v51 = vpop.f32.mrb[10].mxu1 }
 0x2a2   : > { %v1411_v52 = vadd.f32 %v2600_v46, %v2578_v40  ;;  %v2624_v53 = vpop.f32.mrb[11].mxu1 }
 0x2a4   : > { %v1416_v54 = vadd.f32 %v1411_v52, %v1057_v34 }
 0x2be   : > { %v2642_v56 = vpop.f32.mrb[12].mxu0 }
 0x2bf   : > { %v2643_v57 = vpop.f32.mrb[13].mxu0  ;;  %v1898_v58 = vpop.f32.mrb[12].mxu1 }
 0x2c0   : > { %v2644_v59 = vadd.f32 %v2643_v57, %v2642_v56  ;;  %v2645_v60 = vpop.f32.mrb[14].mxu0  ;;  %v1899_v61 = vadd.f32 %v1898_v58, %v1815_v55  ;;  %v2713_v62 = vpop.f32.mrb[13].mxu1 }
 0x2c1   : > { %v2646_v63 = vpop.f32.mrb[15].mxu0  ;;  %v1901_v0 = vpop.f32.mrb[14].mxu1 }
 0x2c2   : > { %v1766_v1 = vadd.f32 %v2644_v59, %v2622_v50  ;;  %v1904_v2 = vmax.f32 %v1899_v61, 0.0  ;;  %v2714_v3 = vpop.f32.mrb[15].mxu1 }
 0x2c4   : > { %v1771_v5 = vadd.f32 %v1766_v1, %v1416_v54  ;;  %v1905_v6 = vpack.c.bf16 %v1904_v2, %v1904_v2 }
 0x2c6   : > { %v1779_v7 = vadd.f32 %v2476_v4, %v1771_v5  ;;  %2732 = vmatmul.mubr.bf16.vlgmr.msra.gmra.mrb[16].mxu0 %v1905_v6 }
 0x2c8   : > { %v1780_v8 = vmax.f32 %v1779_v7, 0.0 }
 0x2ca   : > { %v1781_v9 = vpack.c.bf16 %v1780_v8, %v1780_v8 }
 0x2cc   : > { %2752 = vmatmul.mubr.bf16.vlgmr.msra.gmra.mrb[16].mxu1 %v1781_v9 }
 0x399   : > { %v2004_v13 = vpop.f32.mrb[16].mxu0 }
 0x39a   : > { %v2733_v14 = vpop.f32.mrb[17].mxu0  ;;  %v2013_v16 = vrot.slane %v2004_v13, %v2012_v12 }
 0x39b   : > { %v2007_v15 = vpop.f32.mrb[18].mxu0 }
 0x39c   : > { %v2734_v17 = vpop.f32.mrb[19].mxu0 }
 0x39f   : > { %v2096_v18 = vpop.f32.mrb[16].mxu1 }
 0x3a0   : > { %v2097_v20 = vadd.f32 %v2096_v18, %v2013_v16  ;;  %v2753_v21 = vpop.f32.mrb[17].mxu1 }
 0x3a1   : > { %v2099_v22 = vpop.f32.mrb[18].mxu1 }
 0x3a2   : > { %v2109_v23 = vadd.f32 %v2501_v19, %v2097_v20  ;;  %v2754_v24 = vpop.f32.mrb[19].mxu1 }
 0x3a4   : > { %v2110_v25 = vmax.f32 %v2109_v23, 0.0 }
 0x3a6   : > { %v2111_v26 = vpack.c.bf16 %v2110_v25, %v2110_v25 }
 0x3a8   : > { %2113 = vst.msk [vmem:[%s603_s22] sm:$0xf] %vm2112_vm1, %v2111_v26 }
 0x3a9   : > { %3384 = shalt.err (!%p3381_p13)
}
 0x3aa   : > { %s3385_s9 = scalar_lea.hbm %s4023_s12, 64  ;;  %s3389_s2 = scalar_lea.hbm %s4160_s1, 128 }
 0x3ab   : > { %p3386_p2 = scmp.ne.s32.totalorder %s4023_s12, %s3385_s9  ;;  %p3390_p8 = scmp.lt.u32.totalorder %s4023_s12, %s4160_s1 }
 0x3ac   : > { %p3391_p12 = scmp.lt.u32.totalorder %s3389_s2, %s3385_s9  ;;  %p3393_p6 = scmp.lt.u32.totalorder %s3385_s9, %s4023_s12 }
 0x3ad   : > { %p3387_p4 = pnand %p3386_p2, %p4161_p0 }
 0x3ae   : > { %p3392_p9 = por %p3391_p12, %p3390_p8 }
 0x3af   : > { %p3388_p7 = pneg %p3387_p4 }
 0x3b0   : > { %p3394_p1 = por %p3393_p6, %p3392_p9 }
 0x3b2   : > { %p3395_p11 = pnand %p3394_p1, %p3388_p7 }
 0x3b4   : > { %3398 = shalt.err (!%p3395_p11)
}
 0x3b5   : > { %2795 = dma.vmem_to_hbm [thread:$0]  (%p4161_p0), %s4025_s7, 64, %s4023_s12, %s2115_s14  }
 0x3b6 PF: > { %s4162_s5 = sld [smem:[#allocation34_spill]]  ;;  %s4163_s19 = sld [smem:[#allocation30_spill]] }
 0x3b7   : > { %s2141_s23 = sand.u32 1, %s3453_s17  }
 0x3b8   : > { %s2142_s30 = scalar_lea.sflag [#allocation4], %s2141_s23 }
 0x3bc   : > { %p4164_p5 = scmp.ne.s32.totalorder %s4162_s5, 0  ;;  %p4165_p3 = scmp.ge.s32.totalorder %s4163_s19, 2 }
 0x3be   : > { %p2833_p10 = pnand %p4165_p3, %p4164_p5 }
 0x3c0   : > { %3448 = dma.done.wait (!%p2833_p10), %s2142_s30, 64  }
 0x3c1   : > { %3450 = vsyncadd (!%p2833_p10), %s2142_s30, 4294967232  ;;  %s34_s22 = sadd.s32 1, %s4163_s19   ;;  %s4166_s26 = sld [smem:[#allocation28_spill]] }
 0x3c2   : > { %p31_p13 = scmp.ge.s32.totalorder %s34_s22, 4   ;;  %s4167_s19 = sld [smem:[#allocation33_spill]] }
 0x3c3   : > { %s4168_s13 = sld [smem:[#allocation32_spill]]  ;;  %s4169_s17 = smov %s3457_s18 }
 0x3c4   : > { %s4171_s20 = smov %s3469_s21  ;;  %33 = sbr.rel (!%p31_p13) target bundleno = 21 (0x15), region = 169 }
 0x3c7   : > { %s4170_s18 = smov %s4166_s26 }
 0x3c9   : > { %s4172_s21 = smov %s4168_s13 }
 0x3cb   :  { %2147 = vsyncpa [#allocation3], 1 }
 0x3cc   :  { %2149 = vsyncpa [#allocation3 + $0x1], 1 }
 0x3cd   :  { %2150 = vsyncpa [#allocation6], 1 }
 0x3ce   :  { %2152 = vsyncpa [#allocation6 + $0x1], 1 }
 0x3cf   :  { %2153 = vsyncpa [#allocation9], 1 }
 0x3d0   :  { %2154 = vsyncpa [#allocation12], 1 }
 0x3d1   :  { %2155 = vsyncpa [#allocation15], 1 }
 0x3d2   :  { %2156 = vsyncpa [#allocation18], 1 }
 0x3d3   :  { %2157 = vsyncpa [#allocation4], 1 }
 0x3d4   :  { %2159 = vsyncpa [#allocation4 + $0x1], 1 }

// kernel: deeplab_forward.14
= control target key start
LH: loop header
LB: loop body
LE: loop exit
PB: predicated region body
PF: predicated region fallthrough
CT: control target
= control target key end

     0   :  { %8 = vsyncpa [#allocation3], 0  ;;  %s1342_s0 = inlined_call_operand.hbm [shape: bf16[128,512], index: 0, kind: input, shape index: {}]   ;;  %s1343_s1 = inlined_call_operand.hbm [shape: bf16[512,32], index: 1, kind: input, shape index: {}]   ;;  %s1344_s2 = inlined_call_operand.hbm [shape: f32[1,32], index: 2, kind: input, shape index: {}]   ;;  %s1345_s3 = inlined_call_operand.hbm [shape: bf16[128,32], index: 3, kind: output, shape index: {}]  }
   0x1   :  { %9 = vsyncpa [#allocation6], 0 }
   0x2   :  { %10 = vsyncpa [#allocation4], 0  ;;  %s1226_s12 = smov [#allocation5]   ;;  %s1132_s16 = scalar_lea.hbm %s1343_s1, 4096 }
   0x3   :  { %s28_s13 = sshll.u32 %s1226_s12, 4  ;;  %p1133_p0 = scmp.ne.s32.totalorder %s1343_s1, %s1132_s16  ;;  %s29_s13 = int_to_ptr.vmem [resolvable:$true] %s28_s13 }
   0x4   :  { %p1136_p1 = scmp.lt.u32.totalorder %s1132_s16, %s1343_s1 }
   0x6   :  { %p1138_p2 = pnand %p1136_p1, %p1133_p0 }
   0x8   :  { %1141 = shalt.err (!%p1138_p2)
}
   0x9   :  { %s1142_s21 = scalar_lea.vmem %s29_s13, 4096  ;;  %p1147_p4 = scmp.lt.s32.totalorder %s29_s13, %s29_s13 }
   0xa   :  { %p1143_p3 = scmp.ne.s32.totalorder %s29_s13, %s1142_s21  ;;  %p1148_p5 = scmp.lt.s32.totalorder %s1142_s21, %s1142_s21 }
   0xc   :  { %p1149_p6 = por %p1148_p5, %p1147_p4 }
   0xe   :  { %p1150_p7 = pnand %p1149_p6, %p1143_p3 }
  0x10   :  { %1153 = shalt.err (!%p1150_p7)
}
  0x11   :  { %s1227_s22 = smov 64   ;;  %s1228_s23 = smov 4  }
  0x12   :  { %34 = dma.hbm_to_vmem [thread:$0]  %s1343_s1, 4096, %s29_s13, [#allocation6], %s1227_s22, %s1227_s22, %s1228_s23  }
  0x13   :  { %s1229_s26 = smov [#allocation2]   ;;  %s1154_s30 = scalar_lea.hbm %s1342_s0, 4096 }
  0x14   :  { %s16_s27 = sshll.u32 %s1229_s26, 4  ;;  %p1155_p8 = scmp.ne.s32.totalorder %s1342_s0, %s1154_s30  ;;  %s17_s27 = int_to_ptr.vmem [resolvable:$true] %s16_s27 }
  0x15   :  { %p1158_p9 = scmp.lt.u32.totalorder %s1154_s30, %s1342_s0 }
  0x17   :  { %p1160_p10 = pnand %p1158_p9, %p1155_p8 }
  0x19   :  { %1163 = shalt.err (!%p1160_p10)
}
  0x1a   :  { %s1164_s8 = scalar_lea.vmem %s17_s27, 4096  ;;  %p1169_p12 = scmp.lt.s32.totalorder %s17_s27, %s17_s27 }
  0x1b   :  { %p1165_p11 = scmp.ne.s32.totalorder %s17_s27, %s1164_s8  ;;  %p1170_p13 = scmp.lt.s32.totalorder %s1164_s8, %s1164_s8 }
  0x1d   :  { %p1171_p0 = por %p1170_p13, %p1169_p12 }
  0x1f   :  { %p1172_p1 = pnand %p1171_p0, %p1165_p11 }
  0x21   :  { %1175 = shalt.err (!%p1172_p1)
}
  0x22   :  { %s1230_s1 = smov 256   ;;  %s1231_s9 = smov 16  }
  0x23   :  { %22 = dma.hbm_to_vmem [thread:$0]  %s1342_s0, 4096, %s17_s27, [#allocation3], %s1230_s1, %s1230_s1, %s1231_s9  }
  0x24   :  { %s1232_s12 = smov [#allocation7]   ;;  %s1176_s16 = scalar_lea.hbm %s1344_s2, 16 }
  0x25   :  { %s41_s13 = sshll.u32 %s1232_s12, 4  ;;  %p1177_p2 = scmp.ne.s32.totalorder %s1344_s2, %s1176_s16  ;;  %s42_s13 = int_to_ptr.vmem [resolvable:$true] %s41_s13 }
  0x26   :  { %p1180_p3 = scmp.lt.u32.totalorder %s1176_s16, %s1344_s2 }
  0x28   :  { %p1182_p4 = pnand %p1180_p3, %p1177_p2 }
  0x2a   :  { %1185 = shalt.err (!%p1182_p4)
}
  0x2b   :  { %s1186_s21 = scalar_lea.vmem %s42_s13, 16  ;;  %s1190_s0 = scalar_lea.vmem %s42_s13, 32 }
  0x2c   :  { %p1187_p5 = scmp.ne.s32.totalorder %s42_s13, %s1186_s21  ;;  %p1191_p6 = scmp.lt.s32.totalorder %s42_s13, %s42_s13 }
  0x2d   :  { %p1192_p7 = scmp.lt.s32.totalorder %s1190_s0, %s1186_s21 }
  0x2f   :  { %p1193_p8 = por %p1192_p7, %p1191_p6 }
  0x31   :  { %p1194_p9 = pnand %p1193_p8, %p1187_p5 }
  0x33   :  { %1197 = shalt.err (!%p1194_p9)
}
  0x34   :  { %44 = dma.hbm_to_vmem [thread:$0]  %s1344_s2, 16, %s42_s13, [#allocation6]  }
  0x35   :  { %1220 = dma.done.wait [#allocation3], 4096  }
  0x36   :  { %1221 = vsyncadd [#allocation3], 4294963200 }
  0x37   :  { %1222 = dma.done.wait [#allocation6], 4112  }
  0x38   :  { %1223 = vsyncadd [#allocation6], 4294963184  ;;  %v1052_v0 = vld [vmem:[#allocation5 + $0x40] sm:$0xff]   ;;  %v1056_v4 = vld [vmem:[#allocation5 + $0x48] sm:$0xff]   ;;  %vm784_vm0 = vcmask 257024   ;;  %s1233_s2 = smov [#allocation8]  }
  0x39   :  { %v1053_v1 = vld [vmem:[#allocation5 + $0xc0] sm:$0xff]   ;;  %916 = vmatprep.subr.bf16.mxu0 %v1052_v0  ;;  %v1057_v5 = vld [vmem:[#allocation5 + $0xc8] sm:$0xff]   ;;  %v1060_v8 = vld [vmem:[#allocation5 + $0x50] sm:$0xff]   ;;  %s806_s26 = sshll.u32 %s1233_s2, 4  ;;  %s807_s26 = int_to_ptr.vmem [resolvable:$true] %s806_s26 }
  0x3a   :  { %v1054_v2 = vld [vmem:[#allocation5] sm:$0xff]   ;;  %980 = vmatprep.subr.bf16.mxu1 %v1053_v1  ;;  %v1058_v6 = vld [vmem:[#allocation5 + $0x8] sm:$0xff]   ;;  %v1061_v9 = vld [vmem:[#allocation5 + $0xd0] sm:$0xff]   ;;  %s1198_s27 = scalar_lea.vmem %s807_s26, 1024  ;;  %p1203_p11 = scmp.lt.s32.totalorder %s807_s26, %s807_s26 }
  0x3b   :  { %v1055_v3 = vld [vmem:[#allocation5 + $0x80] sm:$0xff]   ;;  %917 = vmatpush3.bf16.msra.mxu0 %v1054_v2  ;;  %v1059_v7 = vld [vmem:[#allocation5 + $0x88] sm:$0xff]   ;;  %v1062_v10 = vld [vmem:[#allocation5 + $0x10] sm:$0xff]   ;;  %p1199_p10 = scmp.ne.s32.totalorder %s807_s26, %s1198_s27  ;;  %p1204_p12 = scmp.lt.s32.totalorder %s1198_s27, %s1198_s27 }
  0x3c   :  { %981 = vmatpush3.bf16.msra.mxu1 %v1055_v3  ;;  %918 = vmatprep.subr.bf16.mxu0 %v1056_v4  ;;  %v1063_v11 = vld [vmem:[#allocation5 + $0x90] sm:$0xff]   ;;  %v1064_v12 = vld [vmem:[#allocation5 + $0x58] sm:$0xff]   ;;  %v1068_v16 = vld [vmem:[#allocation5 + $0x60] sm:$0xff]  }
  0x3d   :  { %982 = vmatprep.subr.bf16.mxu1 %v1057_v5  ;;  %v1065_v13 = vld [vmem:[#allocation5 + $0xd8] sm:$0xff]   ;;  %v1069_v17 = vld [vmem:[#allocation5 + $0xe0] sm:$0xff]   ;;  %v1072_v20 = vld [vmem:[#allocation5 + $0x68] sm:$0xff]   ;;  %p1205_p13 = por %p1204_p12, %p1203_p11 }
  0x3e   :  { %v1066_v14 = vld [vmem:[#allocation5 + $0x18] sm:$0xff]   ;;  %v1070_v18 = vld [vmem:[#allocation5 + $0x20] sm:$0xff]   ;;  %v1073_v21 = vld [vmem:[#allocation5 + $0xe8] sm:$0xff]  }
  0x3f   :  { %919 = vmatpush3.bf16.msra.mxu0 %v1058_v6  ;;  %v1067_v15 = vld [vmem:[#allocation5 + $0x98] sm:$0xff]   ;;  %v1071_v19 = vld [vmem:[#allocation5 + $0xa0] sm:$0xff]   ;;  %v1074_v22 = vld [vmem:[#allocation5 + $0x28] sm:$0xff]   ;;  %p1206_p0 = pnand %p1205_p13, %p1199_p10 }
  0x40   :  { %983 = vmatpush3.bf16.msra.mxu1 %v1059_v7  ;;  %920 = vmatprep.subr.bf16.mxu0 %v1060_v8  ;;  %v1075_v23 = vld [vmem:[#allocation5 + $0xa8] sm:$0xff]   ;;  %v1076_v24 = vld [vmem:[#allocation5 + $0x70] sm:$0xff]   ;;  %v1080_v28 = vld [vmem:[#allocation5 + $0x78] sm:$0xff]  }
  0x41   :  { %984 = vmatprep.subr.bf16.mxu1 %v1061_v9  ;;  %v1077_v25 = vld [vmem:[#allocation5 + $0xf0] sm:$0xff]   ;;  %v1081_v29 = vld [vmem:[#allocation5 + $0xf8] sm:$0xff]   ;;  %v1293_v2 = vld [vmem:[#allocation7] ss:$0 sm:$0xff] }
  0x42   :  { %v1078_v26 = vld [vmem:[#allocation5 + $0x30] sm:$0xff]   ;;  %v1082_v30 = vld [vmem:[#allocation5 + $0x38] sm:$0xff]  }
  0x43   :  { %921 = vmatpush3.bf16.msra.mxu0 %v1062_v10  ;;  %v1079_v27 = vld [vmem:[#allocation5 + $0xb0] sm:$0xff]   ;;  %v1083_v31 = vld [vmem:[#allocation5 + $0xb8] sm:$0xff]  }
  0x44   :  { %985 = vmatpush3.bf16.msra.mxu1 %v1063_v11  ;;  %922 = vmatprep.subr.bf16.mxu0 %v1064_v12  ;;  %v1084_v32 = vld [vmem:[#allocation2] ss:$16 sps:$4 sm:$0xff]   ;;  %v1086_v33 = vld [vmem:[#allocation2 + $0x4] ss:$16 sps:$4 sm:$0xff]   ;;  %v1087_v34 = vld [vmem:[#allocation2 + $0x8] ss:$16 sps:$4 sm:$0xff]  }
  0x45   :  { %986 = vmatprep.subr.bf16.mxu1 %v1065_v13  ;;  %v1089_v35 = vld [vmem:[#allocation2 + $0xc] ss:$16 sps:$4 sm:$0xff]   ;;  %542 = vmatprep.mubr.bf16.mxu0 %v1086_v33  ;;  %v1090_v36 = vld [vmem:[#allocation2 + $0x24] ss:$16 sps:$4 sm:$0xff]   ;;  %v1094_v38 = vld [vmem:[#allocation2 + $0x20] ss:$16 sps:$4 sm:$0xff]  }
  0x46   :  { %639 = vmatprep.mubr.bf16.mxu1 %v1089_v35  ;;  %v1092_v37 = vld [vmem:[#allocation2 + $0x2c] ss:$16 sps:$4 sm:$0xff]   ;;  %v1095_v39 = vld [vmem:[#allocation2 + $0x28] ss:$16 sps:$4 sm:$0xff]   ;;  %v1096_v40 = vld [vmem:[#allocation2 + $0x44] ss:$16 sps:$4 sm:$0xff]  }
  0x47   :  { %923 = vmatpush3.bf16.msra.mxu0 %v1066_v14  ;;  %v1098_v41 = vld [vmem:[#allocation2 + $0x4c] ss:$16 sps:$4 sm:$0xff]   ;;  %v1100_v42 = vld [vmem:[#allocation2 + $0x40] ss:$16 sps:$4 sm:$0xff]   ;;  %v1101_v43 = vld [vmem:[#allocation2 + $0x48] ss:$16 sps:$4 sm:$0xff]  }
  0x48   :  { %987 = vmatpush3.bf16.msra.mxu1 %v1067_v15  ;;  %924 = vmatprep.subr.bf16.mxu0 %v1068_v16  ;;  %v1102_v44 = vld [vmem:[#allocation2 + $0x64] ss:$16 sps:$4 sm:$0xff]   ;;  %v1104_v45 = vld [vmem:[#allocation2 + $0x6c] ss:$16 sps:$4 sm:$0xff]   ;;  %v1106_v46 = vld [vmem:[#allocation2 + $0x60] ss:$16 sps:$4 sm:$0xff]  }
  0x49   :  { %988 = vmatprep.subr.bf16.mxu1 %v1069_v17  ;;  %v1107_v47 = vld [vmem:[#allocation2 + $0x68] ss:$16 sps:$4 sm:$0xff]   ;;  %v1108_v48 = vld [vmem:[#allocation2 + $0x84] ss:$16 sps:$4 sm:$0xff]   ;;  %v1110_v49 = vld [vmem:[#allocation2 + $0x8c] ss:$16 sps:$4 sm:$0xff]  }
  0x4a   :  { %v1112_v50 = vld [vmem:[#allocation2 + $0x80] ss:$16 sps:$4 sm:$0xff]   ;;  %v1113_v51 = vld [vmem:[#allocation2 + $0x88] ss:$16 sps:$4 sm:$0xff]   ;;  %v1114_v52 = vld [vmem:[#allocation2 + $0xa4] ss:$16 sps:$4 sm:$0xff]  }
  0x4b   :  { %925 = vmatpush3.bf16.msra.mxu0 %v1070_v18  ;;  %v1116_v53 = vld [vmem:[#allocation2 + $0xac] ss:$16 sps:$4 sm:$0xff]   ;;  %v1118_v54 = vld [vmem:[#allocation2 + $0xa0] ss:$16 sps:$4 sm:$0xff]   ;;  %v1119_v55 = vld [vmem:[#allocation2 + $0xa8] ss:$16 sps:$4 sm:$0xff]  }
  0x4c   :  { %989 = vmatpush3.bf16.msra.mxu1 %v1071_v19  ;;  %926 = vmatprep.subr.bf16.mxu0 %v1072_v20  ;;  %v1120_v56 = vld [vmem:[#allocation2 + $0xc4] ss:$16 sps:$4 sm:$0xff]   ;;  %v1122_v57 = vld [vmem:[#allocation2 + $0xcc] ss:$16 sps:$4 sm:$0xff]   ;;  %v1124_v58 = vld [vmem:[#allocation2 + $0xc0] ss:$16 sps:$4 sm:$0xff]  }
  0x4d   :  { %990 = vmatprep.subr.bf16.mxu1 %v1073_v21  ;;  %v1125_v59 = vld [vmem:[#allocation2 + $0xc8] ss:$16 sps:$4 sm:$0xff]   ;;  %v1126_v60 = vld [vmem:[#allocation2 + $0xe4] ss:$16 sps:$4 sm:$0xff]   ;;  %v1128_v61 = vld [vmem:[#allocation2 + $0xec] ss:$16 sps:$4 sm:$0xff]  }
  0x4e   :  { %v1130_v62 = vld [vmem:[#allocation2 + $0xe0] ss:$16 sps:$4 sm:$0xff]   ;;  %v1131_v63 = vld [vmem:[#allocation2 + $0xe8] ss:$16 sps:$4 sm:$0xff]  }
  0x4f   :  { %927 = vmatpush3.bf16.msra.mxu0 %v1074_v22 }
  0x50   :  { %991 = vmatpush3.bf16.msra.mxu1 %v1075_v23  ;;  %928 = vmatprep.subr.bf16.mxu0 %v1076_v24 }
  0x51   :  { %992 = vmatprep.subr.bf16.mxu1 %v1077_v25 }
  0x53   :  { %929 = vmatpush3.bf16.msra.mxu0 %v1078_v26 }
  0x54   :  { %993 = vmatpush3.bf16.msra.mxu1 %v1079_v27  ;;  %930 = vmatprep.subr.bf16.mxu0 %v1080_v28 }
  0x55   :  { %994 = vmatprep.subr.bf16.mxu1 %v1081_v29 }
  0x57   :  { %931 = vmatpush3.bf16.msra.mxu0 %v1082_v30 }
  0x58   :  { %995 = vmatpush3.bf16.msra.mxu1 %v1083_v31 }
  0x5a   :  { %543 = vmatmul.mubr.bf16.vlgmr.msra.gmra.mrb[0].mxu0 %v1084_v32 }
  0x5b   :  { %640 = vmatmul.mubr.bf16.vlgmr.msra.gmra.mrb[0].mxu1 %v1087_v34  ;;  %550 = vmatprep.mubr.bf16.mxu0 %v1090_v36 }
  0x5c   :  { %647 = vmatprep.mubr.bf16.mxu1 %v1092_v37 }
  0x62   :  { %551 = vmatmul.mubr.bf16.gmra.mrb[4].mxu0 %v1094_v38 }
  0x63   :  { %648 = vmatmul.mubr.bf16.gmra.mrb[4].mxu1 %v1095_v39  ;;  %558 = vmatprep.mubr.bf16.mxu0 %v1096_v40 }
  0x64   :  { %655 = vmatprep.mubr.bf16.mxu1 %v1098_v41 }
  0x6a   :  { %559 = vmatmul.mubr.bf16.gmra.mrb[8].mxu0 %v1100_v42 }
  0x6b   :  { %656 = vmatmul.mubr.bf16.gmra.mrb[8].mxu1 %v1101_v43  ;;  %566 = vmatprep.mubr.bf16.mxu0 %v1102_v44 }
  0x6c   :  { %663 = vmatprep.mubr.bf16.mxu1 %v1104_v45 }
  0x72   :  { %567 = vmatmul.mubr.bf16.gmra.mrb[12].mxu0 %v1106_v46 }
  0x73   :  { %664 = vmatmul.mubr.bf16.gmra.mrb[12].mxu1 %v1107_v47  ;;  %574 = vmatprep.mubr.bf16.mxu0 %v1108_v48 }
  0x74   :  { %671 = vmatprep.mubr.bf16.mxu1 %v1110_v49 }
  0x7a   :  { %575 = vmatmul.mubr.bf16.gmra.mrb[16].mxu0 %v1112_v50 }
  0x7b   :  { %672 = vmatmul.mubr.bf16.gmra.mrb[16].mxu1 %v1113_v51  ;;  %582 = vmatprep.mubr.bf16.mxu0 %v1114_v52 }
  0x7c   :  { %679 = vmatprep.mubr.bf16.mxu1 %v1116_v53 }
  0x82   :  { %583 = vmatmul.mubr.bf16.gmra.mrb[20].mxu0 %v1118_v54 }
  0x83   :  { %680 = vmatmul.mubr.bf16.gmra.mrb[20].mxu1 %v1119_v55  ;;  %590 = vmatprep.mubr.bf16.mxu0 %v1120_v56 }
  0x84   :  { %687 = vmatprep.mubr.bf16.mxu1 %v1122_v57 }
  0x8a   :  { %591 = vmatmul.mubr.bf16.gmra.mrb[24].mxu0 %v1124_v58 }
  0x8b   :  { %688 = vmatmul.mubr.bf16.gmra.mrb[24].mxu1 %v1125_v59  ;;  %598 = vmatprep.mubr.bf16.mxu0 %v1126_v60 }
  0x8c   :  { %695 = vmatprep.mubr.bf16.mxu1 %v1128_v61 }
  0x92   :  { %599 = vmatmul.mubr.bf16.gmra.mrb[28].mxu0 %v1130_v62 }
  0x93   :  { %696 = vmatmul.mubr.bf16.gmra.mrb[28].mxu1 %v1131_v63 }
 0x12d   :  { %v932_v0 = vpop.f32.mrb[0].mxu0 }
 0x12e   :  { %v996_v1 = vpop.f32.mrb[0].mxu1  ;;  %v933_v3 = vpop.f32.mrb[1].mxu0 }
 0x12f   :  { %v934_v4 = vadd.f32 %v933_v3, %v932_v0  ;;  %v997_v5 = vpop.f32.mrb[1].mxu1  ;;  %v935_v6 = vpop.f32.mrb[2].mxu0 }
 0x130   :  { %v998_v7 = vadd.f32 %v997_v5, %v996_v1  ;;  %v999_v8 = vpop.f32.mrb[2].mxu1  ;;  %v936_v9 = vpop.f32.mrb[3].mxu0 }
 0x131   :  { %v545_v10 = vadd.f32 %v934_v4, %v1293_v2  ;;  %v937_v11 = vadd.f32 %v936_v9, %v935_v6  ;;  %v1000_v12 = vpop.f32.mrb[3].mxu1 }
 0x132   :  { %v1001_v13 = vadd.f32 %v1000_v12, %v999_v8 }
 0x133   :  { %v642_v14 = vadd.f32 %v998_v7, %v545_v10  ;;  %v548_v15 = vadd.f32 %v937_v11, %v1293_v2 }
 0x135   :  { %v704_v16 = vmax.f32 %v642_v14, 0.0  ;;  %v645_v17 = vadd.f32 %v1001_v13, %v548_v15  ;;  %v938_v18 = vpop.f32.mrb[4].mxu0 }
 0x136   :  { %v1002_v19 = vpop.f32.mrb[4].mxu1  ;;  %v939_v20 = vpop.f32.mrb[5].mxu0 }
 0x137   :  { %v900_v21 = vpack.c.bf16 %v704_v16, %v704_v16  ;;  %v705_v22 = vmax.f32 %v645_v17, 0.0  ;;  %v940_v23 = vadd.f32 %v939_v20, %v938_v18  ;;  %v1003_v24 = vpop.f32.mrb[5].mxu1  ;;  %v941_v25 = vpop.f32.mrb[6].mxu0 }
 0x138   :  { %v1004_v26 = vadd.f32 %v1003_v24, %v1002_v19  ;;  %v1005_v27 = vpop.f32.mrb[6].mxu1  ;;  %v942_v28 = vpop.f32.mrb[7].mxu0 }
 0x139   :  { %785 = vst.msk [vmem:[#allocation8] sm:$0xf] %vm784_vm0, %v900_v21  ;;  %v901_v29 = vpack.c.bf16 %v705_v22, %v705_v22  ;;  %v553_v30 = vadd.f32 %v940_v23, %v1293_v2  ;;  %v943_v31 = vadd.f32 %v942_v28, %v941_v25  ;;  %v1006_v32 = vpop.f32.mrb[7].mxu1 }
 0x13a   :  { %v1007_v33 = vadd.f32 %v1006_v32, %v1005_v27 }
 0x13b   :  { %786 = vst.msk [vmem:[#allocation8 + $0x4] sm:$0xf] %vm784_vm0, %v901_v29  ;;  %v650_v34 = vadd.f32 %v1004_v26, %v553_v30  ;;  %v556_v35 = vadd.f32 %v943_v31, %v1293_v2 }
 0x13d   :  { %v706_v36 = vmax.f32 %v650_v34, 0.0  ;;  %v653_v37 = vadd.f32 %v1007_v33, %v556_v35  ;;  %v944_v38 = vpop.f32.mrb[8].mxu0 }
 0x13e   :  { %v1008_v39 = vpop.f32.mrb[8].mxu1  ;;  %v945_v40 = vpop.f32.mrb[9].mxu0 }
 0x13f   :  { %v902_v41 = vpack.c.bf16 %v706_v36, %v706_v36  ;;  %v707_v42 = vmax.f32 %v653_v37, 0.0  ;;  %v946_v43 = vadd.f32 %v945_v40, %v944_v38  ;;  %v1009_v44 = vpop.f32.mrb[9].mxu1  ;;  %v947_v45 = vpop.f32.mrb[10].mxu0 }
 0x140   :  { %v1010_v46 = vadd.f32 %v1009_v44, %v1008_v39  ;;  %v1011_v47 = vpop.f32.mrb[10].mxu1  ;;  %v948_v48 = vpop.f32.mrb[11].mxu0 }
 0x141   :  { %787 = vst.msk [vmem:[#allocation8 + $0x8] sm:$0xf] %vm784_vm0, %v902_v41  ;;  %v903_v49 = vpack.c.bf16 %v707_v42, %v707_v42  ;;  %v561_v50 = vadd.f32 %v946_v43, %v1293_v2  ;;  %v949_v51 = vadd.f32 %v948_v48, %v947_v45  ;;  %v1012_v52 = vpop.f32.mrb[11].mxu1 }
 0x142   :  { %v1013_v53 = vadd.f32 %v1012_v52, %v1011_v47 }
 0x143   :  { %788 = vst.msk [vmem:[#allocation8 + $0xc] sm:$0xf] %vm784_vm0, %v903_v49  ;;  %v658_v54 = vadd.f32 %v1010_v46, %v561_v50  ;;  %v564_v55 = vadd.f32 %v949_v51, %v1293_v2 }
 0x145   :  { %v708_v56 = vmax.f32 %v658_v54, 0.0  ;;  %v661_v57 = vadd.f32 %v1013_v53, %v564_v55  ;;  %v950_v58 = vpop.f32.mrb[12].mxu0 }
 0x146   :  { %v1014_v59 = vpop.f32.mrb[12].mxu1  ;;  %v951_v60 = vpop.f32.mrb[13].mxu0 }
 0x147   :  { %v904_v61 = vpack.c.bf16 %v708_v56, %v708_v56  ;;  %v709_v62 = vmax.f32 %v661_v57, 0.0  ;;  %v952_v63 = vadd.f32 %v951_v60, %v950_v58  ;;  %v1015_v0 = vpop.f32.mrb[13].mxu1  ;;  %v953_v1 = vpop.f32.mrb[14].mxu0 }
 0x148   :  { %v1016_v3 = vadd.f32 %v1015_v0, %v1014_v59  ;;  %v1017_v4 = vpop.f32.mrb[14].mxu1  ;;  %v954_v5 = vpop.f32.mrb[15].mxu0 }
 0x149   :  { %789 = vst.msk [vmem:[#allocation8 + $0x10] sm:$0xf] %vm784_vm0, %v904_v61  ;;  %v905_v6 = vpack.c.bf16 %v709_v62, %v709_v62  ;;  %v569_v7 = vadd.f32 %v952_v63, %v1293_v2  ;;  %v955_v8 = vadd.f32 %v954_v5, %v953_v1  ;;  %v1018_v9 = vpop.f32.mrb[15].mxu1 }
 0x14a   :  { %v1019_v10 = vadd.f32 %v1018_v9, %v1017_v4 }
 0x14b   :  { %790 = vst.msk [vmem:[#allocation8 + $0x14] sm:$0xf] %vm784_vm0, %v905_v6  ;;  %v666_v11 = vadd.f32 %v1016_v3, %v569_v7  ;;  %v572_v12 = vadd.f32 %v955_v8, %v1293_v2 }
 0x14d   :  { %v710_v13 = vmax.f32 %v666_v11, 0.0  ;;  %v669_v14 = vadd.f32 %v1019_v10, %v572_v12  ;;  %v956_v15 = vpop.f32.mrb[16].mxu0 }
 0x14e   :  { %v1020_v16 = vpop.f32.mrb[16].mxu1  ;;  %v957_v17 = vpop.f32.mrb[17].mxu0 }
 0x14f   :  { %v906_v18 = vpack.c.bf16 %v710_v13, %v710_v13  ;;  %v711_v19 = vmax.f32 %v669_v14, 0.0  ;;  %v958_v20 = vadd.f32 %v957_v17, %v956_v15  ;;  %v1021_v21 = vpop.f32.mrb[17].mxu1  ;;  %v959_v22 = vpop.f32.mrb[18].mxu0 }
 0x150   :  { %v1022_v23 = vadd.f32 %v1021_v21, %v1020_v16  ;;  %v1023_v24 = vpop.f32.mrb[18].mxu1  ;;  %v960_v25 = vpop.f32.mrb[19].mxu0 }
 0x151   :  { %791 = vst.msk [vmem:[#allocation8 + $0x18] sm:$0xf] %vm784_vm0, %v906_v18  ;;  %v907_v26 = vpack.c.bf16 %v711_v19, %v711_v19  ;;  %v577_v27 = vadd.f32 %v958_v20, %v1293_v2  ;;  %v961_v28 = vadd.f32 %v960_v25, %v959_v22  ;;  %v1024_v29 = vpop.f32.mrb[19].mxu1 }
 0x152   :  { %v1025_v30 = vadd.f32 %v1024_v29, %v1023_v24 }
 0x153   :  { %792 = vst.msk [vmem:[#allocation8 + $0x1c] sm:$0xf] %vm784_vm0, %v907_v26  ;;  %v674_v31 = vadd.f32 %v1022_v23, %v577_v27  ;;  %v580_v32 = vadd.f32 %v961_v28, %v1293_v2 }
 0x155   :  { %v712_v33 = vmax.f32 %v674_v31, 0.0  ;;  %v677_v34 = vadd.f32 %v1025_v30, %v580_v32  ;;  %v962_v35 = vpop.f32.mrb[20].mxu0 }
 0x156   :  { %v1026_v36 = vpop.f32.mrb[20].mxu1  ;;  %v963_v37 = vpop.f32.mrb[21].mxu0 }
 0x157   :  { %v908_v38 = vpack.c.bf16 %v712_v33, %v712_v33  ;;  %v713_v39 = vmax.f32 %v677_v34, 0.0  ;;  %v964_v40 = vadd.f32 %v963_v37, %v962_v35  ;;  %v1027_v41 = vpop.f32.mrb[21].mxu1  ;;  %v965_v42 = vpop.f32.mrb[22].mxu0 }
 0x158   :  { %v1028_v43 = vadd.f32 %v1027_v41, %v1026_v36  ;;  %v1029_v44 = vpop.f32.mrb[22].mxu1  ;;  %v966_v45 = vpop.f32.mrb[23].mxu0 }
 0x159   :  { %793 = vst.msk [vmem:[#allocation8 + $0x20] sm:$0xf] %vm784_vm0, %v908_v38  ;;  %v909_v46 = vpack.c.bf16 %v713_v39, %v713_v39  ;;  %v585_v47 = vadd.f32 %v964_v40, %v1293_v2  ;;  %v967_v48 = vadd.f32 %v966_v45, %v965_v42  ;;  %v1030_v49 = vpop.f32.mrb[23].mxu1 }
 0x15a   :  { %v1031_v50 = vadd.f32 %v1030_v49, %v1029_v44 }
 0x15b   :  { %794 = vst.msk [vmem:[#allocation8 + $0x24] sm:$0xf] %vm784_vm0, %v909_v46  ;;  %v682_v51 = vadd.f32 %v1028_v43, %v585_v47  ;;  %v588_v52 = vadd.f32 %v967_v48, %v1293_v2 }
 0x15d   :  { %v714_v53 = vmax.f32 %v682_v51, 0.0  ;;  %v685_v54 = vadd.f32 %v1031_v50, %v588_v52  ;;  %v968_v55 = vpop.f32.mrb[24].mxu0 }
 0x15e   :  { %v1032_v56 = vpop.f32.mrb[24].mxu1  ;;  %v969_v57 = vpop.f32.mrb[25].mxu0 }
 0x15f   :  { %v910_v58 = vpack.c.bf16 %v714_v53, %v714_v53  ;;  %v715_v59 = vmax.f32 %v685_v54, 0.0  ;;  %v970_v60 = vadd.f32 %v969_v57, %v968_v55  ;;  %v1033_v61 = vpop.f32.mrb[25].mxu1  ;;  %v971_v62 = vpop.f32.mrb[26].mxu0 }
 0x160   :  { %v1034_v63 = vadd.f32 %v1033_v61, %v1032_v56  ;;  %v1035_v0 = vpop.f32.mrb[26].mxu1  ;;  %v972_v1 = vpop.f32.mrb[27].mxu0 }
 0x161   :  { %795 = vst.msk [vmem:[#allocation8 + $0x28] sm:$0xf] %vm784_vm0, %v910_v58  ;;  %v911_v3 = vpack.c.bf16 %v715_v59, %v715_v59  ;;  %v593_v4 = vadd.f32 %v970_v60, %v1293_v2  ;;  %v973_v5 = vadd.f32 %v972_v1, %v971_v62  ;;  %v1036_v6 = vpop.f32.mrb[27].mxu1 }
 0x162   :  { %v1037_v7 = vadd.f32 %v1036_v6, %v1035_v0 }
 0x163   :  { %796 = vst.msk [vmem:[#allocation8 + $0x2c] sm:$0xf] %vm784_vm0, %v911_v3  ;;  %v690_v8 = vadd.f32 %v1034_v63, %v593_v4  ;;  %v596_v9 = vadd.f32 %v973_v5, %v1293_v2 }
 0x165   :  { %v716_v10 = vmax.f32 %v690_v8, 0.0  ;;  %v693_v11 = vadd.f32 %v1037_v7, %v596_v9  ;;  %v974_v12 = vpop.f32.mrb[28].mxu0 }
 0x166   :  { %v1038_v13 = vpop.f32.mrb[28].mxu1  ;;  %v975_v14 = vpop.f32.mrb[29].mxu0 }
 0x167   :  { %v912_v15 = vpack.c.bf16 %v716_v10, %v716_v10  ;;  %v717_v16 = vmax.f32 %v693_v11, 0.0  ;;  %v976_v17 = vadd.f32 %v975_v14, %v974_v12  ;;  %v1039_v18 = vpop.f32.mrb[29].mxu1  ;;  %v977_v19 = vpop.f32.mrb[30].mxu0 }
 0x168   :  { %v1040_v20 = vadd.f32 %v1039_v18, %v1038_v13  ;;  %v1041_v21 = vpop.f32.mrb[30].mxu1  ;;  %v978_v22 = vpop.f32.mrb[31].mxu0 }
 0x169   :  { %797 = vst.msk [vmem:[#allocation8 + $0x30] sm:$0xf] %vm784_vm0, %v912_v15  ;;  %v913_v23 = vpack.c.bf16 %v717_v16, %v717_v16  ;;  %v601_v24 = vadd.f32 %v976_v17, %v1293_v2  ;;  %v979_v25 = vadd.f32 %v978_v22, %v977_v19  ;;  %v1042_v26 = vpop.f32.mrb[31].mxu1 }
 0x16a   :  { %v1043_v27 = vadd.f32 %v1042_v26, %v1041_v21 }
 0x16b   :  { %798 = vst.msk [vmem:[#allocation8 + $0x34] sm:$0xf] %vm784_vm0, %v913_v23  ;;  %v698_v28 = vadd.f32 %v1040_v20, %v601_v24  ;;  %v604_v29 = vadd.f32 %v979_v25, %v1293_v2 }
 0x16d   :  { %v718_v30 = vmax.f32 %v698_v28, 0.0  ;;  %v701_v31 = vadd.f32 %v1043_v27, %v604_v29 }
 0x16f   :  { %v914_v32 = vpack.c.bf16 %v718_v30, %v718_v30  ;;  %v719_v33 = vmax.f32 %v701_v31, 0.0 }
 0x171   :  { %799 = vst.msk [vmem:[#allocation8 + $0x38] sm:$0xf] %vm784_vm0, %v914_v32  ;;  %v915_v34 = vpack.c.bf16 %v719_v33, %v719_v33 }
 0x173   :  { %800 = vst.msk [vmem:[#allocation8 + $0x3c] sm:$0xf] %vm784_vm0, %v915_v34 }
 0x174   :  { %1209 = shalt.err (!%p1206_p0)
}
 0x175   :  { %s1210_s30 = scalar_lea.hbm %s1345_s3, 1024 }
 0x176   :  { %p1211_p1 = scmp.ne.s32.totalorder %s1345_s3, %s1210_s30  ;;  %p1214_p2 = scmp.lt.u32.totalorder %s1210_s30, %s1345_s3 }
 0x178   :  { %p1216_p3 = pnand %p1214_p2, %p1211_p1 }
 0x17a   :  { %1219 = shalt.err (!%p1216_p3)
}
 0x17b   :  { %812 = dma.vmem_to_hbm [thread:$0]  %s807_s26, 1024, %s1345_s3, [#allocation4], %s1227_s22, %s1227_s22, %s1228_s23  }
 0x17c   :  { %1224 = dma.done.wait [#allocation4], 1024  }
 0x17d   :  { %1225 = vsyncadd [#allocation4], 4294966272 }
 0x17e   :  { %816 = vsyncpa [#allocation3], 1 }
 0x17f   :  { %817 = vsyncpa [#allocation6], 1 }
 0x180   :  { %818 = vsyncpa [#allocation4], 1 }

// kernel: deeplab_forward.15
= control target key start
LH: loop header
LB: loop body
LE: loop exit
PB: predicated region body
PF: predicated region fallthrough
CT: control target
= control target key end

     0   :  { %10 = vsyncpa [#allocation3], 0  ;;  %s1452_s0 = inlined_call_operand.hbm [shape: bf16[128,384], index: 0, kind: input, shape index: {}]   ;;  %s1453_s1 = inlined_call_operand.hbm [shape: bf16[384,128], index: 1, kind: input, shape index: {}]   ;;  %s1454_s2 = inlined_call_operand.hbm [shape: f32[1,128], index: 2, kind: input, shape index: {}]   ;;  %s1455_s3 = inlined_call_operand.hbm [shape: bf16[128,3], index: 3, kind: input, shape index: {}]   ;;  %s1456_s4 = inlined_call_operand.hbm [shape: f32[1,3], index: 4, kind: input, shape index: {}]   ;;  %s1457_s5 = inlined_call_operand.hbm [shape: f32[128,3], index: 5, kind: output, shape index: {}]  }
   0x1   :  { %11 = vsyncpa [#allocation6], 0 }
   0x2   :  { %12 = vsyncpa [#allocation9], 0 }
   0x3   :  { %13 = vsyncpa [#allocation4], 0  ;;  %s1301_s18 = smov [#allocation5]   ;;  %s1161_s22 = scalar_lea.hbm %s1453_s1, 3072 }
   0x4   :  { %s31_s19 = sshll.u32 %s1301_s18, 4  ;;  %p1162_p0 = scmp.ne.s32.totalorder %s1453_s1, %s1161_s22  ;;  %s32_s19 = int_to_ptr.vmem [resolvable:$true] %s31_s19 }
   0x5   :  { %p1165_p1 = scmp.lt.u32.totalorder %s1161_s22, %s1453_s1 }
   0x7   :  { %p1167_p2 = pnand %p1165_p1, %p1162_p0 }
   0x9   :  { %1170 = shalt.err (!%p1167_p2)
}
   0xa   :  { %s1171_s27 = scalar_lea.vmem %s32_s19, 3072  ;;  %p1176_p4 = scmp.lt.s32.totalorder %s32_s19, %s32_s19 }
   0xb   :  { %p1172_p3 = scmp.ne.s32.totalorder %s32_s19, %s1171_s27  ;;  %p1177_p5 = scmp.lt.s32.totalorder %s1171_s27, %s1171_s27 }
   0xd   :  { %p1178_p6 = por %p1177_p5, %p1176_p4 }
   0xf   :  { %p1179_p7 = pnand %p1178_p6, %p1172_p3 }
  0x11   :  { %1182 = shalt.err (!%p1179_p7)
}
  0x12   :  { %s1302_s28 = smov 64   ;;  %s1303_s29 = smov 4  }
  0x13   :  { %37 = dma.hbm_to_vmem [thread:$0]  %s1453_s1, 3072, %s32_s19, [#allocation6], %s1302_s28, %s1302_s28, %s1303_s29  }
  0x14   :  { %s1304_s7 = smov [#allocation8]   ;;  %s1305_s9 = smov [#allocation2]  }
  0x15   :  { %s53_s8 = sshll.u32 %s1304_s7, 4  ;;  %s19_s10 = sshll.u32 %s1305_s9, 4  ;;  %s54_s8 = int_to_ptr.vmem [resolvable:$true] %s53_s8  ;;  %s20_s10 = int_to_ptr.vmem [resolvable:$true] %s19_s10 }
  0x16   :  { %s1183_s13 = scalar_lea.hbm %s1455_s3, 1024 }
  0x17   :  { %p1184_p8 = scmp.ne.s32.totalorder %s1455_s3, %s1183_s13  ;;  %p1187_p9 = scmp.lt.u32.totalorder %s1183_s13, %s1455_s3 }
  0x19   :  { %p1189_p10 = pnand %p1187_p9, %p1184_p8 }
  0x1b   :  { %1192 = shalt.err (!%p1189_p10)
}
  0x1c   :  { %s1193_s1 = scalar_lea.vmem %s54_s8, 1024  ;;  %p1198_p12 = scmp.lt.s32.totalorder %s54_s8, %s54_s8 }
  0x1d   :  { %p1194_p11 = scmp.ne.s32.totalorder %s54_s8, %s1193_s1  ;;  %p1199_p13 = scmp.lt.s32.totalorder %s1193_s1, %s1193_s1 }
  0x1f   :  { %p1200_p0 = por %p1199_p13, %p1198_p12 }
  0x21   :  { %p1201_p1 = pnand %p1200_p0, %p1194_p11 }
  0x23   :  { %1204 = shalt.err (!%p1201_p1)
}
  0x24   :  { %59 = dma.hbm_to_vmem [thread:$0]  %s1455_s3, 1024, %s54_s8, [#allocation9], %s1302_s28, %s1302_s28, %s1303_s29  }
  0x25   :  { %s1205_s22 = scalar_lea.hbm %s1452_s0, 3072 }
  0x26   :  { %p1206_p2 = scmp.ne.s32.totalorder %s1452_s0, %s1205_s22  ;;  %p1209_p3 = scmp.lt.u32.totalorder %s1205_s22, %s1452_s0 }
  0x28   :  { %p1211_p4 = pnand %p1209_p3, %p1206_p2 }
  0x2a   :  { %1214 = shalt.err (!%p1211_p4)
}
  0x2b   :  { %s1215_s27 = scalar_lea.vmem %s20_s10, 3072  ;;  %p1220_p6 = scmp.lt.s32.totalorder %s20_s10, %s20_s10 }
  0x2c   :  { %p1216_p5 = scmp.ne.s32.totalorder %s20_s10, %s1215_s27  ;;  %p1221_p7 = scmp.lt.s32.totalorder %s1215_s27, %s1215_s27 }
  0x2e   :  { %p1222_p8 = por %p1221_p7, %p1220_p6 }
  0x30   :  { %p1223_p9 = pnand %p1222_p8, %p1216_p5 }
  0x32   :  { %1226 = shalt.err (!%p1223_p9)
}
  0x33   :  { %s1306_s3 = smov 192   ;;  %s1307_s28 = smov 12  }
  0x34   :  { %25 = dma.hbm_to_vmem [thread:$0]  %s1452_s0, 3072, %s20_s10, [#allocation3], %s1306_s3, %s1306_s3, %s1307_s28  }
  0x35   :  { %s1308_s6 = smov [#allocation7]   ;;  %s1309_s8 = smov [#allocation10]  }
  0x36   :  { %s44_s7 = sshll.u32 %s1308_s6, 4  ;;  %s66_s9 = sshll.u32 %s1309_s8, 4  ;;  %s45_s7 = int_to_ptr.vmem [resolvable:$true] %s44_s7  ;;  %s67_s9 = int_to_ptr.vmem [resolvable:$true] %s66_s9 }
  0x37   :  { %s1227_s13 = scalar_lea.hbm %s1454_s2, 16 }
  0x38   :  { %p1228_p10 = scmp.ne.s32.totalorder %s1454_s2, %s1227_s13  ;;  %p1231_p11 = scmp.lt.u32.totalorder %s1227_s13, %s1454_s2 }
  0x3a   :  { %p1233_p12 = pnand %p1231_p11, %p1228_p10 }
  0x3c   :  { %1236 = shalt.err (!%p1233_p12)
}
  0x3d   :  { %s1237_s0 = scalar_lea.vmem %s45_s7, 16  ;;  %s1241_s10 = scalar_lea.vmem %s45_s7, 32 }
  0x3e   :  { %p1238_p13 = scmp.ne.s32.totalorder %s45_s7, %s1237_s0  ;;  %p1242_p0 = scmp.lt.s32.totalorder %s45_s7, %s45_s7 }
  0x3f   :  { %p1243_p1 = scmp.lt.s32.totalorder %s1241_s10, %s1237_s0 }
  0x41   :  { %p1244_p2 = por %p1243_p1, %p1242_p0 }
  0x43   :  { %p1245_p3 = pnand %p1244_p2, %p1238_p13 }
  0x45   :  { %1248 = shalt.err (!%p1245_p3)
}
  0x46   :  { %47 = dma.hbm_to_vmem [thread:$0]  %s1454_s2, 16, %s45_s7, [#allocation6]  }
  0x47   :  { %s1249_s21 = scalar_lea.hbm %s1456_s4, 16 }
  0x48   :  { %p1250_p4 = scmp.ne.s32.totalorder %s1456_s4, %s1249_s21  ;;  %p1253_p5 = scmp.lt.u32.totalorder %s1249_s21, %s1456_s4 }
  0x4a   :  { %p1255_p6 = pnand %p1253_p5, %p1250_p4 }
  0x4c   :  { %1258 = shalt.err (!%p1255_p6)
}
  0x4d   :  { %s1259_s26 = scalar_lea.vmem %s67_s9, 16  ;;  %s1263_s27 = scalar_lea.vmem %s67_s9, 32 }
  0x4e   :  { %p1260_p7 = scmp.ne.s32.totalorder %s67_s9, %s1259_s26  ;;  %p1264_p8 = scmp.lt.s32.totalorder %s67_s9, %s67_s9 }
  0x4f   :  { %p1265_p9 = scmp.lt.s32.totalorder %s1263_s27, %s1259_s26 }
  0x51   :  { %p1266_p10 = por %p1265_p9, %p1264_p8 }
  0x53   :  { %p1267_p11 = pnand %p1266_p10, %p1260_p7 }
  0x55   :  { %1270 = shalt.err (!%p1267_p11)
}
  0x56   :  { %69 = dma.hbm_to_vmem [thread:$0]  %s1456_s4, 16, %s67_s9, [#allocation9]  }
  0x57   :  { %1293 = dma.done.wait [#allocation3], 3072  }
  0x58   :  { %1294 = vsyncadd [#allocation3], 4294964224 }
  0x59   :  { %1295 = dma.done.wait [#allocation6], 3088  }
  0x5a   :  { %1296 = vsyncadd [#allocation6], 4294964208 }
  0x5b   :  { %1297 = dma.done.wait [#allocation9], 1040  }
  0x5c   :  { %1298 = vsyncadd [#allocation9], 4294966256  ;;  %v1097_v0 = vld [vmem:[#allocation5 + $0x40] sm:$0xff]   ;;  %v1099_v2 = vld [vmem:[#allocation5 + $0x48] sm:$0xff]   ;;  %vm831_vm0 = vcmask 23552   ;;  %s1310_s4 = smov [#allocation11]  }
  0x5d   :  { %v1098_v1 = vld [vmem:[#allocation5] sm:$0xff]   ;;  %925 = vmatprep.subr.bf16.mxu0 %v1097_v0  ;;  %v1101_v4 = vld [vmem:[#allocation5 + $0x8] sm:$0xff]   ;;  %v1102_v5 = vld [vmem:[#allocation5 + $0x50] sm:$0xff]   ;;  %s853_s28 = sshll.u32 %s1310_s4, 4  ;;  %s854_s28 = int_to_ptr.vmem [resolvable:$true] %s853_s28 }
  0x5e   :  { %926 = vmatpush3.bf16.msra.mxu0 %v1098_v1  ;;  %v1100_v3 = vld [vmem:[#allocation5 + $0x80] sm:$0xff]   ;;  %v1103_v6 = vld [vmem:[#allocation5 + $0x88] sm:$0xff]   ;;  %v1104_v7 = vld [vmem:[#allocation5 + $0x10] sm:$0xff]   ;;  %s1271_s29 = scalar_lea.vmem %s854_s28, 2048  ;;  %p1276_p13 = scmp.lt.s32.totalorder %s854_s28, %s854_s28 }
  0x5f   :  { %927 = vmatprep.subr.bf16.mxu0 %v1099_v2  ;;  %1021 = vmatprep.subr.bf16.mxu1 %v1100_v3  ;;  %v1105_v8 = vld [vmem:[#allocation5 + $0x58] sm:$0xff]   ;;  %v1106_v9 = vld [vmem:[#allocation5 + $0x90] sm:$0xff]   ;;  %v1108_v11 = vld [vmem:[#allocation5 + $0x60] sm:$0xff]   ;;  %p1272_p12 = scmp.ne.s32.totalorder %s854_s28, %s1271_s29  ;;  %p1277_p0 = scmp.lt.s32.totalorder %s1271_s29, %s1271_s29 }
  0x60   :  { %1022 = vmatpush3.bf16.msra.mxu1 %v1100_v3  ;;  %v1107_v10 = vld [vmem:[#allocation5 + $0x18] sm:$0xff]   ;;  %v1110_v13 = vld [vmem:[#allocation5 + $0x20] sm:$0xff]   ;;  %v1111_v15 = vld [vmem:[#allocation5 + $0x68] sm:$0xff]  }
  0x61   :  { %1023 = vmatprep.subr.bf16.mxu1 %v1103_v6  ;;  %v1109_v12 = vld [vmem:[#allocation5 + $0x98] sm:$0xff]   ;;  %v1112_v14 = vld [vmem:[#allocation5 + $0xa0] sm:$0xff]   ;;  %v1113_v16 = vld [vmem:[#allocation5 + $0x28] sm:$0xff]   ;;  %p1278_p1 = por %p1277_p0, %p1276_p13 }
  0x62   :  { %928 = vmatpush3.bf16.msra.mxu0 %v1101_v4  ;;  %v1115_v17 = vld [vmem:[#allocation5 + $0xa8] sm:$0xff]   ;;  %v1114_v18 = vld [vmem:[#allocation5 + $0x70] sm:$0xff]   ;;  %v1117_v20 = vld [vmem:[#allocation5 + $0x78] sm:$0xff]  }
  0x63   :  { %929 = vmatprep.subr.bf16.mxu0 %v1102_v5  ;;  %v1116_v19 = vld [vmem:[#allocation5 + $0x30] sm:$0xff]   ;;  %v1119_v23 = vld [vmem:[#allocation5 + $0x38] sm:$0xff]   ;;  %v1120_v26 = vld [vmem:[#allocation2] ss:$12 sps:$4 sm:$0xff]   ;;  %p1279_p2 = pnand %p1278_p1, %p1272_p12 }
  0x64   :  { %1024 = vmatpush3.bf16.msra.mxu1 %v1103_v6  ;;  %v1118_v21 = vld [vmem:[#allocation5 + $0xb0] sm:$0xff]   ;;  %v1123_v25 = vld [vmem:[#allocation5 + $0xb8] sm:$0xff]   ;;  %v1125_v28 = vld [vmem:[#allocation2 + $0x20] ss:$12 sps:$4 sm:$0xff]  }
  0x65   :  { %1025 = vmatprep.subr.bf16.mxu1 %v1106_v9  ;;  %v1122_v22 = vld [vmem:[#allocation2 + $0x4] ss:$12 sps:$4 sm:$0xff]   ;;  %v1124_v24 = vld [vmem:[#allocation2 + $0x8] ss:$12 sps:$4 sm:$0xff]   ;;  %v1134_v37 = vld [vmem:[#allocation2 + $0x4c] ss:$12 sps:$4 sm:$0xff]  }
  0x66   :  { %930 = vmatpush3.bf16.msra.mxu0 %v1104_v7  ;;  %477 = vmatprep.mubr.bf16.mxu0 %v1122_v22  ;;  %v1126_v27 = vld [vmem:[#allocation2 + $0x1c] ss:$12 sps:$4 sm:$0xff]   ;;  %v1132_v29 = vld [vmem:[#allocation2 + $0x38] ss:$12 sps:$4 sm:$0xff]   ;;  %v1129_v31 = vld [vmem:[#allocation2 + $0x34] ss:$12 sps:$4 sm:$0xff]  }
  0x67   :  { %931 = vmatprep.subr.bf16.mxu0 %v1105_v8  ;;  %1037 = vmatprep.mubr.bf16.mxu1 %v1124_v24  ;;  %v1128_v30 = vld [vmem:[#allocation2 + $0x18] ss:$12 sps:$4 sm:$0xff]   ;;  %v1133_v32 = vld [vmem:[#allocation2 + $0x50] ss:$12 sps:$4 sm:$0xff]   ;;  %v1140_v33 = vld [vmem:[#allocation2 + $0x68] ss:$12 sps:$4 sm:$0xff]  }
  0x68   :  { %1026 = vmatpush3.bf16.msra.mxu1 %v1106_v9  ;;  %v1153_v34 = vld [vmem:[#allocation8] sm:$0xff]   ;;  %v1131_v35 = vld [vmem:[#allocation2 + $0x30] ss:$12 sps:$4 sm:$0xff]   ;;  %v1150_v49 = vld [vmem:[#allocation2 + $0xac] ss:$12 sps:$4 sm:$0xff]  }
  0x69   :  { %1027 = vmatprep.subr.bf16.mxu1 %v1109_v12  ;;  %v1154_v36 = vld [vmem:[#allocation8 + $0x8] sm:$0xff]   ;;  %v1155_v38 = vld [vmem:[#allocation8 + $0x10] sm:$0xff]   ;;  %v1156_v51 = vld [vmem:[#allocation8 + $0x18] sm:$0xff]  }
  0x6a   :  { %932 = vmatpush3.bf16.msra.mxu0 %v1107_v10  ;;  %v1141_v39 = vld [vmem:[#allocation2 + $0x80] ss:$12 sps:$4 sm:$0xff]   ;;  %v1148_v40 = vld [vmem:[#allocation2 + $0x98] ss:$12 sps:$4 sm:$0xff]   ;;  %v1136_v41 = vld [vmem:[#allocation2 + $0x48] ss:$12 sps:$4 sm:$0xff]  }
  0x6b   :  { %933 = vmatprep.subr.bf16.mxu0 %v1108_v11  ;;  %v1137_v42 = vld [vmem:[#allocation2 + $0x64] ss:$12 sps:$4 sm:$0xff]   ;;  %v1139_v44 = vld [vmem:[#allocation2 + $0x60] ss:$12 sps:$4 sm:$0xff]   ;;  %v1142_v45 = vld [vmem:[#allocation2 + $0x7c] ss:$12 sps:$4 sm:$0xff]  }
  0x6c   :  { %1028 = vmatpush3.bf16.msra.mxu1 %v1109_v12  ;;  %v1149_v43 = vld [vmem:[#allocation2 + $0xb0] ss:$12 sps:$4 sm:$0xff]   ;;  %v1144_v46 = vld [vmem:[#allocation2 + $0x78] ss:$12 sps:$4 sm:$0xff]   ;;  %v1145_v47 = vld [vmem:[#allocation2 + $0x94] ss:$12 sps:$4 sm:$0xff]  }
  0x6d   :  { %1029 = vmatprep.subr.bf16.mxu1 %v1112_v14  ;;  %v1147_v48 = vld [vmem:[#allocation2 + $0x90] ss:$12 sps:$4 sm:$0xff]   ;;  %v1152_v50 = vld [vmem:[#allocation2 + $0xa8] ss:$12 sps:$4 sm:$0xff]   ;;  %v1403_v58 = vld [vmem:[#allocation7] ss:$0 sm:$0xff] }
  0x6e   :  { %934 = vmatpush3.bf16.msra.mxu0 %v1110_v13  ;;  %v1157_v52 = vld [vmem:[#allocation8 + $0x20] sm:$0xff]   ;;  %v1158_v53 = vld [vmem:[#allocation8 + $0x28] sm:$0xff]   ;;  %v1159_v54 = vld [vmem:[#allocation8 + $0x30] sm:$0xff]  }
  0x6f   :  { %935 = vmatprep.subr.bf16.mxu0 %v1111_v15  ;;  %v1160_v55 = vld [vmem:[#allocation8 + $0x38] sm:$0xff]  }
  0x70   :  { %1030 = vmatpush3.bf16.msra.mxu1 %v1112_v14 }
  0x71   :  { %1031 = vmatprep.subr.bf16.mxu1 %v1115_v17 }
  0x72   :  { %936 = vmatpush3.bf16.msra.mxu0 %v1113_v16 }
  0x73   :  { %937 = vmatprep.subr.bf16.mxu0 %v1114_v18 }
  0x74   :  { %1032 = vmatpush3.bf16.msra.mxu1 %v1115_v17 }
  0x75   :  { %1033 = vmatprep.subr.bf16.mxu1 %v1118_v21 }
  0x76   :  { %938 = vmatpush3.bf16.msra.mxu0 %v1116_v19 }
  0x77   :  { %939 = vmatprep.subr.bf16.mxu0 %v1117_v20 }
  0x78   :  { %1034 = vmatpush3.bf16.msra.mxu1 %v1118_v21 }
  0x79   :  { %1035 = vmatprep.subr.bf16.mxu1 %v1123_v25 }
  0x7a   :  { %940 = vmatpush3.bf16.msra.mxu0 %v1119_v23 }
  0x7c   :  { %1036 = vmatpush3.bf16.msra.mxu1 %v1123_v25 }
  0x7d   :  { %478 = vmatmul.mubr.bf16.vlgmr.msra.gmra.mrb[0].mxu0 %v1120_v26  ;;  %1053 = vmatprep.subr.bf16.mxu1 %v1153_v34 }
  0x7e   :  { %485 = vmatprep.mubr.bf16.mxu0 %v1126_v27 }
  0x7f   :  { %1038 = vmatmul.mubr.bf16.vlgmr.msra.gmra.mrb[0].mxu1 %v1125_v28 }
  0x80   :  { %1041 = vmatprep.mubr.bf16.mxu1 %v1132_v29  ;;  %1054 = vmatpush3.bf16.msra.mxu1 %v1153_v34 }
  0x81   :  { %1055 = vmatprep.subr.bf16.mxu1 %v1154_v36 }
  0x84   :  { %1056 = vmatpush3.bf16.msra.mxu1 %v1154_v36 }
  0x85   :  { %486 = vmatmul.mubr.bf16.gmra.mrb[4].mxu0 %v1128_v30  ;;  %1057 = vmatprep.subr.bf16.mxu1 %v1155_v38 }
  0x86   :  { %493 = vmatprep.mubr.bf16.mxu0 %v1129_v31 }
  0x87   :  { %1042 = vmatmul.mubr.bf16.gmra.mrb[4].mxu1 %v1133_v32 }
  0x88   :  { %1045 = vmatprep.mubr.bf16.mxu1 %v1140_v33  ;;  %1058 = vmatpush3.bf16.msra.mxu1 %v1155_v38 }
  0x89   :  { %1059 = vmatprep.subr.bf16.mxu1 %v1156_v51 }
  0x8c   :  { %1060 = vmatpush3.bf16.msra.mxu1 %v1156_v51 }
  0x8d   :  { %494 = vmatmul.mubr.bf16.gmra.mrb[8].mxu0 %v1131_v35  ;;  %1061 = vmatprep.subr.bf16.mxu1 %v1157_v52 }
  0x8e   :  { %501 = vmatprep.mubr.bf16.mxu0 %v1134_v37 }
  0x8f   :  { %1046 = vmatmul.mubr.bf16.gmra.mrb[8].mxu1 %v1141_v39 }
  0x90   :  { %1049 = vmatprep.mubr.bf16.mxu1 %v1148_v40  ;;  %1062 = vmatpush3.bf16.msra.mxu1 %v1157_v52 }
  0x91   :  { %1063 = vmatprep.subr.bf16.mxu1 %v1158_v53 }
  0x94   :  { %1064 = vmatpush3.bf16.msra.mxu1 %v1158_v53 }
  0x95   :  { %502 = vmatmul.mubr.bf16.gmra.mrb[12].mxu0 %v1136_v41  ;;  %1065 = vmatprep.subr.bf16.mxu1 %v1159_v54 }
  0x96   :  { %509 = vmatprep.mubr.bf16.mxu0 %v1137_v42 }
  0x97   :  { %1050 = vmatmul.mubr.bf16.gmra.mrb[12].mxu1 %v1149_v43 }
  0x98   :  { %1066 = vmatpush3.bf16.msra.mxu1 %v1159_v54 }
  0x99   :  { %1067 = vmatprep.subr.bf16.mxu1 %v1160_v55 }
  0x9c   :  { %1068 = vmatpush3.bf16.msra.mxu1 %v1160_v55 }
  0x9d   :  { %510 = vmatmul.mubr.bf16.gmra.mrb[16].mxu0 %v1139_v44 }
  0x9e   :  { %517 = vmatprep.mubr.bf16.mxu0 %v1142_v45 }
  0xa5   :  { %518 = vmatmul.mubr.bf16.gmra.mrb[20].mxu0 %v1144_v46 }
  0xa6   :  { %525 = vmatprep.mubr.bf16.mxu0 %v1145_v47 }
  0xad   :  { %526 = vmatmul.mubr.bf16.gmra.mrb[24].mxu0 %v1147_v48 }
  0xae   :  { %533 = vmatprep.mubr.bf16.mxu0 %v1150_v49 }
  0xb5   :  { %534 = vmatmul.mubr.bf16.gmra.mrb[28].mxu0 %v1152_v50 }
 0x150   :  { %v941_v56 = vpop.f32.mrb[0].mxu0 }
 0x151   :  { %v942_v57 = vpop.f32.mrb[1].mxu0 }
 0x152   :  { %v943_v59 = vadd.f32 %v942_v57, %v941_v56  ;;  %v944_v60 = vpop.f32.mrb[2].mxu0  ;;  %v1039_v62 = vpop.f32.mrb[0].mxu1 }
 0x153   :  { %v945_v61 = vpop.f32.mrb[3].mxu0  ;;  %v576_v1 = vpop.f32.mrb[1].mxu1 }
 0x154   :  { %v946_v63 = vadd.f32 %v945_v61, %v944_v60  ;;  %v480_v0 = vadd.f32 %v943_v59, %v1403_v58  ;;  %v1040_v2 = vpop.f32.mrb[2].mxu1 }
 0x155   :  { %v579_v5 = vpop.f32.mrb[3].mxu1 }
 0x156   :  { %v577_v3 = vadd.f32 %v576_v1, %v480_v0  ;;  %v483_v4 = vadd.f32 %v946_v63, %v1403_v58 }
 0x158   :  { %v580_v6 = vadd.f32 %v579_v5, %v483_v4  ;;  %v947_v7 = vpop.f32.mrb[4].mxu0  ;;  %v639_v9 = vmax.f32 %v577_v3, 0.0 }
 0x159   :  { %v948_v8 = vpop.f32.mrb[5].mxu0 }
 0x15a   :  { %v640_v10 = vmax.f32 %v580_v6, 0.0  ;;  %v949_v11 = vadd.f32 %v948_v8, %v947_v7  ;;  %v950_v12 = vpop.f32.mrb[6].mxu0  ;;  %v1043_v14 = vpop.f32.mrb[4].mxu1 }
 0x15b   :  { %v951_v13 = vpop.f32.mrb[7].mxu0  ;;  %v592_v18 = vpop.f32.mrb[5].mxu1 }
 0x15c   :  { %v655_v15 = vpack.c.bf16 %v640_v10, %v639_v9  ;;  %v488_v16 = vadd.f32 %v949_v11, %v1403_v58  ;;  %v952_v17 = vadd.f32 %v951_v13, %v950_v12  ;;  %v1044_v19 = vpop.f32.mrb[6].mxu1 }
 0x15d   :  { %v595_v22 = vpop.f32.mrb[7].mxu1 }
 0x15e   :  { %v585_v20 = vadd.f32 %v1039_v62, %v488_v16  ;;  %v491_v21 = vadd.f32 %v952_v17, %v1403_v58  ;;  %1069 = vmatprep.mubr.bf16.mxu1 %v655_v15 }
 0x160   :  { %v588_v23 = vadd.f32 %v1040_v2, %v491_v21  ;;  %v953_v24 = vpop.f32.mrb[8].mxu0  ;;  %v641_v26 = vmax.f32 %v585_v20, 0.0 }
 0x161   :  { %v954_v25 = vpop.f32.mrb[9].mxu0 }
 0x162   :  { %v642_v27 = vmax.f32 %v588_v23, 0.0  ;;  %v955_v28 = vadd.f32 %v954_v25, %v953_v24  ;;  %v956_v29 = vpop.f32.mrb[10].mxu0  ;;  %v1047_v31 = vpop.f32.mrb[8].mxu1 }
 0x163   :  { %v957_v30 = vpop.f32.mrb[11].mxu0  ;;  %v608_v35 = vpop.f32.mrb[9].mxu1 }
 0x164   :  { %v656_v32 = vpack.c.bf16 %v642_v27, %v641_v26  ;;  %v958_v33 = vadd.f32 %v957_v30, %v956_v29  ;;  %v496_v34 = vadd.f32 %v955_v28, %v1403_v58  ;;  %v1048_v36 = vpop.f32.mrb[10].mxu1 }
 0x165   :  { %v611_v39 = vpop.f32.mrb[11].mxu1 }
 0x166   :  { %v593_v37 = vadd.f32 %v592_v18, %v496_v34  ;;  %1070 = vmatmul.mubr.bf16.vlgmr.msra.gmra.mrb[16].mxu1 %v656_v32  ;;  %v499_v38 = vadd.f32 %v958_v33, %v1403_v58 }
 0x168   :  { %v596_v40 = vadd.f32 %v595_v22, %v499_v38  ;;  %v959_v41 = vpop.f32.mrb[12].mxu0  ;;  %v643_v43 = vmax.f32 %v593_v37, 0.0 }
 0x169   :  { %v960_v42 = vpop.f32.mrb[13].mxu0 }
 0x16a   :  { %v644_v44 = vmax.f32 %v596_v40, 0.0  ;;  %v961_v45 = vadd.f32 %v960_v42, %v959_v41  ;;  %v962_v46 = vpop.f32.mrb[14].mxu0  ;;  %v1411_v48 = vpop.f32.mrb[12].mxu1 }
 0x16b   :  { %v963_v47 = vpop.f32.mrb[15].mxu0  ;;  %v624_v52 = vpop.f32.mrb[13].mxu1 }
 0x16c   :  { %v657_v49 = vpack.c.bf16 %v644_v44, %v643_v43  ;;  %v504_v50 = vadd.f32 %v961_v45, %v1403_v58  ;;  %v964_v51 = vadd.f32 %v963_v47, %v962_v46  ;;  %v1052_v53 = vpop.f32.mrb[14].mxu1 }
 0x16d   :  { %v627_v56 = vpop.f32.mrb[15].mxu1 }
 0x16e   :  { %v601_v54 = vadd.f32 %v1043_v14, %v504_v50  ;;  %v507_v55 = vadd.f32 %v964_v51, %v1403_v58  ;;  %1073 = vmatprep.mubr.bf16.mxu1 %v657_v49  ;;  %v916_v51 = vld [vmem:[#allocation10] ss:$0 sm:$0xff] }
 0x170   :  { %v604_v57 = vadd.f32 %v1044_v19, %v507_v55  ;;  %v965_v59 = vpop.f32.mrb[16].mxu0  ;;  %v645_v61 = vmax.f32 %v601_v54, 0.0 }
 0x171   :  { %v966_v60 = vpop.f32.mrb[17].mxu0 }
 0x172   :  { %v646_v62 = vmax.f32 %v604_v57, 0.0  ;;  %v967_v63 = vadd.f32 %v966_v60, %v965_v59  ;;  %v968_v0 = vpop.f32.mrb[18].mxu0 }
 0x173   :  { %v969_v1 = vpop.f32.mrb[19].mxu0 }
 0x174   :  { %v970_v2 = vadd.f32 %v969_v1, %v968_v0  ;;  %v512_v3 = vadd.f32 %v967_v63, %v1403_v58  ;;  %v658_v4 = vpack.c.bf16 %v646_v62, %v645_v61 }
 0x176   :  { %v609_v5 = vadd.f32 %v608_v35, %v512_v3  ;;  %1074 = vmatmul.mubr.bf16.gmra.mrb[20].mxu1 %v658_v4  ;;  %v515_v6 = vadd.f32 %v970_v2, %v1403_v58 }
 0x178   :  { %v612_v7 = vadd.f32 %v611_v39, %v515_v6  ;;  %v971_v8 = vpop.f32.mrb[20].mxu0  ;;  %v647_v10 = vmax.f32 %v609_v5, 0.0 }
 0x179   :  { %v972_v9 = vpop.f32.mrb[21].mxu0 }
 0x17a   :  { %v648_v11 = vmax.f32 %v612_v7, 0.0  ;;  %v973_v12 = vadd.f32 %v972_v9, %v971_v8  ;;  %v974_v13 = vpop.f32.mrb[22].mxu0 }
 0x17b   :  { %v975_v14 = vpop.f32.mrb[23].mxu0 }
 0x17c   :  { %v659_v15 = vpack.c.bf16 %v648_v11, %v647_v10  ;;  %v520_v16 = vadd.f32 %v973_v12, %v1403_v58  ;;  %v976_v17 = vadd.f32 %v975_v14, %v974_v13 }
 0x17e   :  { %v617_v18 = vadd.f32 %v1047_v31, %v520_v16  ;;  %v523_v19 = vadd.f32 %v976_v17, %v1403_v58  ;;  %1077 = vmatprep.mubr.bf16.mxu1 %v659_v15 }
 0x180   :  { %v620_v20 = vadd.f32 %v1048_v36, %v523_v19  ;;  %v977_v21 = vpop.f32.mrb[24].mxu0  ;;  %v649_v23 = vmax.f32 %v617_v18, 0.0 }
 0x181   :  { %v978_v22 = vpop.f32.mrb[25].mxu0 }
 0x182   :  { %v650_v24 = vmax.f32 %v620_v20, 0.0  ;;  %v979_v25 = vadd.f32 %v978_v22, %v977_v21  ;;  %v980_v26 = vpop.f32.mrb[26].mxu0 }
 0x183   :  { %v981_v27 = vpop.f32.mrb[27].mxu0 }
 0x184   :  { %v982_v28 = vadd.f32 %v981_v27, %v980_v26  ;;  %v528_v29 = vadd.f32 %v979_v25, %v1403_v58  ;;  %v660_v30 = vpack.c.bf16 %v650_v24, %v649_v23 }
 0x186   :  { %v625_v32 = vadd.f32 %v624_v52, %v528_v29  ;;  %1078 = vmatmul.mubr.bf16.gmra.mrb[24].mxu1 %v660_v30  ;;  %v531_v33 = vadd.f32 %v982_v28, %v1403_v58 }
 0x188   :  { %v628_v31 = vadd.f32 %v627_v56, %v531_v33  ;;  %v983_v34 = vpop.f32.mrb[28].mxu0  ;;  %v651_v37 = vmax.f32 %v625_v32, 0.0 }
 0x189   :  { %v984_v35 = vpop.f32.mrb[29].mxu0 }
 0x18a   :  { %v652_v36 = vmax.f32 %v628_v31, 0.0  ;;  %v985_v38 = vadd.f32 %v984_v35, %v983_v34  ;;  %v986_v39 = vpop.f32.mrb[30].mxu0 }
 0x18b   :  { %v987_v40 = vpop.f32.mrb[31].mxu0 }
 0x18c   :  { %v661_v41 = vpack.c.bf16 %v652_v36, %v651_v37  ;;  %v536_v42 = vadd.f32 %v985_v38, %v1403_v58  ;;  %v988_v43 = vadd.f32 %v987_v40, %v986_v39 }
 0x18e   :  { %v633_v44 = vadd.f32 %v1411_v48, %v536_v42  ;;  %v539_v45 = vadd.f32 %v988_v43, %v1403_v58  ;;  %1081 = vmatprep.mubr.bf16.mxu1 %v661_v41 }
 0x190   :  { %v636_v46 = vadd.f32 %v1052_v53, %v539_v45  ;;  %v653_v47 = vmax.f32 %v633_v44, 0.0 }
 0x192   :  { %v654_v49 = vmax.f32 %v636_v46, 0.0 }
 0x194   :  { %v662_v50 = vpack.c.bf16 %v654_v49, %v653_v47 }
 0x196   :  { %1082 = vmatmul.mubr.bf16.gmra.mrb[28].mxu1 %v662_v50 }
 0x239   :  { %v1071_v52 = vpop.f32.mrb[16].mxu1 }
 0x23a   :  { %v777_v54 = vadd.f32 %v1071_v52, %v916_v51  ;;  %v768_v55 = vpop.f32.mrb[17].mxu1 }
 0x23b   :  { %v769_v56 = vadd.f32 %v916_v51, %v768_v55  ;;  %v1072_v57 = vpop.f32.mrb[18].mxu1 }
 0x23c   :  { %834 = vst.msk [vmem:[#allocation11 + $0x10] sm:$0xff] %vm831_vm0, %v777_v54  ;;  %v780_v59 = vadd.f32 %v1072_v57, %v916_v51  ;;  %v771_v60 = vpop.f32.mrb[19].mxu1 }
 0x23d   :  { %832 = vst.msk [vmem:[#allocation11] sm:$0xff] %vm831_vm0, %v769_v56  ;;  %v772_v58 = vadd.f32 %v916_v51, %v771_v60 }
 0x23e   :  { %835 = vst.msk [vmem:[#allocation11 + $0x18] sm:$0xff] %vm831_vm0, %v780_v59 }
 0x23f   :  { %833 = vst.msk [vmem:[#allocation11 + $0x8] sm:$0xff] %vm831_vm0, %v772_v58 }
 0x249   :  { %v1075_v48 = vpop.f32.mrb[20].mxu1 }
 0x24a   :  { %v793_v53 = vadd.f32 %v1075_v48, %v916_v51  ;;  %v784_v61 = vpop.f32.mrb[21].mxu1 }
 0x24b   :  { %v785_v62 = vadd.f32 %v916_v51, %v784_v61  ;;  %v1076_v63 = vpop.f32.mrb[22].mxu1 }
 0x24c   :  { %838 = vst.msk [vmem:[#allocation11 + $0x30] sm:$0xff] %vm831_vm0, %v793_v53  ;;  %v796_v0 = vadd.f32 %v1076_v63, %v916_v51  ;;  %v787_v1 = vpop.f32.mrb[23].mxu1 }
 0x24d   :  { %836 = vst.msk [vmem:[#allocation11 + $0x20] sm:$0xff] %vm831_vm0, %v785_v62  ;;  %v788_v2 = vadd.f32 %v916_v51, %v787_v1 }
 0x24e   :  { %839 = vst.msk [vmem:[#allocation11 + $0x38] sm:$0xff] %vm831_vm0, %v796_v0 }
 0x24f   :  { %837 = vst.msk [vmem:[#allocation11 + $0x28] sm:$0xff] %vm831_vm0, %v788_v2 }
 0x259   :  { %v1079_v3 = vpop.f32.mrb[24].mxu1 }
 0x25a   :  { %v809_v4 = vadd.f32 %v1079_v3, %v916_v51  ;;  %v800_v5 = vpop.f32.mrb[25].mxu1 }
 0x25b   :  { %v801_v6 = vadd.f32 %v916_v51, %v800_v5  ;;  %v1080_v7 = vpop.f32.mrb[26].mxu1 }
 0x25c   :  { %842 = vst.msk [vmem:[#allocation11 + $0x50] sm:$0xff] %vm831_vm0, %v809_v4  ;;  %v812_v8 = vadd.f32 %v1080_v7, %v916_v51  ;;  %v803_v9 = vpop.f32.mrb[27].mxu1 }
 0x25d   :  { %840 = vst.msk [vmem:[#allocation11 + $0x40] sm:$0xff] %vm831_vm0, %v801_v6  ;;  %v804_v10 = vadd.f32 %v916_v51, %v803_v9 }
 0x25e   :  { %843 = vst.msk [vmem:[#allocation11 + $0x58] sm:$0xff] %vm831_vm0, %v812_v8 }
 0x25f   :  { %841 = vst.msk [vmem:[#allocation11 + $0x48] sm:$0xff] %vm831_vm0, %v804_v10 }
 0x269   :  { %v1083_v11 = vpop.f32.mrb[28].mxu1 }
 0x26a   :  { %v825_v12 = vadd.f32 %v1083_v11, %v916_v51  ;;  %v816_v13 = vpop.f32.mrb[29].mxu1 }
 0x26b   :  { %v817_v14 = vadd.f32 %v916_v51, %v816_v13  ;;  %v1084_v15 = vpop.f32.mrb[30].mxu1 }
 0x26c   :  { %846 = vst.msk [vmem:[#allocation11 + $0x70] sm:$0xff] %vm831_vm0, %v825_v12  ;;  %v828_v16 = vadd.f32 %v1084_v15, %v916_v51  ;;  %v819_v17 = vpop.f32.mrb[31].mxu1 }
 0x26d   :  { %844 = vst.msk [vmem:[#allocation11 + $0x60] sm:$0xff] %vm831_vm0, %v817_v14  ;;  %v820_v18 = vadd.f32 %v916_v51, %v819_v17 }
 0x26e   :  { %847 = vst.msk [vmem:[#allocation11 + $0x78] sm:$0xff] %vm831_vm0, %v828_v16 }
 0x26f   :  { %845 = vst.msk [vmem:[#allocation11 + $0x68] sm:$0xff] %vm831_vm0, %v820_v18 }
 0x270   :  { %1282 = shalt.err (!%p1279_p2)
}
 0x271   :  { %s1283_s7 = scalar_lea.hbm %s1457_s5, 2048 }
 0x272   :  { %p1284_p3 = scmp.ne.s32.totalorder %s1457_s5, %s1283_s7  ;;  %p1287_p4 = scmp.lt.u32.totalorder %s1283_s7, %s1457_s5 }
 0x274   :  { %p1289_p5 = pnand %p1287_p4, %p1284_p3 }
 0x276   :  { %1292 = shalt.err (!%p1289_p5)
}
 0x277   :  { %s1311_s13 = smov 128   ;;  %s1312_s14 = smov 8  }
 0x278   :  { %859 = dma.vmem_to_hbm [thread:$0]  %s854_s28, 2048, %s1457_s5, [#allocation4], %s1311_s13, %s1311_s13, %s1312_s14  }
 0x279   :  { %1299 = dma.done.wait [#allocation4], 2048  }
 0x27a   :  { %1300 = vsyncadd [#allocation4], 4294965248 }
 0x27b   :  { %863 = vsyncpa [#allocation3], 1 }
 0x27c   :  { %864 = vsyncpa [#allocation6], 1 }
 0x27d   :  { %865 = vsyncpa [#allocation9], 1 }
 0x27e   :  { %866 = vsyncpa [#allocation4], 1 }

</bundles_post_ra>
